<compile_context>
chip_gen: v5e
topology: v5e:2x2
jax: 0.10.0
libtpu: 0.0.40
codegen_flags: <defaults>
</compile_context>

<pallas_src>
import functools

import jax
import jax.numpy as jnp
from jax.experimental import pallas as pl
from jax.experimental.pallas import tpu as pltpu


# --------------------------------------------------------------------------
# Per-(image, layer) grid-step kernel.  The activation lives in `act_ref`
# (bf16, with a 1-pixel zero halo) for all 16 layers of one image.
# --------------------------------------------------------------------------
def _drcnn_layer_kernel(x_ref, w_ref, shift_ref, hres_ref, fusion_ref,
                        act_ref, *opt_scratch,
                        H, W, C, XP, n_layers, rows_per_strip):
    # x_ref      : (1, H, W, C)       f32  channel-padded H_ini (NHWC)
    # w_ref      : (1, 9*C, C)        bf16 this layer's im2col weights (BN scale folded in)
    # shift_ref  : (1, 1, C)          f32  folded BN shift / conv bias
    # hres_ref   : (1, H, W, C)       f32  H_res        (written only at l == last)
    # fusion_ref : (1, H, W, C)       f32  H_ini + H_res (written only at l == last)
    # act_ref    : (H+2, W+2*XP, C)   bf16 resident activation + zero halo; the
    #              image columns live at the packed-sublane-aligned offset XP.
    # opt_scratch: () or ((H, W, C) bf16 "next activation") when multi-strip.
    nxt_ref = opt_scratch[0] if opt_scratch else None
    l = pl.program_id(1)
    last = n_layers - 1
    n_strips = -(-H // rows_per_strip)

    # ---- per-image init: zero the halo border only, place x in the interior.
    @pl.when(l == 0)
    def _init_activation():
        zcol = jnp.zeros((H + 2, XP, C), act_ref.dtype)
        act_ref[:, :XP, :] = zcol                      # left halo band  (aligned)
        act_ref[:, XP + W:, :] = zcol                  # right halo band (aligned)
        zrow = jnp.zeros((1, W + 2 * XP, C), act_ref.dtype)
        act_ref[0:1, :, :] = zrow                      # top halo row
        act_ref[H + 1:H + 2, :, :] = zrow              # bottom halo row
        act_ref[1:H + 1, XP:XP + W, :] = x_ref[0].astype(act_ref.dtype)

    wmat = w_ref[0]        # (9C, C) bf16
    shift = shift_ref[0]   # (1, C)  f32

    # ---- one 3x3 conv layer = strip-tiled im2col matmul (bf16 x bf16 -> f32).
    for s in range(n_strips):
        r0 = s * rows_per_strip
        rows = min(rows_per_strip, H - r0)

        taps = []
        for dy in range(3):
            # One halo-row read per dy; the 3 dx taps are slices of this value.
            row_blk = act_ref[r0 + dy:r0 + dy + rows, XP - 1:XP + W + 1, :]
            for dx in range(3):
                taps.append(row_blk[:, dx:dx + W, :])          # (rows, W, C) bf16
        slab = jnp.concatenate(taps, axis=-1).reshape(rows * W, 9 * C)   # bf16
        y = jnp.dot(slab, wmat, preferred_element_type=jnp.float32) + shift

        @pl.when(l < last)                                     # conv1..15: ReLU
        def _store_hidden(y=y, r0=r0, rows=rows):
            ya = jnp.maximum(y, 0.0).reshape(rows, W, C).astype(act_ref.dtype)
            if n_strips == 1:
                act_ref[1:H + 1, XP:XP + W, :] = ya            # aligned writeback
            else:
                nxt_ref[r0:r0 + rows, :, :] = ya

        @pl.when(l == last)                                    # conv16: no BN/ReLU
        def _store_output(y=y, r0=r0, rows=rows):
            h_res = y.reshape(rows, W, C)
            hres_ref[0, r0:r0 + rows, :, :] = h_res
            fusion_ref[0, r0:r0 + rows, :, :] = x_ref[0, r0:r0 + rows, :, :] + h_res

    if n_strips > 1:
        @pl.when(l < last)
        def _commit_next_activation():
            act_ref[1:H + 1, XP:XP + W, :] = nxt_ref[:, :, :]


def drcnn_stack(x_pad, w_stack, shift_stack):
    """Run the fused 16-layer conv stack. x_pad: (B, H, W, Cpad) f32 NHWC."""
    B, H, W, C = x_pad.shape
    NL = w_stack.shape[0]
    assert W % 8 == 0, "W must be a multiple of 8 for the in-kernel reshapes"

    XP = 16                               # packed-sublane-aligned interior offset
    TARGET_TM = 1024                      # pixels per matmul strip (amortizes MXU weight push)
    rows_per_strip = max(1, min(H, TARGET_TM // W))
    n_strips = -(-H // rows_per_strip)

    scratch = [pltpu.VMEM((H + 2, W + 2 * XP, C), jnp.bfloat16)]
    if n_strips > 1:                      # multi-strip layers need a ping buffer
        scratch.append(pltpu.VMEM((H, W, C), jnp.bfloat16))

    kernel = functools.partial(_drcnn_layer_kernel, H=H, W=W, C=C, XP=XP,
                               n_layers=NL, rows_per_strip=rows_per_strip)
    return pl.pallas_call(
        kernel,
        out_shape=(jax.ShapeDtypeStruct((B, H, W, C), jnp.float32),
                   jax.ShapeDtypeStruct((B, H, W, C), jnp.float32)),
        grid=(B, NL),                     # batch (parallel) x layer (arbitrary)
        in_specs=[
            pl.BlockSpec((1, H, W, C), lambda b, l: (b, 0, 0, 0)),    # H_ini (resident per b)
            pl.BlockSpec((1, 9 * C, C), lambda b, l: (l, 0, 0)),      # per-layer weights
            pl.BlockSpec((1, 1, C), lambda b, l: (l, 0, 0)),          # per-layer shift
        ],
        out_specs=(
            pl.BlockSpec((1, H, W, C), lambda b, l: (b, 0, 0, 0)),    # H_res
            pl.BlockSpec((1, H, W, C), lambda b, l: (b, 0, 0, 0)),    # fusion_out
        ),
        scratch_shapes=scratch,
        compiler_params=pltpu.CompilerParams(
            dimension_semantics=("parallel", "arbitrary"),
            vmem_limit_bytes=48 * 1024 * 1024),
    )(x_pad, w_stack, shift_stack)


# --------------------------------------------------------------------------
# Parameter construction (deterministic, synthetic), stacked + channel padded
# --------------------------------------------------------------------------
def make_params(key, in_channels, mid_channels, out_channels):
    """Stacked im2col weights (BN scale folded in, f32 fold then bf16 cast)
    plus folded shift for the 16 conv layers.

    Layers 2..15 have BatchNorm2d (eval semantics):
      scale = gamma / sqrt(var + eps)
      w_folded = w * scale (along Cout);  shift = b*scale + beta - mean*scale
    Layers 1 and 16 have no BN: w unchanged, shift = conv bias.
    Layer 1's Cin and layer 16's Cout are zero-padded up to mid_channels so all
    layers share one (9*C, C) weight shape (padded outputs stay exactly zero).
    """
    eps = 1e-5
    n_layers = 16
    cpad = mid_channels
    assert in_channels <= cpad and out_channels <= cpad
    cins = [in_channels] + [mid_channels] * 15
    couts = [mid_channels] * 15 + [out_channels]
    has_bn = [False] + [True] * 14 + [False]

    keys = jax.random.split(key, n_layers)
    w_list, sh_list = [], []
    for i in range(n_layers):
        kw, kb, kg, kbe, km, kv = jax.random.split(keys[i], 6)
        cin, cout = cins[i], couts[i]
        fan_in = 9 * cin
        w = jax.random.normal(kw, (3, 3, cin, cout), jnp.float32) * (2.0 / fan_in) ** 0.5
        b = 0.01 * jax.random.normal(kb, (cout,), jnp.float32)
        if has_bn[i]:
            gamma = 1.0 + 0.1 * jax.random.normal(kg, (cout,), jnp.float32)
            beta = 0.05 * jax.random.normal(kbe, (cout,), jnp.float32)
            mean = 0.05 * jax.random.normal(km, (cout,), jnp.float32)
            var = 1.0 + 0.1 * jnp.abs(jax.random.normal(kv, (cout,), jnp.float32))
            scale = gamma / jnp.sqrt(var + eps)
            w = w * scale[None, None, None, :]          # fold BN scale into weights (f32)
            shift = b * scale + beta - mean * scale
        else:
            shift = b
        w_pad = jnp.zeros((3, 3, cpad, cpad), jnp.float32).at[:, :, :cin, :cout].set(w)
        sh_pad = jnp.zeros((cpad,), jnp.float32).at[:cout].set(shift)
        w_list.append(w_pad.reshape(9 * cpad, cpad))
        sh_list.append(sh_pad)

    return dict(
        w=jnp.stack(w_list).astype(jnp.bfloat16),   # (16, 9*cpad, cpad) bf16
        shift=jnp.stack(sh_list)[:, None, :],       # (16, 1, cpad) f32
    )


# --------------------------------------------------------------------------
# Full forward pass (matches Guided_DRCNN_Test.forward semantics)
# --------------------------------------------------------------------------
@functools.partial(jax.jit, static_argnames=("hp_ratio", "out_channels"))
def guided_drcnn_forward(params, batch_h, batch_m, batch_p, *, hp_ratio, out_channels):
    """batch_h: (B, C, h, w) NCHW; batch_p: (B, 1, H, W); batch_m unused.

    Returns (H_res, fusion_out), both (B, out_channels, H, W) NCHW.
    """
    del batch_m, batch_p  # only feed the CLAHE / guided-filter preprocessing (see TODOs)

    B, C, h, w = batch_h.shape
    H, W = h * hp_ratio, w * hp_ratio
    cpad = params["w"].shape[-1]

    # NHWC end-to-end: transpose the small low-res tensor once, upsample in NHWC.
    x_lr = jnp.transpose(batch_h, (0, 2, 3, 1))
    h_ini = jax.image.resize(x_lr, (B, H, W, C), method="bicubic")
    x_pad = jnp.pad(h_ini, ((0, 0), (0, 0), (0, 0), (0, cpad - C))).astype(jnp.float32)

    hres_p, fusion_p = drcnn_stack(x_pad, params["w"], params["shift"])

    h_res = jnp.transpose(hres_p[..., :out_channels], (0, 3, 1, 2))
    fusion_out = jnp.transpose(fusion_p[..., :out_channels], (0, 3, 1, 2))
    return h_res, fusion_out


# --------------------------------------------------------------------------
if __name__ == "__main__":
    in_channels, mid_channels, out_channels = 4, 32, 4
    hp_ratio = 2
    B, h, w = 2, 8, 8                 # low-res hyperspectral input
    H, W = h * hp_ratio, w * hp_ratio

    key = jax.random.PRNGKey(0)
    k_h, k_m, k_p, k_param = jax.random.split(key, 4)
    batch_h = jax.random.uniform(k_h, (B, in_channels, h, w), jnp.float32)
    batch_m = jax.random.uniform(k_m, (B, in_channels, H, W), jnp.float32)
    batch_p = jax.random.uniform(k_p, (B, 1, H, W), jnp.float32)

    params = make_params(k_param, in_channels, mid_channels, out_channels)

    H_res, fusion_out = guided_drcnn_forward(
        params, batch_h, batch_m, batch_p,
        hp_ratio=hp_ratio, out_channels=out_channels)
    jax.block_until_ready((H_res, fusion_out))

    assert H_res.shape == (B, out_channels, H, W)
    assert fusion_out.shape == (B, out_channels, H, W)
    assert bool(jnp.all(jnp.isfinite(H_res))) and bool(jnp.all(jnp.isfinite(fusion_out)))
    print("KERNEL_OK")
</pallas_src>

<mosaic_0001>
module attributes {stable_mosaic.version = 11 : i64} {
  func.func @_drcnn_layer_kernel(%arg0: i32, %arg1: i32, %arg2: memref<1x16x16x32xf32, #tpu.memory_space<vmem>>, %arg3: memref<1x288x32xbf16, #tpu.memory_space<vmem>>, %arg4: memref<1x1x32xf32, #tpu.memory_space<vmem>>, %arg5: memref<1x16x16x32xf32, #tpu.memory_space<vmem>>, %arg6: memref<1x16x16x32xf32, #tpu.memory_space<vmem>>, %arg7: memref<18x48x32xbf16, #tpu.memory_space<vmem>>) attributes {dimension_semantics = [#tpu.dimension_semantics<parallel>, #tpu.dimension_semantics<arbitrary>], iteration_bounds = array<i64: 2, 16>, scalar_prefetch = 0 : i64, scratch_operands = 1 : i64, tpu.core_type = #tpu.core_type<tc>, window_params = [{transform_indices = @transform_0, window_bounds = array<i64: 1, 16, 16, 32>}, {transform_indices = @transform_1, window_bounds = array<i64: 1, 288, 32>}, {transform_indices = @transform_2, window_bounds = array<i64: 1, 1, 32>}, {transform_indices = @transform_3, window_bounds = array<i64: 1, 16, 16, 32>}, {transform_indices = @transform_4, window_bounds = array<i64: 1, 16, 16, 32>}]} {
    %c0_i32 = arith.constant 0 : i32
    %0 = arith.cmpi eq, %arg1, %c0_i32 : i32
    %1 = arith.extui %0 : i1 to i32
    %c0_i32_0 = arith.constant 0 : i32
    %2 = arith.cmpi ne, %1, %c0_i32_0 : i32
    scf.if %2 {
      %cst_15 = arith.constant 0.000000e+00 : bf16
      %30 = vector.broadcast %cst_15 : bf16 to vector<18x16x32xbf16>
      %c0_16 = arith.constant 0 : index
      %c0_17 = arith.constant 0 : index
      %c0_18 = arith.constant 0 : index
      %31 = vector.load %arg7[%c0_16, %c0_17, %c0_18] : memref<18x48x32xbf16, #tpu.memory_space<vmem>>, vector<18x16x32xbf16>
      tpu.vector_store %arg7[%c0_16, %c0_17, %c0_18], %30 {strides = array<i32>} : memref<18x48x32xbf16, #tpu.memory_space<vmem>>, vector<18x16x32xbf16>,
      %c0_19 = arith.constant 0 : index
      %c32 = arith.constant 32 : index
      %c0_20 = arith.constant 0 : index
      %32 = vector.load %arg7[%c0_19, %c32, %c0_20] : memref<18x48x32xbf16, #tpu.memory_space<vmem>>, vector<18x16x32xbf16>
      tpu.vector_store %arg7[%c0_19, %c32, %c0_20], %30 {strides = array<i32>} : memref<18x48x32xbf16, #tpu.memory_space<vmem>>, vector<18x16x32xbf16>,
      %cst_21 = arith.constant 0.000000e+00 : bf16
      %33 = vector.broadcast %cst_21 : bf16 to vector<1x48x32xbf16>
      %c0_22 = arith.constant 0 : index
      %c0_23 = arith.constant 0 : index
      %c0_24 = arith.constant 0 : index
      %34 = vector.load %arg7[%c0_22, %c0_23, %c0_24] : memref<18x48x32xbf16, #tpu.memory_space<vmem>>, vector<1x48x32xbf16>
      tpu.vector_store %arg7[%c0_22, %c0_23, %c0_24], %33 {strides = array<i32>} : memref<18x48x32xbf16, #tpu.memory_space<vmem>>, vector<1x48x32xbf16>,
      %c17 = arith.constant 17 : index
      %c0_25 = arith.constant 0 : index
      %c0_26 = arith.constant 0 : index
      %35 = vector.load %arg7[%c17, %c0_25, %c0_26] : memref<18x48x32xbf16, #tpu.memory_space<vmem>>, vector<1x48x32xbf16>
      tpu.vector_store %arg7[%c17, %c0_25, %c0_26], %33 {strides = array<i32>} : memref<18x48x32xbf16, #tpu.memory_space<vmem>>, vector<1x48x32xbf16>,
      %c0_27 = arith.constant 0 : index
      %c0_28 = arith.constant 0 : index
      %c0_29 = arith.constant 0 : index
      %c0_30 = arith.constant 0 : index
      %36 = vector.load %arg2[%c0_27, %c0_28, %c0_29, %c0_30] : memref<1x16x16x32xf32, #tpu.memory_space<vmem>>, vector<1x16x16x32xf32>
      %37 = vector.shape_cast %36 : vector<1x16x16x32xf32> to vector<16x16x32xf32>
      %38 = arith.truncf %37 : vector<16x16x32xf32> to vector<16x16x32xbf16>
      %c1_31 = arith.constant 1 : index
      %c16 = arith.constant 16 : index
      %c0_32 = arith.constant 0 : index
      %39 = vector.load %arg7[%c1_31, %c16, %c0_32] : memref<18x48x32xbf16, #tpu.memory_space<vmem>>, vector<16x16x32xbf16>
      tpu.vector_store %arg7[%c1_31, %c16, %c0_32], %38 {strides = array<i32>} : memref<18x48x32xbf16, #tpu.memory_space<vmem>>, vector<16x16x32xbf16>,
    } else {
    }
    %c0 = arith.constant 0 : index
    %c0_1 = arith.constant 0 : index
    %c0_2 = arith.constant 0 : index
    %3 = vector.load %arg3[%c0, %c0_1, %c0_2] : memref<1x288x32xbf16, #tpu.memory_space<vmem>>, vector<1x288x32xbf16>
    %4 = vector.shape_cast %3 : vector<1x288x32xbf16> to vector<288x32xbf16>
    %c0_3 = arith.constant 0 : index
    %c0_4 = arith.constant 0 : index
    %c0_5 = arith.constant 0 : index
    %5 = vector.load %arg4[%c0_3, %c0_4, %c0_5] : memref<1x1x32xf32, #tpu.memory_space<vmem>>, vector<1x1x32xf32>
    %6 = vector.shape_cast %5 : vector<1x1x32xf32> to vector<1x32xf32>
    %c0_6 = arith.constant 0 : index
    %c15 = arith.constant 15 : index
    %c0_7 = arith.constant 0 : index
    %7 = vector.load %arg7[%c0_6, %c15, %c0_7] : memref<18x48x32xbf16, #tpu.memory_space<vmem>>, vector<16x18x32xbf16>
    %8 = vector.extract_strided_slice %7 {offsets = [0, 0, 0], sizes = [16, 16, 32], strides = [1, 1, 1]} : vector<16x18x32xbf16> to vector<16x16x32xbf16>
    %9 = vector.extract_strided_slice %7 {offsets = [0, 1, 0], sizes = [16, 16, 32], strides = [1, 1, 1]} : vector<16x18x32xbf16> to vector<16x16x32xbf16>
    %10 = vector.extract_strided_slice %7 {offsets = [0, 2, 0], sizes = [16, 16, 32], strides = [1, 1, 1]} : vector<16x18x32xbf16> to vector<16x16x32xbf16>
    %c1 = arith.constant 1 : index
    %c15_8 = arith.constant 15 : index
    %c0_9 = arith.constant 0 : index
    %11 = vector.load %arg7[%c1, %c15_8, %c0_9] : memref<18x48x32xbf16, #tpu.memory_space<vmem>>, vector<16x18x32xbf16>
    %12 = vector.extract_strided_slice %11 {offsets = [0, 0, 0], sizes = [16, 16, 32], strides = [1, 1, 1]} : vector<16x18x32xbf16> to vector<16x16x32xbf16>
    %13 = vector.extract_strided_slice %11 {offsets = [0, 1, 0], sizes = [16, 16, 32], strides = [1, 1, 1]} : vector<16x18x32xbf16> to vector<16x16x32xbf16>
    %14 = vector.extract_strided_slice %11 {offsets = [0, 2, 0], sizes = [16, 16, 32], strides = [1, 1, 1]} : vector<16x18x32xbf16> to vector<16x16x32xbf16>
    %c2 = arith.constant 2 : index
    %c15_10 = arith.constant 15 : index
    %c0_11 = arith.constant 0 : index
    %15 = vector.load %arg7[%c2, %c15_10, %c0_11] : memref<18x48x32xbf16, #tpu.memory_space<vmem>>, vector<16x18x32xbf16>
    %16 = vector.extract_strided_slice %15 {offsets = [0, 0, 0], sizes = [16, 16, 32], strides = [1, 1, 1]} : vector<16x18x32xbf16> to vector<16x16x32xbf16>
    %17 = vector.extract_strided_slice %15 {offsets = [0, 1, 0], sizes = [16, 16, 32], strides = [1, 1, 1]} : vector<16x18x32xbf16> to vector<16x16x32xbf16>
    %18 = vector.extract_strided_slice %15 {offsets = [0, 2, 0], sizes = [16, 16, 32], strides = [1, 1, 1]} : vector<16x18x32xbf16> to vector<16x16x32xbf16>
    %19 = tpu.concatenate %8, %9, %10, %12, %13, %14, %16, %17, %18 in 2 : vector<16x16x32xbf16>, vector<16x16x32xbf16>, vector<16x16x32xbf16>, vector<16x16x32xbf16>, vector<16x16x32xbf16>, vector<16x16x32xbf16>, vector<16x16x32xbf16>, vector<16x16x32xbf16>, vector<16x16x32xbf16> -> vector<16x16x288xbf16>
    %20 = vector.shape_cast %19 : vector<16x16x288xbf16> to vector<256x288xbf16>
    %cst = arith.constant dense<0.000000e+00> : vector<256x32xf32>
    %21 = tpu.matmul %20, %4, %cst {dimension_numbers = #tpu.dot_dimension_numbers<[1], [0], [0], [1], [0, 0, 1, 1], [], []>} : vector<256x288xbf16>, vector<288x32xbf16>, vector<256x32xf32> -> vector<256x32xf32>
    %22 = vector.broadcast %6 : vector<1x32xf32> to vector<256x32xf32>
    %23 = arith.addf %21, %22 : vector<256x32xf32>
    %c15_i32 = arith.constant 15 : i32
    %24 = arith.cmpi slt, %arg1, %c15_i32 : i32
    %25 = arith.extui %24 : i1 to i32
    %c0_i32_12 = arith.constant 0 : i32
    %26 = arith.cmpi ne, %25, %c0_i32_12 : i32
    scf.if %26 {
      %cst_15 = arith.constant 0.000000e+00 : f32
      %30 = vector.broadcast %cst_15 : f32 to vector<256x32xf32>
      %31 = arith.maximumf %23, %30 : vector<256x32xf32>
      %32 = vector.shape_cast %31 : vector<256x32xf32> to vector<16x16x32xf32>
      %33 = arith.truncf %32 : vector<16x16x32xf32> to vector<16x16x32xbf16>
      %c1_16 = arith.constant 1 : index
      %c16 = arith.constant 16 : index
      %c0_17 = arith.constant 0 : index
      %34 = vector.load %arg7[%c1_16, %c16, %c0_17] : memref<18x48x32xbf16, #tpu.memory_space<vmem>>, vector<16x16x32xbf16>
      tpu.vector_store %arg7[%c1_16, %c16, %c0_17], %33 {strides = array<i32>} : memref<18x48x32xbf16, #tpu.memory_space<vmem>>, vector<16x16x32xbf16>,
    } else {
    }
    %c15_i32_13 = arith.constant 15 : i32
    %27 = arith.cmpi eq, %arg1, %c15_i32_13 : i32
    %28 = arith.extui %27 : i1 to i32
    %c0_i32_14 = arith.constant 0 : i32
    %29 = arith.cmpi ne, %28, %c0_i32_14 : i32
    scf.if %29 {
      %30 = vector.shape_cast %23 : vector<256x32xf32> to vector<16x16x32xf32>
      %c0_15 = arith.constant 0 : index
      %c0_16 = arith.constant 0 : index
      %c0_17 = arith.constant 0 : index
      %c0_18 = arith.constant 0 : index
      %31 = vector.load %arg5[%c0_15, %c0_16, %c0_17, %c0_18] : memref<1x16x16x32xf32, #tpu.memory_space<vmem>>, vector<1x16x16x32xf32>
      %32 = vector.shape_cast %31 : vector<1x16x16x32xf32> to vector<16x16x32xf32>
      %33 = vector.shape_cast %30 : vector<16x16x32xf32> to vector<1x16x16x32xf32>
      tpu.vector_store %arg5[%c0_15, %c0_16, %c0_17, %c0_18], %33 {strides = array<i32>} : memref<1x16x16x32xf32, #tpu.memory_space<vmem>>, vector<1x16x16x32xf32>,
      %c0_19 = arith.constant 0 : index
      %c0_20 = arith.constant 0 : index
      %c0_21 = arith.constant 0 : index
      %c0_22 = arith.constant 0 : index
      %34 = vector.load %arg2[%c0_19, %c0_20, %c0_21, %c0_22] : memref<1x16x16x32xf32, #tpu.memory_space<vmem>>, vector<1x16x16x32xf32>
      %35 = vector.shape_cast %34 : vector<1x16x16x32xf32> to vector<16x16x32xf32>
      %36 = arith.addf %35, %30 : vector<16x16x32xf32>
      %c0_23 = arith.constant 0 : index
      %c0_24 = arith.constant 0 : index
      %c0_25 = arith.constant 0 : index
      %c0_26 = arith.constant 0 : index
      %37 = vector.load %arg6[%c0_23, %c0_24, %c0_25, %c0_26] : memref<1x16x16x32xf32, #tpu.memory_space<vmem>>, vector<1x16x16x32xf32>
      %38 = vector.shape_cast %37 : vector<1x16x16x32xf32> to vector<16x16x32xf32>
      %39 = vector.shape_cast %36 : vector<16x16x32xf32> to vector<1x16x16x32xf32>
      tpu.vector_store %arg6[%c0_23, %c0_24, %c0_25, %c0_26], %39 {strides = array<i32>} : memref<1x16x16x32xf32, #tpu.memory_space<vmem>>, vector<1x16x16x32xf32>,
    } else {
    }
    return
  }
  func.func @transform_0(%arg0: i32, %arg1: i32) -> (i32, i32, i32, i32) {
    %c0_i32 = arith.constant 0 : i32
    %c0_i32_0 = arith.constant 0 : i32
    %c0_i32_1 = arith.constant 0 : i32
    %c0_i32_2 = arith.constant 0 : i32
    return %arg0, %c0_i32, %c0_i32_0, %c0_i32_1 : i32, i32, i32, i32
  }
  func.func @transform_1(%arg0: i32, %arg1: i32) -> (i32, i32, i32) {
    %c0_i32 = arith.constant 0 : i32
    %c0_i32_0 = arith.constant 0 : i32
    %c0_i32_1 = arith.constant 0 : i32
    return %arg1, %c0_i32, %c0_i32_0 : i32, i32, i32
  }
  func.func @transform_2(%arg0: i32, %arg1: i32) -> (i32, i32, i32) {
    %c0_i32 = arith.constant 0 : i32
    %c0_i32_0 = arith.constant 0 : i32
    %c0_i32_1 = arith.constant 0 : i32
    return %arg1, %c0_i32, %c0_i32_0 : i32, i32, i32
  }
  func.func @transform_3(%arg0: i32, %arg1: i32) -> (i32, i32, i32, i32) {
    %c0_i32 = arith.constant 0 : i32
    %c0_i32_0 = arith.constant 0 : i32
    %c0_i32_1 = arith.constant 0 : i32
    %c0_i32_2 = arith.constant 0 : i32
    return %arg0, %c0_i32, %c0_i32_0, %c0_i32_1 : i32, i32, i32, i32
  }
  func.func @transform_4(%arg0: i32, %arg1: i32) -> (i32, i32, i32, i32) {
    %c0_i32 = arith.constant 0 : i32
    %c0_i32_0 = arith.constant 0 : i32
    %c0_i32_1 = arith.constant 0 : i32
    %c0_i32_2 = arith.constant 0 : i32
    return %arg0, %c0_i32, %c0_i32_0, %c0_i32_1 : i32, i32, i32, i32
  }
}

</mosaic_0001>

<bundles_post_ra>
// kernel: guided_drcnn_forward.1
= control target key start
LH: loop header
LB: loop body
LE: loop exit
PB: predicated region body
PF: predicated region fallthrough
CT: control target
= control target key end

     0   :  { %s4834_s15 = smov 0   ;;  %s4836_s16 = smov 0   ;;  %s6634_s0 = inlined_call_operand.vmem [shape: f32[2,16,16,32], index: 0, kind: input, shape index: {}]   ;;  %s6635_s1 = inlined_call_operand.vmem [shape: bf16[16,288,32], index: 1, kind: input, shape index: {}]   ;;  %s6636_s2 = inlined_call_operand.vmem [shape: f32[16,1,32], index: 2, kind: input, shape index: {}]   ;;  %s6637_s3 = inlined_call_operand.vmem [shape: f32[2,16,16,32], index: 3, kind: output, shape index: {0}]   ;;  %s6638_s4 = inlined_call_operand.vmem [shape: f32[2,16,16,32], index: 4, kind: output, shape index: {1}]  }
   0x1   :  { %s4838_s17 = smov 0   ;;  %s4840_s18 = smov 0  }
   0x2   :  { %s4842_s19 = smov 0  }
   0x3 LB: > { %s24_s20 = sadd.s32 1, %s4795_s17  ;;  %s27_s21 = sadd.s32 1, %s4799_s18  ;;  %s4803_s19 = sphi %s4842_s19, %s15_s19   ;;  %s4799_s18 = sphi %s4840_s18, %s6686_s18   ;;  %s4795_s17 = sphi %s4838_s17, %s6685_s17   ;;  %s4791_s16 = sphi %s4836_s16, %s6684_s16   ;;  %s4787_s15 = sphi %s4834_s15, %s6683_s15  }
   0x4   : > { %p25_p0 = scmp.ge.s32.totalorder %s24_s20, 16  ;;  %p4072_p1 = scmp.ge.s32.totalorder %s4803_s19, 1 }
   0x5   : > { %p195_p2 = scmp.lt.s32.totalorder %s4803_s19, 33 }
   0x6   : > { %s6688_s20 = smov (%p25_p0, %s24_s20), 0  ;;  %s6690_s21 = smov (!%p25_p0, %s27_s21), %s4799_s18 }
   0x7   : > { %p196_p3 = pnand %p4072_p1, %p195_p2  ;;  %p29_p4 = scmp.ge.s32.totalorder %s6690_s21, 2 }
   0x9   : > { %s6692_s21 = smov (%p29_p4, %s6690_s21), 0  ;;  %199 = sbr.rel (%p196_p3) target bundleno = 900 (0x384), region = 32 }
   0xe   : > { %p234_p5 = scmp.lt.s32.totalorder %s4791_s16, 1  ;;  %p239_p6 = scmp.lt.s32.totalorder %s4787_s15, 15 }
   0xf   : > { %p4080_p7 = scmp.ne.s32.totalorder %s4787_s15, 0 }
  0x10   : > { %s6694_s16 = smov (!%p234_p5, %s4791_s16), 1 }
  0x11   : > { %s240_s22 = scalar_select %p239_p6, %s4787_s15, 15 }
  0x12   : > { %s4173_s23 = sshll.u32 %s6694_s16, 8  ;;  %261 = sbr.rel (%p4080_p7) target bundleno = 100 (0x64), region = 36 }
  0x13   : > { %s4871_s26 = scalar_lea.vmem %s6634_s0, %s4173_s23  ;;  %s4692_s27 = smul.u32 144, %s240_s22 }
  0x14   : > { %s4876_s30 = scalar_lea.vmem %s6636_s2, %s240_s22  ;;  %s4881_s7 = scalar_lea.vmem %s6637_s3, %s4173_s23 }
  0x15   : > { %s4886_s10 = scalar_lea.vmem %s6635_s1, %s4692_s27  ;;  %s4891_s13 = scalar_lea.vmem %s6638_s4, %s4173_s23 }
  0x17   : > { %vm262_vm0 = vcmask 257024   ;;  %v4805_v0 = vmov 0   ;;  %v348_v1 = vld [vmem:[%s4871_s26] sm:$0xff]  ;;  %v349_v2 = vld [vmem:[%s4871_s26 + $0x8] sm:$0xff]  ;;  %v350_v3 = vld [vmem:[%s4871_s26 + $0x10] sm:$0xff] }
  0x18   : > { %264 = vst.msk [vmem:[#allocation2 + $0x4] sm:$0xf] %vm262_vm0, %v4805_v0  ;;  %v380_v4 = vpack.c.bf16 %v348_v1, %v348_v1  ;;  %v351_v5 = vld [vmem:[%s4871_s26 + $0x18] sm:$0xff]  ;;  %v381_v6 = vpack.c.bf16 %v349_v2, %v349_v2  ;;  %v352_v7 = vld [vmem:[%s4871_s26 + $0x20] sm:$0xff]  ;;  %v382_v8 = vpack.c.bf16 %v350_v3, %v350_v3  ;;  %v353_v9 = vld [vmem:[%s4871_s26 + $0x28] sm:$0xff] }
  0x19   : > { %266 = vst.msk [vmem:[#allocation2 + $0x1c] sm:$0xf] %vm262_vm0, %v4805_v0  ;;  %v383_v10 = vpack.c.bf16 %v351_v5, %v351_v5  ;;  %v354_v11 = vld [vmem:[%s4871_s26 + $0x30] sm:$0xff]  ;;  %v384_v12 = vpack.c.bf16 %v352_v7, %v352_v7  ;;  %v355_v13 = vld [vmem:[%s4871_s26 + $0x38] sm:$0xff]  ;;  %v385_v14 = vpack.c.bf16 %v353_v9, %v353_v9  ;;  %v356_v15 = vld [vmem:[%s4871_s26 + $0x40] sm:$0xff] }
  0x1a   : > { %268 = vst.msk [vmem:[#allocation2 + $0x34] sm:$0xf] %vm262_vm0, %v4805_v0  ;;  %v386_v16 = vpack.c.bf16 %v354_v11, %v354_v11  ;;  %v357_v17 = vld [vmem:[%s4871_s26 + $0x48] sm:$0xff]  ;;  %v387_v18 = vpack.c.bf16 %v355_v13, %v355_v13  ;;  %v358_v19 = vld [vmem:[%s4871_s26 + $0x50] sm:$0xff]  ;;  %v388_v20 = vpack.c.bf16 %v356_v15, %v356_v15  ;;  %v359_v21 = vld [vmem:[%s4871_s26 + $0x58] sm:$0xff] }
  0x1b   : > { %270 = vst.msk [vmem:[#allocation2 + $0x4c] sm:$0xf] %vm262_vm0, %v4805_v0  ;;  %v389_v22 = vpack.c.bf16 %v357_v17, %v357_v17  ;;  %v360_v23 = vld [vmem:[%s4871_s26 + $0x60] sm:$0xff]  ;;  %v390_v24 = vpack.c.bf16 %v358_v19, %v358_v19  ;;  %v361_v25 = vld [vmem:[%s4871_s26 + $0x68] sm:$0xff]  ;;  %v391_v26 = vpack.c.bf16 %v359_v21, %v359_v21  ;;  %v362_v27 = vld [vmem:[%s4871_s26 + $0x70] sm:$0xff] }
  0x1c   : > { %272 = vst.msk [vmem:[#allocation2 + $0x64] sm:$0xf] %vm262_vm0, %v4805_v0  ;;  %v392_v28 = vpack.c.bf16 %v360_v23, %v360_v23  ;;  %v363_v29 = vld [vmem:[%s4871_s26 + $0x78] sm:$0xff]  ;;  %v393_v30 = vpack.c.bf16 %v361_v25, %v361_v25  ;;  %v364_v31 = vld [vmem:[%s4871_s26 + $0x80] sm:$0xff]  ;;  %v394_v32 = vpack.c.bf16 %v362_v27, %v362_v27  ;;  %v365_v33 = vld [vmem:[%s4871_s26 + $0x88] sm:$0xff] }
  0x1d   : > { %274 = vst.msk [vmem:[#allocation2 + $0x7c] sm:$0xf] %vm262_vm0, %v4805_v0  ;;  %v395_v34 = vpack.c.bf16 %v363_v29, %v363_v29  ;;  %v366_v35 = vld [vmem:[%s4871_s26 + $0x90] sm:$0xff]  ;;  %v396_v36 = vpack.c.bf16 %v364_v31, %v364_v31  ;;  %v367_v37 = vld [vmem:[%s4871_s26 + $0x98] sm:$0xff]  ;;  %v397_v38 = vpack.c.bf16 %v365_v33, %v365_v33  ;;  %v368_v39 = vld [vmem:[%s4871_s26 + $0xa0] sm:$0xff] }
  0x1e   : > { %276 = vst.msk [vmem:[#allocation2 + $0x94] sm:$0xf] %vm262_vm0, %v4805_v0  ;;  %v398_v40 = vpack.c.bf16 %v366_v35, %v366_v35  ;;  %v369_v41 = vld [vmem:[%s4871_s26 + $0xa8] sm:$0xff]  ;;  %v399_v42 = vpack.c.bf16 %v367_v37, %v367_v37  ;;  %v370_v43 = vld [vmem:[%s4871_s26 + $0xb0] sm:$0xff]  ;;  %v400_v44 = vpack.c.bf16 %v368_v39, %v368_v39  ;;  %v371_v45 = vld [vmem:[%s4871_s26 + $0xb8] sm:$0xff] }
  0x1f   : > { %278 = vst.msk [vmem:[#allocation2 + $0xac] sm:$0xf] %vm262_vm0, %v4805_v0  ;;  %v401_v46 = vpack.c.bf16 %v369_v41, %v369_v41  ;;  %v372_v47 = vld [vmem:[%s4871_s26 + $0xc0] sm:$0xff]  ;;  %v402_v48 = vpack.c.bf16 %v370_v43, %v370_v43  ;;  %v373_v49 = vld [vmem:[%s4871_s26 + $0xc8] sm:$0xff]  ;;  %v403_v50 = vpack.c.bf16 %v371_v45, %v371_v45  ;;  %v374_v51 = vld [vmem:[%s4871_s26 + $0xd0] sm:$0xff] }
  0x20   : > { %280 = vst.msk [vmem:[#allocation2 + $0xc4] sm:$0xf] %vm262_vm0, %v4805_v0  ;;  %v404_v52 = vpack.c.bf16 %v372_v47, %v372_v47  ;;  %v375_v53 = vld [vmem:[%s4871_s26 + $0xd8] sm:$0xff]  ;;  %v405_v54 = vpack.c.bf16 %v373_v49, %v373_v49  ;;  %v376_v55 = vld [vmem:[%s4871_s26 + $0xe0] sm:$0xff]  ;;  %v406_v56 = vpack.c.bf16 %v374_v51, %v374_v51  ;;  %v377_v57 = vld [vmem:[%s4871_s26 + $0xe8] sm:$0xff] }
  0x21   : > { %282 = vst.msk [vmem:[#allocation2 + $0xdc] sm:$0xf] %vm262_vm0, %v4805_v0  ;;  %v407_v58 = vpack.c.bf16 %v375_v53, %v375_v53  ;;  %v378_v59 = vld [vmem:[%s4871_s26 + $0xf0] sm:$0xff]  ;;  %v408_v60 = vpack.c.bf16 %v376_v55, %v376_v55  ;;  %v379_v61 = vld [vmem:[%s4871_s26 + $0xf8] sm:$0xff]  ;;  %v409_v62 = vpack.c.bf16 %v377_v57, %v377_v57 }
  0x22   : > { %284 = vst.msk [vmem:[#allocation2 + $0xf4] sm:$0xf] %vm262_vm0, %v4805_v0  ;;  %v410_v63 = vpack.c.bf16 %v378_v59, %v378_v59 }
  0x23   : > { %286 = vst.msk [vmem:[#allocation2 + $0x10c] sm:$0xf] %vm262_vm0, %v4805_v0 }
  0x24   : > { %288 = vst.msk [vmem:[#allocation2 + $0x124] sm:$0xf] %vm262_vm0, %v4805_v0 }
  0x25   : > { %290 = vst.msk [vmem:[#allocation2 + $0x13c] sm:$0xf] %vm262_vm0, %v4805_v0 }
  0x26   : > { %292 = vst.msk [vmem:[#allocation2 + $0x154] sm:$0xf] %vm262_vm0, %v4805_v0 }
  0x27   : > { %294 = vst.msk [vmem:[#allocation2 + $0x16c] sm:$0xf] %vm262_vm0, %v4805_v0 }
  0x28   : > { %296 = vst.msk [vmem:[#allocation2 + $0x184] sm:$0xf] %vm262_vm0, %v4805_v0 }
  0x29   : > { %298 = vst.msk [vmem:[#allocation2 + $0x19c] sm:$0xf] %vm262_vm0, %v4805_v0 }
  0x2a   : > { %299 = vst.msk [vmem:[#allocation2 + $0x10] sm:$0xf] %vm262_vm0, %v4805_v0 }
  0x2b   : > { %301 = vst.msk [vmem:[#allocation2 + $0x28] sm:$0xf] %vm262_vm0, %v4805_v0 }
  0x2c   : > { %303 = vst.msk [vmem:[#allocation2 + $0x40] sm:$0xf] %vm262_vm0, %v4805_v0 }
  0x2d   : > { %305 = vst.msk [vmem:[#allocation2 + $0x58] sm:$0xf] %vm262_vm0, %v4805_v0 }
  0x2e   : > { %307 = vst.msk [vmem:[#allocation2 + $0x70] sm:$0xf] %vm262_vm0, %v4805_v0 }
  0x2f   : > { %309 = vst.msk [vmem:[#allocation2 + $0x88] sm:$0xf] %vm262_vm0, %v4805_v0 }
  0x30   : > { %311 = vst.msk [vmem:[#allocation2 + $0xa0] sm:$0xf] %vm262_vm0, %v4805_v0 }
  0x31   : > { %313 = vst.msk [vmem:[#allocation2 + $0xb8] sm:$0xf] %vm262_vm0, %v4805_v0 }
  0x32   : > { %315 = vst.msk [vmem:[#allocation2 + $0xd0] sm:$0xf] %vm262_vm0, %v4805_v0 }
  0x33   : > { %317 = vst.msk [vmem:[#allocation2 + $0xe8] sm:$0xf] %vm262_vm0, %v4805_v0 }
  0x34   : > { %319 = vst.msk [vmem:[#allocation2 + $0x100] sm:$0xf] %vm262_vm0, %v4805_v0 }
  0x35   : > { %321 = vst.msk [vmem:[#allocation2 + $0x118] sm:$0xf] %vm262_vm0, %v4805_v0 }
  0x36   : > { %323 = vst.msk [vmem:[#allocation2 + $0x130] sm:$0xf] %vm262_vm0, %v4805_v0 }
  0x37   : > { %325 = vst.msk [vmem:[#allocation2 + $0x148] sm:$0xf] %vm262_vm0, %v4805_v0 }
  0x38   : > { %327 = vst.msk [vmem:[#allocation2 + $0x160] sm:$0xf] %vm262_vm0, %v4805_v0 }
  0x39   : > { %329 = vst.msk [vmem:[#allocation2 + $0x178] sm:$0xf] %vm262_vm0, %v4805_v0 }
  0x3a   : > { %331 = vst.msk [vmem:[#allocation2 + $0x190] sm:$0xf] %vm262_vm0, %v4805_v0 }
  0x3b   : > { %333 = vst.msk [vmem:[#allocation2 + $0x1a8] sm:$0xf] %vm262_vm0, %v4805_v0 }
  0x3c   : > { %337 = vst.msk [vmem:[#allocation2 + $0x8] sm:$0xf] %vm262_vm0, %v4805_v0 }
  0x3d   : > { %338 = vst.msk [vmem:[#allocation2 + $0xc] sm:$0xf] %vm262_vm0, %v4805_v0 }
  0x3e   : > { %344 = vst.msk [vmem:[#allocation2 + $0x1a0] sm:$0xf] %vm262_vm0, %v4805_v0 }
  0x3f   : > { %345 = vst.msk [vmem:[#allocation2 + $0x1a4] sm:$0xf] %vm262_vm0, %v4805_v0 }
  0x40   : > { %336 = vst.msk [vmem:[#allocation2 + $0x4] sm:$0xf] %vm262_vm0, %v4805_v0 }
  0x41   : > { %339 = vst.msk [vmem:[#allocation2 + $0x10] sm:$0xf] %vm262_vm0, %v4805_v0 }
  0x42   : > { %343 = vst.msk [vmem:[#allocation2 + $0x19c] sm:$0xf] %vm262_vm0, %v4805_v0 }
  0x43   : > { %346 = vst.msk [vmem:[#allocation2 + $0x1a8] sm:$0xf] %vm262_vm0, %v4805_v0  ;;  %v411_v0 = vpack.c.bf16 %v379_v61, %v379_v61 }
  0x44   : > { %413 = vst.msk [vmem:[#allocation2 + $0x20] sm:$0xf] %vm262_vm0, %v380_v4 }
  0x45   : > { %414 = vst.msk [vmem:[#allocation2 + $0x24] sm:$0xf] %vm262_vm0, %v381_v6 }
  0x46   : > { %415 = vst.msk [vmem:[#allocation2 + $0x38] sm:$0xf] %vm262_vm0, %v382_v8 }
  0x47   : > { %416 = vst.msk [vmem:[#allocation2 + $0x3c] sm:$0xf] %vm262_vm0, %v383_v10 }
  0x48   : > { %417 = vst.msk [vmem:[#allocation2 + $0x50] sm:$0xf] %vm262_vm0, %v384_v12 }
  0x49   : > { %418 = vst.msk [vmem:[#allocation2 + $0x54] sm:$0xf] %vm262_vm0, %v385_v14 }
  0x4a   : > { %419 = vst.msk [vmem:[#allocation2 + $0x68] sm:$0xf] %vm262_vm0, %v386_v16 }
  0x4b   : > { %420 = vst.msk [vmem:[#allocation2 + $0x6c] sm:$0xf] %vm262_vm0, %v387_v18 }
  0x4c   : > { %421 = vst.msk [vmem:[#allocation2 + $0x80] sm:$0xf] %vm262_vm0, %v388_v20 }
  0x4d   : > { %422 = vst.msk [vmem:[#allocation2 + $0x84] sm:$0xf] %vm262_vm0, %v389_v22 }
  0x4e   : > { %423 = vst.msk [vmem:[#allocation2 + $0x98] sm:$0xf] %vm262_vm0, %v390_v24 }
  0x4f   : > { %424 = vst.msk [vmem:[#allocation2 + $0x9c] sm:$0xf] %vm262_vm0, %v391_v26 }
  0x50   : > { %425 = vst.msk [vmem:[#allocation2 + $0xb0] sm:$0xf] %vm262_vm0, %v392_v28 }
  0x51   : > { %426 = vst.msk [vmem:[#allocation2 + $0xb4] sm:$0xf] %vm262_vm0, %v393_v30 }
  0x52   : > { %427 = vst.msk [vmem:[#allocation2 + $0xc8] sm:$0xf] %vm262_vm0, %v394_v32 }
  0x53   : > { %428 = vst.msk [vmem:[#allocation2 + $0xcc] sm:$0xf] %vm262_vm0, %v395_v34 }
  0x54   : > { %429 = vst.msk [vmem:[#allocation2 + $0xe0] sm:$0xf] %vm262_vm0, %v396_v36 }
  0x55   : > { %430 = vst.msk [vmem:[#allocation2 + $0xe4] sm:$0xf] %vm262_vm0, %v397_v38 }
  0x56   : > { %431 = vst.msk [vmem:[#allocation2 + $0xf8] sm:$0xf] %vm262_vm0, %v398_v40 }
  0x57   : > { %432 = vst.msk [vmem:[#allocation2 + $0xfc] sm:$0xf] %vm262_vm0, %v399_v42 }
  0x58   : > { %433 = vst.msk [vmem:[#allocation2 + $0x110] sm:$0xf] %vm262_vm0, %v400_v44 }
  0x59   : > { %434 = vst.msk [vmem:[#allocation2 + $0x114] sm:$0xf] %vm262_vm0, %v401_v46 }
  0x5a   : > { %435 = vst.msk [vmem:[#allocation2 + $0x128] sm:$0xf] %vm262_vm0, %v402_v48 }
  0x5b   : > { %436 = vst.msk [vmem:[#allocation2 + $0x12c] sm:$0xf] %vm262_vm0, %v403_v50 }
  0x5c   : > { %437 = vst.msk [vmem:[#allocation2 + $0x140] sm:$0xf] %vm262_vm0, %v404_v52 }
  0x5d   : > { %438 = vst.msk [vmem:[#allocation2 + $0x144] sm:$0xf] %vm262_vm0, %v405_v54 }
  0x5e   : > { %439 = vst.msk [vmem:[#allocation2 + $0x158] sm:$0xf] %vm262_vm0, %v406_v56 }
  0x5f   : > { %440 = vst.msk [vmem:[#allocation2 + $0x15c] sm:$0xf] %vm262_vm0, %v407_v58 }
  0x60   : > { %441 = vst.msk [vmem:[#allocation2 + $0x170] sm:$0xf] %vm262_vm0, %v408_v60 }
  0x61   : > { %442 = vst.msk [vmem:[#allocation2 + $0x174] sm:$0xf] %vm262_vm0, %v409_v62 }
  0x62   : > { %443 = vst.msk [vmem:[#allocation2 + $0x188] sm:$0xf] %vm262_vm0, %v410_v63 }
  0x63   : > { %444 = vst.msk [vmem:[#allocation2 + $0x18c] sm:$0xf] %vm262_vm0, %v411_v0 }
  0x64 PF: > { %v5002_v1 = vld [vmem:[#allocation2 + $0x68] sm:$0xff]   ;;  %v5004_v2 = vld [vmem:[#allocation2 + $0x38] sm:$0xff]   ;;  %v5012_v8 = vld [vmem:[#allocation2 + $0x80] sm:$0xff]   ;;  %s4806_s14 = smov 32   ;;  %vm1028_vm1 = vcmask 1042432   ;;  %s4807_s16 = smov 64  }
  0x65   : > { %v5006_v3 = vld [vmem:[#allocation2 + $0x8] sm:$0xff]   ;;  %v853_v4 = vshrl.u32 %v5002_v1, 16  ;;  %v856_v5 = vshll.u32 %v5002_v1, 16  ;;  %v837_v6 = vshrl.u32 %v5004_v2, 16  ;;  %v840_v7 = vshll.u32 %v5004_v2, 16  ;;  %v5018_v13 = vld [vmem:[#allocation2 + $0x50] sm:$0xff]  }
  0x66   : > { %v821_v9 = vshrl.u32 %v5006_v3, 16  ;;  %v824_v10 = vshll.u32 %v5006_v3, 16  ;;  %v861_v11 = vshrl.u32 %v5012_v8, 16  ;;  %v864_v12 = vshll.u32 %v5012_v8, 16  ;;  %v5020_v18 = vld [vmem:[#allocation2 + $0x20] sm:$0xff]   ;;  %v5034_v32 = vld [vmem:[#allocation2 + $0xc8] sm:$0xff]  }
  0x67   : > { %v855_v14 = vrot.slane %v853_v4, 4  ;;  %v858_v15 = vrot.slane %v856_v5, 5  ;;  %v839_v16 = vrot.slane %v837_v6, 4  ;;  %v842_v17 = vrot.slane %v840_v7, 5  ;;  %v5037_v35 = vld [vmem:[#allocation2 + $0xb0] sm:$0xff]   ;;  %v5039_v36 = vld [vmem:[#allocation2 + $0x98] sm:$0xff]  }
  0x68   : > { %v823_v19 = vrot.slane %v821_v9, 4  ;;  %v826_v20 = vrot.slane %v824_v10, 5  ;;  %v863_v21 = vrot.slane %v861_v11, 4  ;;  %v845_v24 = vshrl.u32 %v5018_v13, 16  ;;  %v5055_v50 = vld [vmem:[#allocation2 + $0x110] sm:$0xff]   ;;  %v5058_v53 = vld [vmem:[#allocation2 + $0xf8] sm:$0xff]  }
  0x69   : > { %v5022_v22 = vor.u32 %v858_v15, %v855_v14  ;;  %v5024_v23 = vor.u32 %v842_v17, %v839_v16  ;;  %v848_v25 = vshll.u32 %v5018_v13, 16  ;;  %v866_v27 = vrot.slane %v864_v12, 5  ;;  %v5060_v54 = vld [vmem:[#allocation2 + $0xe0] sm:$0xff]   ;;  %v5070_v7 = vld [vmem:[#allocation2 + $0x158] sm:$0xff]   ;;  %v5075_v12 = vld [vmem:[#allocation2 + $0x128] sm:$0xff]   ;;  %s4808_s22 = smov 96  }
  0x6a   : > { %v827_v26 = vor.u32 %v826_v20, %v823_v19  ;;  %v829_v28 = vshrl.u32 %v5020_v18, 16  ;;  %v832_v29 = vshll.u32 %v5020_v18, 16  ;;  %v847_v30 = vrot.slane %v845_v24, 4  ;;  %v5073_v11 = vld [vmem:[#allocation2 + $0x140] sm:$0xff]   ;;  %p4169_p8 = scmp.ge.s32.totalorder %s4787_s15, 15 }
  0x6b   : > { %956 = vrot.lane.b32.xlu2 %v5022_v22, %s4806_s14  ;;  %952 = vrot.lane.b32.xlu1 %v5024_v23, %s4806_s14  ;;  %v850_v31 = vrot.slane %v848_v25, 5  ;;  %v5041_v37 = vor.u32 %v866_v27, %v863_v21  ;;  %v885_v38 = vshrl.u32 %v5034_v32, 16  ;;  %v888_v40 = vshll.u32 %v5034_v32, 16 }
  0x6c   : > { %948 = vrot.lane.b32.xlu0 %v827_v26, %s4806_s14  ;;  %v831_v33 = vrot.slane %v829_v28, 4  ;;  %v834_v34 = vrot.slane %v832_v29, 5  ;;  %v877_v41 = vshrl.u32 %v5037_v35, 16  ;;  %v880_v42 = vshll.u32 %v5037_v35, 16  ;;  %v485_v26 = vld [vmem:[#allocation2 + $0x10] sm:$0x1] }
  0x6d   : > { %v5044_v39 = vor.u32 %v850_v31, %v847_v30  ;;  %v869_v44 = vshrl.u32 %v5039_v36, 16  ;;  %v872_v45 = vshll.u32 %v5039_v36, 16  ;;  %v887_v46 = vrot.slane %v885_v38, 4  ;;  %v5086_v38 = vld [vmem:[#allocation2 + $0x170] sm:$0xff]  }
  0x6e   : > { %v835_v43 = vor.u32 %v834_v34, %v831_v33  ;;  %v890_v47 = vrot.slane %v888_v40, 5  ;;  %v879_v48 = vrot.slane %v877_v41, 4  ;;  %v882_v49 = vrot.slane %v880_v42, 5 }
  0x6f   : > { %v871_v51 = vrot.slane %v869_v44, 4  ;;  %v874_v52 = vrot.slane %v872_v45, 5  ;;  %v909_v55 = vshrl.u32 %v5055_v50, 16  ;;  %v912_v56 = vshll.u32 %v5055_v50, 16 }
  0x70   : > { %v891_v57 = vor.u32 %v890_v47, %v887_v46  ;;  %v883_v58 = vor.u32 %v882_v49, %v879_v48  ;;  %v901_v59 = vshrl.u32 %v5058_v53, 16  ;;  %v904_v60 = vshll.u32 %v5058_v53, 16  ;;  %v489_v46 = vld [vmem:[#allocation2 + $0x28] sm:$0x1] }
  0x71   : > { %v875_v61 = vor.u32 %v874_v52, %v871_v51  ;;  %v893_v62 = vshrl.u32 %v5060_v54, 16  ;;  %v896_v63 = vshll.u32 %v5060_v54, 16  ;;  %v911_v0 = vrot.slane %v909_v55, 4 }
  0x72   : > { %v914_v4 = vrot.slane %v912_v56, 5  ;;  %v903_v5 = vrot.slane %v901_v59, 4  ;;  %v906_v6 = vrot.slane %v904_v60, 5  ;;  %v933_v15 = vshrl.u32 %v5070_v7, 16  ;;  %v493_v59 = vld [vmem:[#allocation2 + $0x40] sm:$0x1] }
  0x73   : > { %958 = vrot.lane.b32.xlu2 %v5041_v37, %s4806_s14  ;;  %954 = vrot.lane.b32.xlu1 %v5044_v39, %s4806_s14  ;;  %v895_v9 = vrot.slane %v893_v62, 4  ;;  %v898_v10 = vrot.slane %v896_v63, 5  ;;  %v936_v17 = vshll.u32 %v5070_v7, 16  ;;  %v925_v19 = vshrl.u32 %v5073_v11, 16 }
  0x74   : > { %950 = vrot.lane.b32.xlu0 %v835_v43, %s4806_s14  ;;  %v915_v14 = vor.u32 %v914_v4, %v911_v0  ;;  %v907_v16 = vor.u32 %v906_v6, %v903_v5  ;;  %v928_v20 = vshll.u32 %v5073_v11, 16  ;;  %v917_v24 = vshrl.u32 %v5075_v12, 16 }
  0x75   : > { %v899_v21 = vor.u32 %v898_v10, %v895_v9  ;;  %v920_v25 = vshll.u32 %v5075_v12, 16  ;;  %v935_v27 = vrot.slane %v933_v15, 4  ;;  %v938_v28 = vrot.slane %v936_v17, 5  ;;  %v501_v9 = vld [vmem:[#allocation2 + $0x70] sm:$0x1] }
  0x76   : > { %v927_v29 = vrot.slane %v925_v19, 4  ;;  %v930_v30 = vrot.slane %v928_v20, 5  ;;  %v919_v31 = vrot.slane %v917_v24, 4  ;;  %v996_v34 = vunpack.c.l.b16 %v485_v26  ;;  %v505_v24 = vld [vmem:[#allocation2 + $0x88] sm:$0x1] }
  0x77   : > { %v922_v33 = vrot.slane %v920_v25, 5  ;;  %v939_v40 = vor.u32 %v938_v28, %v935_v27  ;;  %v941_v44 = vshrl.u32 %v5086_v38, 16  ;;  %v944_v45 = vshll.u32 %v5086_v38, 16 }
  0x78   : > { %v931_v41 = vor.u32 %v930_v30, %v927_v29  ;;  %v1012_v43 = vpack.c.b16 %v996_v34, %v996_v34  ;;  %v1029_v47 = vrot.slane %v5006_v3, 5  ;;  %v997_v52 = vunpack.c.l.b16 %v489_v46  ;;  %v513_v34 = vld [vmem:[#allocation2 + $0xb8] sm:$0x1] }
  0x79   : > { %v923_v42 = vor.u32 %v922_v33, %v919_v31  ;;  %v943_v49 = vrot.slane %v941_v44, 4  ;;  %v946_v51 = vrot.slane %v944_v45, 5  ;;  %v5099_v60 = vrot.slane %v5020_v18, 5 }
  0x7a   : > { %v1030_v48 = vrot.slane %v1012_v43, 5  ;;  %v998_v63 = vunpack.c.l.b16 %v493_v59  ;;  %v5102_v0 = vrot.slane %v5004_v2, 5  ;;  %v5112_v10 = vrot.slane %v5018_v13, 5  ;;  %v525_v59 = vld [vmem:[#allocation2 + $0x100] sm:$0x1] }
  0x7b   : > { %964 = vrot.lane.b32.xlu2 %v891_v57, %s4806_s14  ;;  %962 = vrot.lane.b32.xlu1 %v883_v58, %s4806_s14  ;;  %v947_v56 = vor.u32 %v946_v51, %v943_v49  ;;  %v1013_v57 = vpack.c.b16 %v997_v52, %v997_v52  ;;  %v497_v58 = vld [vmem:[#allocation2 + $0x58] sm:$0x1]  ;;  %v1000_v15 = vunpack.c.l.b16 %v501_v9  ;;  %v5123_v25 = vrot.slane %v5002_v1, 5 }
  0x7c   : > { %960 = vrot.lane.b32.xlu0 %v875_v61, %s4806_s14  ;;  %v1031_v55 = vsel %vm1028_vm1, %v1029_v47, %v1030_v48  ;;  %v999_v62 = vunpack.c.l.b16 %v497_v58  ;;  %v1014_v6 = vpack.c.b16 %v998_v63, %v998_v63  ;;  %v1001_v28 = vunpack.c.l.b16 %v505_v24  ;;  %v517_v48 = vld [vmem:[#allocation2 + $0xd0] sm:$0x1]  ;;  %v4500_v24 = vld [vmem:[#allocation2 + $0x1c] sm:$0x8] }
  0x7d   : > { %v1033_v61 = vrot.slane %v1013_v57, 5  ;;  %v1016_v19 = vpack.c.b16 %v1000_v15, %v1000_v15  ;;  %v5126_v29 = vrot.slane %v5012_v8, 5  ;;  %v1050_v49 = vrot.slane %v5037_v35, 5 }
  0x7e   : > { %v1015_v5 = vpack.c.b16 %v999_v62, %v999_v62  ;;  %v1017_v33 = vpack.c.b16 %v1001_v28, %v1001_v28  ;;  %v1004_v52 = vunpack.c.l.b16 %v517_v48  ;;  %v1006_v35 = vunpack.c.l.b16 %v525_v59 }
  0x7f   : > { %v1034_v4 = vsel %vm1028_vm1, %v5099_v60, %v1033_v61  ;;  %v1042_v26 = vrot.slane %v1016_v19, 5  ;;  %v1056_v61 = vrot.slane %v5060_v54, 5  ;;  %v1059_v9 = vrot.slane %v5058_v53, 5  ;;  %v4660_v53 = vld [vmem:[#allocation2 + $0x1c] sm:$0xf0]  }
  0x80   : > { %v1045_v43 = vrot.slane %v1017_v33, 5  ;;  %v1020_v58 = vpack.c.b16 %v1004_v52, %v1004_v52  ;;  %v4253_v52 = vunpack.c.h.b16 %v5070_v7  ;;  %vm2101_vm2 = vcmask 261120  }
  0x81   : > { %v1043_v30 = vsel %vm1028_vm1, %v5123_v25, %v1042_v26  ;;  %vm2182_vm3 = vcmask 523264   ;;  %vm2504_vm4 = vsmask.f32 4352  ;;  %vm2247_vm5 = vcmask 785408  }
  0x82   : > { %v1046_v46 = vsel %vm1028_vm1, %v5126_v29, %v1045_v43  ;;  %v1054_v63 = vrot.slane %v1020_v58, 5  ;;  %v5190_v58 = vpack.c.b16 %v4253_v52, %v4253_v52 }
  0x83   : > { %970 = vrot.lane.b32.xlu2 %v915_v14, %s4806_s14  ;;  %968 = vrot.lane.b32.xlu1 %v907_v16, %s4806_s14  ;;  %v1039_v14 = vrot.slane %v1015_v5, 5  ;;  %v1036_v16 = vrot.slane %v1014_v6, 5  ;;  %v1022_v5 = vpack.c.b16 %v1006_v35, %v1006_v35  ;;  %v529_v6 = vld [vmem:[#allocation2 + $0x118] sm:$0x1]  ;;  %v533_v35 = vld [vmem:[#allocation2 + $0x130] sm:$0x1] }
  0x84   : > { %966 = vrot.lane.b32.xlu0 %v899_v21, %s4806_s14  ;;  %v509_v21 = vld [vmem:[#allocation2 + $0xa0] sm:$0x1]  ;;  %v1007_v54 = vunpack.c.l.b16 %v529_v6  ;;  %v4568_v6 = vld [vmem:[#allocation2 + $0x4c] sm:$0x8] }
  0x85   : > { %v1040_v17 = vsel %vm1028_vm1, %v5112_v10, %v1039_v14  ;;  %v1037_v20 = vsel %vm1028_vm1, %v5102_v0, %v1036_v16  ;;  %v1002_v27 = vunpack.c.l.b16 %v509_v21  ;;  %v1060_v14 = vrot.slane %v1022_v5, 5 }
  0x86   : > { %v1062_v16 = vrot.slane %v5055_v50, 5  ;;  %v1023_v19 = vpack.c.b16 %v1007_v54, %v1007_v54  ;;  %v4261_v21 = vunpack.c.h.b16 %v5020_v18 }
  0x87   : > { %v1018_v31 = vpack.c.b16 %v1002_v27, %v1002_v27 }
  0x88   : > { %v1063_v28 = vrot.slane %v1023_v19, 5  ;;  %v5165_v50 = vpack.c.b16 %v4261_v21, %v4261_v21  ;;  %v4672_v21 = vld [vmem:[#allocation2 + $0x13c] sm:$0xf0]  }
  0x8a   : > { %v1064_v33 = vsel %vm1028_vm1, %v1062_v16, %v1063_v28 }
  0x8b   : > { %976 = vrot.lane.b32.xlu2 %v939_v40, %s4806_s14  ;;  %974 = vrot.lane.b32.xlu1 %v931_v41, %s4806_s14  ;;  %v1047_v40 = vrot.slane %v5039_v36, 5  ;;  %v1048_v41 = vrot.slane %v1018_v31, 5 }
  0x8c   : > { %972 = vrot.lane.b32.xlu0 %v923_v42, %s4806_s14  ;;  %v1003_v42 = vunpack.c.l.b16 %v513_v34  ;;  %v4564_v34 = vld [vmem:[#allocation2 + $0x34] sm:$0x8] }
  0x8d   : > { %v1049_v44 = vsel %vm1028_vm1, %v1047_v40, %v1048_v41 }
  0x8e   : > { %v1019_v45 = vpack.c.b16 %v1003_v42, %v1003_v42 }
  0x90   : > { %v1051_v36 = vrot.slane %v1019_v45, 5  ;;  %v4205_v45 = vunpack.c.h.b16 %v5004_v2 }
  0x93   : > { %1077 = vrot.lane.b32.xlu1 %v1029_v47, %s4807_s16  ;;  %1079 = vrot.lane.b32.xlu2 %v1031_v55, %s4807_s16  ;;  %v521_v47 = vld [vmem:[#allocation2 + $0xe8] sm:$0x1]  ;;  %v1053_v55 = vrot.slane %v5034_v32, 5 }
  0x94   : > { %978 = vrot.lane.b32.xlu0 %v947_v56, %s4806_s14  ;;  %v1005_v51 = vunpack.c.l.b16 %v521_v47  ;;  %v1052_v56 = vsel %vm1028_vm1, %v1050_v49, %v1051_v36  ;;  %v4661_v47 = vld [vmem:[#allocation2 + $0x34] sm:$0xf0]  }
  0x95   : > { %v1055_v32 = vsel %vm1028_vm1, %v1053_v55, %v1054_v63  ;;  %v1008_v63 = vunpack.c.l.b16 %v533_v35 }
  0x96   : > { %v1021_v57 = vpack.c.b16 %v1005_v51, %v1005_v51 }
  0x98   : > { %v1057_v62 = vrot.slane %v1021_v57, 5 }
  0x9b   : > { %1083 = vrot.lane.b32.xlu1 %v1034_v4, %s4807_s16  ;;  %1085 = vrot.lane.b32.xlu2 %v5102_v0, %s4807_s16  ;;  %v1058_v4 = vsel %vm1028_vm1, %v1056_v61, %v1057_v62 }
  0x9c   : > { %1081 = vrot.lane.b32.xlu0 %v5099_v60, %s4807_s16 }
  0xa3   : > { %1089 = vrot.lane.b32.xlu1 %v5112_v10, %s4807_s16  ;;  %1091 = vrot.lane.b32.xlu2 %v1040_v17, %s4807_s16  ;;  %v1061_v17 = vsel %vm1028_vm1, %v1059_v9, %v1060_v14 }
  0xa4   : > { %1087 = vrot.lane.b32.xlu0 %v1037_v20, %s4807_s16  ;;  %v550_v20 = vld [vmem:[#allocation2 + $0x28] sm:$0x1] }
  0xa5   : > { %v1493_v26 = vunpack.c.l.b16 %v550_v20  ;;  %v4548_v20 = vld [vmem:[#allocation2 + $0x13c] sm:$0x8] }
  0xa6   : > { %v4549_v28 = vor.u32 %v4672_v21, %v4548_v20 }
  0xa7   : > { %v1509_v31 = vpack.c.b16 %v1493_v26, %v1493_v26 }
  0xa9   : > { %v1526_v18 = vrot.slane %v1509_v31, 5  ;;  %v4249_v31 = vunpack.c.h.b16 %v5073_v11 }
  0xab   : > { %1095 = vrot.lane.b32.xlu1 %v1043_v30, %s4807_s16  ;;  %1097 = vrot.lane.b32.xlu2 %v5126_v29, %s4807_s16  ;;  %v4501_v30 = vor.u32 %v4660_v53, %v4500_v24  ;;  %v1527_v43 = vsel %vm1028_vm1, %v5099_v60, %v1526_v18  ;;  %v4662_v18 = vld [vmem:[#allocation2 + $0x4c] sm:$0xf0]  }
  0xac   : > { %1093 = vrot.lane.b32.xlu0 %v5123_v25, %s4807_s16 }
  0xb3   : > { %1101 = vrot.lane.b32.xlu1 %v1047_v40, %s4807_s16  ;;  %1103 = vrot.lane.b32.xlu2 %v1049_v44, %s4807_s16  ;;  %v4676_v40 = vld [vmem:[#allocation2 + $0x34] sm:$0xf0]   ;;  %v554_v44 = vld [vmem:[#allocation2 + $0x40] sm:$0x1] }
  0xb4   : > { %1099 = vrot.lane.b32.xlu0 %v1046_v46, %s4807_s16  ;;  %v4565_v42 = vor.u32 %v4676_v40, %v4564_v34  ;;  %v4504_v46 = vld [vmem:[#allocation2 + $0x34] sm:$0x8]  ;;  %v1494_v48 = vunpack.c.l.b16 %v554_v44 }
  0xb6   : > { %v1510_v57 = vpack.c.b16 %v1494_v48, %v1494_v48  ;;  %v4257_v48 = vunpack.c.h.b16 %v5086_v38 }
  0xb8   : > { %v1529_v2 = vrot.slane %v1510_v57, 5 }
  0xbb   : > { %1107 = vrot.lane.b32.xlu1 %v1052_v56, %s4807_s16  ;;  %1109 = vrot.lane.b32.xlu2 %v1053_v55, %s4807_s16  ;;  %v4505_v55 = vor.u32 %v4661_v47, %v4504_v46  ;;  %v5188_v56 = vpack.c.b16 %v4205_v45, %v4205_v45 }
  0xbc   : > { %1105 = vrot.lane.b32.xlu0 %v1050_v49, %s4807_s16 }
  0xc3   : > { %1113 = vrot.lane.b32.xlu1 %v1056_v61, %s4807_s16  ;;  %1115 = vrot.lane.b32.xlu2 %v1058_v4, %s4807_s16  ;;  %v4209_v4 = vunpack.c.h.b16 %v5018_v13  ;;  %v1065_v13 = vrot.slane %v5075_v12, 5  ;;  %v4508_v12 = vld [vmem:[#allocation2 + $0x4c] sm:$0x8] }
  0xc4   : > { %1111 = vrot.lane.b32.xlu0 %v1055_v32, %s4807_s16  ;;  %v4509_v47 = vor.u32 %v4662_v18, %v4508_v12  ;;  %v4183_v12 = vld [vmem:[%s4886_s10 + $0x38] sm:$0xff]  ;;  %v5287_v18 = vrot.slane %v5073_v11, 5 }
  0xc5   : > { %v5155_v15 = vpop.permute.xlu2 %956  ;;  %3448 = vmatpush.bf16.msra.mxu0 %v4183_v12  ;;  %4626 = vmatpush.bf16.msra.mxu3 %v4183_v12 }
  0xcb   : > { %1119 = vrot.lane.b32.xlu1 %v1061_v17, %s4807_s16  ;;  %1121 = vrot.lane.b32.xlu2 %v1062_v16, %s4807_s16  ;;  %v1024_v16 = vpack.c.b16 %v1008_v63, %v1008_v63  ;;  %v779_v17 = vpack.c.b16 %v4209_v4, %v4209_v4 }
  0xcc   : > { %1117 = vrot.lane.b32.xlu0 %v1059_v9, %s4807_s16  ;;  %v4677_v9 = vld [vmem:[#allocation2 + $0x4c] sm:$0xf0]  }
  0xcd   : > { %v5163_v27 = vpop.permute.xlu2 %958  ;;  %v4569_v54 = vor.u32 %v4677_v9, %v4568_v6  ;;  %v1066_v19 = vrot.slane %v1024_v16, 5  ;;  %v537_v16 = vld [vmem:[#allocation2 + $0x148] sm:$0x1] }
  0xd3   : > { %1269 = vrot.lane.b32.xlu1 %v4501_v30, %s4808_s22  ;;  %1271 = vrot.lane.b32.xlu2 %v5165_v50, %s4808_s22  ;;  %v1067_v30 = vsel %vm1028_vm1, %v1065_v13, %v1066_v19  ;;  %v4213_v19 = vunpack.c.h.b16 %v5002_v1 }
  0xd4   : > { %1123 = vrot.lane.b32.xlu0 %v1064_v33, %s4807_s16  ;;  %v558_v33 = vld [vmem:[#allocation2 + $0x58] sm:$0x1] }
  0xd5   : > { %v5172_v41 = vpop.permute.xlu2 %964  ;;  %v1495_v34 = vunpack.c.l.b16 %v558_v33 }
  0xd6   : > { %6645 = vst [vmem:[#allocation3_spill] sm:$0xff] %v5172_v41 }
  0xd7   : > { %v1511_v52 = vpack.c.b16 %v1495_v34, %v1495_v34  ;;  %v4193_v34 = vld [vmem:[%s4886_s10 + $0x88] sm:$0xff] }
  0xd8   : > { %3632 = vmatpush.bf16.msra.mxu2 %v4193_v34 }
  0xd9   : > { %v1532_v57 = vrot.slane %v1511_v52, 5  ;;  %v2539_v52 = vshll.u32 %v5102_v0, 16 }
  0xdb   : > { %1575 = vrot.lane.b32.xlu1 %v1527_v43, %s4806_s14  ;;  %1765 = vrot.lane.b32.xlu2 %v4565_v42, %s4807_s16 }
  0xdc   : > { %1573 = vrot.lane.b32.xlu0 %v5099_v60, %s4806_s14 }
  0xdd   : > { %v5181_v49 = vpop.permute.xlu2 %970  ;;  %v5183_v36 = vpop.permute.xlu1 %952 }
  0xde   : > { %6646 = vst [vmem:[#allocation4_spill] sm:$0xff] %v5181_v49  ;;  %v5185_v51 = vpop.permute.xlu0 %948 }
  0xe3   : > { %1973 = vrot.lane.b32.xlu1 %v5024_v23, %s4808_s22  ;;  %1273 = vrot.lane.b32.xlu2 %v4505_v55, %s4808_s22  ;;  %v1530_v23 = vsel %vm1028_vm1, %v5102_v0, %v1529_v2  ;;  %v5254_v55 = vpack.c.b16 %v4257_v48, %v4257_v48  ;;  %v4572_v2 = vld [vmem:[#allocation2 + $0x64] sm:$0x8]  ;;  %v2536_v48 = vshrl.u32 %v5102_v0, 16 }
  0xe4   : > { %1767 = vrot.lane.b32.xlu0 %v5188_v56, %s4807_s16 }
  0xe5   : > { %v5197_v60 = vpop.permute.xlu2 %976  ;;  %v5199_v59 = vpop.permute.xlu1 %954 }
  0xe6   : > { %v5204_v61 = vsel %vm2101_vm2, %v5190_v58, %v5197_v60  ;;  %v5206_v62 = vpop.permute.xlu0 %950  ;;  %v2121_v40 = vsel %vm2101_vm2, %v779_v17, %v5199_v59 }
  0xe7   : > { %v2111_v20 = vsel %vm2101_vm2, %v5165_v50, %v5206_v62  ;;  %v5290_v50 = vpack.c.b16 %v4213_v19, %v4213_v19 }
  0xeb   : > { %1577 = vrot.lane.b32.xlu1 %v5102_v0, %s4806_s14  ;;  %1579 = vrot.lane.b32.xlu2 %v1530_v23, %s4806_s14  ;;  %v4678_v23 = vld [vmem:[#allocation2 + $0x64] sm:$0xf0]  }
  0xec   : > { %1275 = vrot.lane.b32.xlu0 %v5188_v56, %s4808_s22  ;;  %v4573_v9 = vor.u32 %v4678_v23, %v4572_v2  ;;  %v4552_v2 = vld [vmem:[#allocation2 + $0x154] sm:$0x8]  ;;  %v4673_v23 = vld [vmem:[#allocation2 + $0x154] sm:$0xf0]  }
  0xed   : > { %v5216_v5 = vpop.permute.xlu1 %962  ;;  %v5218_v32 = vpop.permute.xlu2 %1079  ;;  %v4553_v34 = vor.u32 %v4673_v23, %v4552_v2  ;;  %v4512_v2 = vld [vmem:[#allocation2 + $0x64] sm:$0x8]  ;;  %v4663_v23 = vld [vmem:[#allocation2 + $0x64] sm:$0xf0]  }
  0xee   : > { %6647 = vst [vmem:[#allocation5_spill] sm:$0xff] %v5216_v5  ;;  %v5220_v14 = vpop.permute.xlu0 %960  ;;  %v4436_v5 = vld [vmem:[#allocation2 + $0x4] sm:$0x8] }
  0xef   : > { %6648 = vst [vmem:[#allocation6_spill] sm:$0xff] %v5220_v14  ;;  %v4440_v14 = vld [vmem:[#allocation2 + $0x1c] sm:$0x8] }
  0xf3   : > { %1771 = vrot.lane.b32.xlu1 %v779_v17, %s4807_s16  ;;  %1975 = vrot.lane.b32.xlu2 %v5044_v39, %s4808_s22  ;;  %v799_v39 = vpack.c.b16 %v4249_v31, %v4249_v31 }
  0xf4   : > { %1769 = vrot.lane.b32.xlu0 %v4569_v54, %s4807_s16  ;;  %v1533_v54 = vsel %vm1028_vm1, %v5112_v10, %v1532_v57 }
  0xf5   : > { %v5227_v24 = vpop.permute.xlu1 %968  ;;  %v5229_v53 = vpop.permute.xlu2 %1085 }
  0xf6   : > { %6649 = vst [vmem:[#allocation7_spill] sm:$0xff] %v5227_v24  ;;  %v5231_v26 = vpop.permute.xlu0 %966 }
  0xf7   : > { %6650 = vst [vmem:[#allocation8_spill] sm:$0xff] %v5231_v26  ;;  %v4197_v26 = vunpack.c.h.b16 %v5006_v3 }
  0xfb   : > { %1127 = vrot.lane.b32.xlu1 %v1067_v30, %s4807_s16  ;;  %1317 = vrot.lane.b32.xlu2 %v4549_v28, %s4808_s22  ;;  %v1009_v30 = vunpack.c.l.b16 %v537_v16  ;;  %v2541_v16 = vrot.slane %v2539_v52, 4 }
  0xfc   : > { %1125 = vrot.lane.b32.xlu0 %v1065_v13, %s4807_s16 }
  0xfd   : > { %v5240_v42 = vpop.permute.xlu1 %974  ;;  %v1092_v43 = vpop.permute.xlu2 %1091 }
  0xfe   : > { %v5244_v44 = vsel %vm2101_vm2, %v799_v39, %v5240_v42  ;;  %v5247_v45 = vsel %vm2182_vm3, %v2121_v40, %v1092_v43  ;;  %v5249_v46 = vpop.permute.xlu0 %972  ;;  %v1025_v40 = vpack.c.b16 %v1009_v30, %v1009_v30  ;;  %v4181_v30 = vld [vmem:[%s4886_s10 + $0x28] sm:$0xff] }
 0x103   : > { %1277 = vrot.lane.b32.xlu1 %v4509_v47, %s4808_s22  ;;  %1279 = vrot.lane.b32.xlu2 %v779_v17, %s4808_s22  ;;  %v615_v17 = vld [vmem:[#allocation2 + $0x40] sm:$0x1]  ;;  %v4182_v47 = vld [vmem:[%s4886_s10 + $0x30] sm:$0xff] }
 0x104   : > { %1319 = vrot.lane.b32.xlu0 %v799_v39, %s4808_s22  ;;  %v2021_v13 = vunpack.c.l.b16 %v615_v17  ;;  %3449 = vmatpush.bf16.msra.mxu0 %v4182_v47 }
 0x105   : > { %v5257_v35 = vpop.permute.xlu1 %1077  ;;  %v5259_v63 = vpop.permute.xlu2 %1097  ;;  %4627 = vmatpush.bf16.msra.mxu3 %v4182_v47  ;;  %v4180_v47 = vld [vmem:[%s4886_s10 + $0x20] sm:$0xff] }
 0x106   : > { %6651 = vst [vmem:[#allocation9_spill] sm:$0xff] %v5259_v63  ;;  %v5261_v4 = vpop.permute.xlu0 %978  ;;  %v2037_v31 = vpack.c.b16 %v2021_v13, %v2021_v13 }
 0x107   : > { %v5266_v6 = vsel %vm2101_vm2, %v5254_v55, %v5261_v4 }
 0x108   : > { %6652 = vst [vmem:[#allocation10_spill] sm:$0xff] %v5266_v6  ;;  %v2054_v1 = vrot.slane %v2037_v31, 5  ;;  %3450 = vmatpush.bf16.msra.mxu0 %v4181_v30 }
 0x109   : > { %4628 = vmatpush.bf16.msra.mxu3 %v4181_v30 }
 0x10a   : > { %v2055_v43 = vsel %vm1028_vm1, %v5102_v0, %v2054_v1 }
 0x10b   : > { %1583 = vrot.lane.b32.xlu1 %v1533_v54, %s4806_s14  ;;  %1773 = vrot.lane.b32.xlu2 %v4573_v9, %s4807_s16  ;;  %v2544_v57 = vshrl.u32 %v2055_v43, 16  ;;  %v2547_v11 = vshll.u32 %v2055_v43, 16  ;;  %v4192_v9 = vld [vmem:[%s4886_s10 + $0x80] sm:$0xff]  ;;  %v2538_v54 = vrot.slane %v2536_v48, 3  ;;  %v619_v48 = vld [vmem:[#allocation2 + $0x58] sm:$0x1] }
 0x10c   : > { %1581 = vrot.lane.b32.xlu0 %v5112_v10, %s4806_s14  ;;  %3633 = vmatpush.bf16.msra.mxu2 %v4192_v9  ;;  %v2022_v52 = vunpack.c.l.b16 %v619_v48  ;;  %v4679_v48 = vld [vmem:[#allocation2 + $0x7c] sm:$0xf0]  }
 0x10d   : > { %v1084_v21 = vpop.permute.xlu1 %1083  ;;  %v5278_v28 = vpop.permute.xlu2 %1103  ;;  %v2546_v17 = vrot.slane %v2544_v57, 3  ;;  %v2549_v0 = vrot.slane %v2547_v11, 4  ;;  %v2542_v31 = vor.u32 %v2541_v16, %v2538_v54  ;;  %3451 = vmatpush.bf16.msra.mxu0 %v4180_v47  ;;  %4629 = vmatpush.bf16.msra.mxu3 %v4180_v47 }
 0x10e   : > { %6653 = vst [vmem:[#allocation11_spill] sm:$0xff] %v5278_v28  ;;  %v5281_v33 = vsel %vm2182_vm3, %v2111_v20, %v1084_v21  ;;  %v5283_v39 = vpop.permute.xlu0 %1081  ;;  %v2116_v20 = vsel %vm2101_vm2, %v5188_v56, %v5183_v36  ;;  %v562_v56 = vld [vmem:[#allocation2 + $0x70] sm:$0x1]  ;;  %v2038_v54 = vpack.c.b16 %v2022_v52, %v2022_v52 }
 0x10f   : > { %v2550_v12 = vor.u32 %v2549_v0, %v2546_v17  ;;  %v1496_v9 = vunpack.c.l.b16 %v562_v56  ;;  %v4179_v17 = vld [vmem:[%s4886_s10 + $0x18] sm:$0xff]  ;;  %v4190_v56 = vld [vmem:[%s4886_s10 + $0x70] sm:$0xff] }
 0x110   : > { %v4191_v0 = vld [vmem:[%s4886_s10 + $0x78] sm:$0xff] }
 0x111   : > { %v2551_v43 = vsel %vm2504_vm4, %v2542_v31, %v2550_v12  ;;  %3452 = vmatpush.bf16.msra.mxu0 %v4179_v17  ;;  %3537 = vmatpush.bf16.msra.mxu1 %v4191_v0  ;;  %v4178_v31 = vld [vmem:[%s4886_s10 + $0x10] sm:$0xff]  ;;  %v2583_v12 = vshrl.u32 %v5112_v10, 16 }
 0x112   : > { %4153 = vmatmul.msk.bf16.vlgmr.msra.gmra.mxu2 %vm2101_vm2, %v2551_v43  ;;  %4630 = vmatpush.bf16.msra.mxu3 %v4179_v17 }
 0x113   : > { %1977 = vrot.lane.b32.xlu1 %v5022_v22, %s4808_s22  ;;  %1129 = vrot.lane.b32.xlu2 %v5287_v18, %s4807_s16  ;;  %v1069_v22 = vrot.slane %v1025_v40, 5 }
 0x114   : > { %1775 = vrot.lane.b32.xlu0 %v5290_v50, %s4807_s16 }
 0x115   : > { %v5304_v13 = vpop.permute.xlu1 %1089  ;;  %v5306_v19 = vpop.permute.xlu2 %1109  ;;  %v1070_v40 = vsel %vm1028_vm1, %v5287_v18, %v1069_v22  ;;  %v4513_v22 = vor.u32 %v4663_v23, %v4512_v2  ;;  %3453 = vmatpush.bf16.msra.mxu0 %v4178_v31  ;;  %v2585_v2 = vrot.slane %v2583_v12, 3  ;;  %3538 = vmatpush.bf16.msra.mxu1 %v4190_v56  ;;  %v4189_v12 = vld [vmem:[%s4886_s10 + $0x68] sm:$0xff] }
 0x116   : > { %6654 = vst [vmem:[#allocation12_spill] sm:$0xff] %v5306_v19  ;;  %v1088_v21 = vpop.permute.xlu0 %1087  ;;  %4631 = vmatpush.bf16.msra.mxu3 %v4178_v31  ;;  %v4176_v31 = vld [vmem:[%s4886_s10] sm:$0xff] }
 0x117   : > { %v5313_v1 = vsel %vm2182_vm3, %v2116_v20, %v1088_v21  ;;  %v1512_v20 = vpack.c.b16 %v1496_v9, %v1496_v9  ;;  %v541_v21 = vld [vmem:[#allocation2 + $0x160] sm:$0x1]  ;;  %v4217_v9 = vunpack.c.h.b16 %v5012_v8 }
 0x118   : > { %v1010_v52 = vunpack.c.l.b16 %v541_v21 }
 0x119   : > { %v5352_v8 = vpack.c.b16 %v4217_v9, %v4217_v9  ;;  %3539 = vmatpush.bf16.msra.mxu1 %v4189_v12  ;;  %v5374_v9 = vld [vmem:[%s4886_s10 + $0x58] sm:$0xff] }
 0x11b   : > { %1321 = vrot.lane.b32.xlu1 %v4553_v34, %s4808_s22  ;;  %1323 = vrot.lane.b32.xlu2 %v5190_v58, %s4808_s22  ;;  %v2057_v58 = vrot.slane %v2038_v54, 5  ;;  %v2586_v34 = vshll.u32 %v5112_v10, 16 }
 0x11c   : > { %1131 = vrot.lane.b32.xlu0 %v1070_v40, %s4807_s16  ;;  %v4576_v40 = vld [vmem:[#allocation2 + $0x7c] sm:$0x8] }
 0x11d   : > { %v5324_v57 = vpop.permute.xlu1 %1095  ;;  %v5326_v11 = vpop.permute.xlu2 %1115  ;;  %v2058_v30 = vsel %vm1028_vm1, %v5112_v10, %v2057_v58  ;;  %v2588_v23 = vrot.slane %v2586_v34, 4  ;;  %v1535_v58 = vrot.slane %v1512_v20, 5  ;;  %v4577_v24 = vor.u32 %v4679_v48, %v4576_v40  ;;  %v623_v40 = vld [vmem:[#allocation2 + $0x70] sm:$0x1] }
 0x11e   : > { %6655 = vst [vmem:[#allocation13_spill] sm:$0xff] %v5326_v11  ;;  %v5328_v16 = vpop.permute.xlu0 %1093  ;;  %v2591_v43 = vshrl.u32 %v2058_v30, 16  ;;  %v2594_v47 = vshll.u32 %v2058_v30, 16  ;;  %v4674_v11 = vld [vmem:[#allocation2 + $0x16c] sm:$0xf0]  }
 0x11f   : > { %v2589_v21 = vor.u32 %v2588_v23, %v2585_v2 }
 0x120   : > { %v2593_v10 = vrot.slane %v2591_v43, 3  ;;  %v2596_v49 = vrot.slane %v2594_v47, 4  ;;  %v1026_v43 = vpack.c.b16 %v1010_v52, %v1010_v52  ;;  %v5365_v47 = vrot.slane %v5070_v7, 5 }
 0x121   : > { %v2023_v52 = vunpack.c.l.b16 %v623_v40 }
 0x122   : > { %v2597_v34 = vor.u32 %v2596_v49, %v2593_v10  ;;  %v4188_v49 = vld [vmem:[%s4886_s10 + $0x60] sm:$0xff]  ;;  %v1072_v48 = vrot.slane %v1026_v43, 5  ;;  %v5387_v43 = vld [vmem:[%s4886_s10 + $0x50] sm:$0xff] }
 0x123   : > { %1283 = vrot.lane.b32.xlu1 %v5290_v50, %s4808_s22  ;;  %1585 = vrot.lane.b32.xlu2 %v5123_v25, %s4806_s14  ;;  %v2039_v10 = vpack.c.b16 %v2023_v52, %v2023_v52 }
 0x124   : > { %1281 = vrot.lane.b32.xlu0 %v4513_v22, %s4808_s22  ;;  %v4177_v22 = vld [vmem:[%s4886_s10 + $0x8] sm:$0xff]  ;;  %v2598_v20 = vsel %vm2504_vm4, %v2589_v21, %v2597_v34  ;;  %3540 = vmatpush.bf16.msra.mxu1 %v4188_v49  ;;  %v1073_v7 = vsel %vm1028_vm1, %v5365_v47, %v1072_v48  ;;  %v2630_v21 = vshrl.u32 %v5123_v25, 16  ;;  %v2633_v34 = vshll.u32 %v5123_v25, 16 }
 0x125   : > { %v5344_v54 = vpop.permute.xlu1 %1101  ;;  %v5346_v17 = vpop.permute.xlu2 %1121  ;;  %3454 = vmatpush.bf16.msra.mxu0 %v4177_v22  ;;  %4632 = vmatpush.bf16.msra.mxu3 %v4177_v22 }
 0x126   : > { %6656 = vst [vmem:[#allocation14_spill] sm:$0xff] %v5344_v54  ;;  %v5348_v30 = vpop.permute.xlu0 %1099  ;;  %4154 = vmatmul.msk.bf16.gmra.mxu2 %vm2101_vm2, %v2598_v20  ;;  %v2632_v48 = vrot.slane %v2630_v21, 3  ;;  %v2635_v52 = vrot.slane %v2633_v34, 4  ;;  %v5400_v21 = vld [vmem:[%s4886_s10 + $0x48] sm:$0xff]  ;;  %v5403_v54 = vld [vmem:[#allocation2 + $0x98] sm:$0xff]  }
 0x127   : > { %6657 = vst [vmem:[#allocation15_spill] sm:$0xff] %v5346_v17  ;;  %v1536_v17 = vsel %vm1028_vm1, %v5123_v25, %v1535_v58  ;;  %v566_v58 = vld [vmem:[#allocation2 + $0x88] sm:$0x1] }
 0x128   : > { %3541 = vmatpush.bf16.msra.mxu1 %v5374_v9  ;;  %v1497_v40 = vunpack.c.l.b16 %v566_v58 }
 0x129   : > { %3455 = vmatpush.bf16.msra.mxu0 %v4176_v31  ;;  %4633 = vmatpush.bf16.msra.mxu3 %v4176_v31  ;;  %v4664_v31 = vld [vmem:[#allocation2 + $0x7c] sm:$0xf0]  }
 0x12a   : > { %v1513_v34 = vpack.c.b16 %v1497_v40, %v1497_v40 }
 0x12b   : > { %1777 = vrot.lane.b32.xlu1 %v4577_v24, %s4807_s16  ;;  %1779 = vrot.lane.b32.xlu2 %v5352_v8, %s4807_s16 }
 0x12c   : > { %1587 = vrot.lane.b32.xlu0 %v1536_v17, %s4806_s14  ;;  %v2060_v17 = vrot.slane %v2039_v10, 5  ;;  %3542 = vmatpush.bf16.msra.mxu1 %v5387_v43 }
 0x12d   : > { %v5367_v2 = vpop.permute.xlu1 %1107  ;;  %v5369_v23 = vpop.permute.xlu2 %1271  ;;  %4634 = vmatpush.bf16.msrb.mxu3 %v4191_v0  ;;  %v4516_v0 = vld [vmem:[#allocation2 + $0x7c] sm:$0x8] }
 0x12e   : > { %6658 = vst [vmem:[#allocation16_spill] sm:$0xff] %v5367_v2  ;;  %v5371_v24 = vpop.permute.xlu0 %1105  ;;  %v2061_v22 = vsel %vm1028_vm1, %v5123_v25, %v2060_v17  ;;  %v4556_v17 = vld [vmem:[#allocation2 + $0x16c] sm:$0x8]  ;;  %v4517_v58 = vor.u32 %v4664_v31, %v4516_v0  ;;  %v4406_v2 = vld [vmem:[#allocation2 + $0x80] sm:$0xff]   ;;  %v1538_v0 = vrot.slane %v1513_v34, 5 }
 0x12f   : > { %6659 = vst [vmem:[#allocation17_spill] sm:$0xff] %v5371_v24  ;;  %v2638_v20 = vshrl.u32 %v2061_v22, 16  ;;  %v2641_v10 = vshll.u32 %v2061_v22, 16  ;;  %v4557_v22 = vor.u32 %v4674_v11, %v4556_v17  ;;  %v4644_v24 = vld [vmem:[#allocation2 + $0x4] sm:$0xf0]   ;;  %v5410_v11 = vld [vmem:[%s4886_s10 + $0x40] sm:$0xff]  ;;  %v4277_v31 = vunpack.c.h.b16 %v4406_v2 }
 0x130   : > { %3543 = vmatpush.bf16.msra.mxu1 %v5400_v21 }
 0x131   : > { %4635 = vmatpush.bf16.msrb.mxu3 %v4190_v56  ;;  %v2643_v41 = vrot.slane %v2641_v10, 4 }
 0x133   : > { %1133 = vrot.lane.b32.xlu1 %v5365_v47, %s4807_s16  ;;  %1135 = vrot.lane.b32.xlu2 %v1073_v7, %s4807_s16  ;;  %v2640_v7 = vrot.slane %v2638_v20, 3  ;;  %v773_v20 = vpack.c.b16 %v4197_v26, %v4197_v26  ;;  %v4437_v26 = vor.u32 %v4644_v24, %v4436_v5 }
 0x134   : > { %1979 = vrot.lane.b32.xlu0 %v5041_v37, %s4808_s22  ;;  %v2636_v37 = vor.u32 %v2635_v52, %v2632_v48  ;;  %v627_v48 = vld [vmem:[#allocation2 + $0x88] sm:$0x1]  ;;  %3544 = vmatpush.bf16.msra.mxu1 %v5410_v11 }
 0x135   : > { %v5391_v25 = vpop.permute.xlu1 %1113  ;;  %v5393_v56 = vpop.permute.xlu2 %1765  ;;  %4636 = vmatpush.bf16.msrb.mxu3 %v4189_v12  ;;  %v1537_v12 = vrot.slane %v4406_v2, 5  ;;  %v2106_v10 = vsel %vm2101_vm2, %v773_v20, %v5185_v51  ;;  %v1881_v2 = vshll.u32 %v5403_v54, 16  ;;  %v545_v20 = vld [vmem:[#allocation2 + $0x178] sm:$0x1] }
 0x136   : > { %6660 = vst [vmem:[#allocation18_spill] sm:$0xff] %v5391_v25  ;;  %v5397_v19 = vpop.permute.xlu0 %1111  ;;  %v2644_v25 = vor.u32 %v2643_v41, %v2640_v7  ;;  %v2024_v41 = vunpack.c.l.b16 %v627_v48  ;;  %v2186_v5 = vsel %vm2182_vm3, %v2106_v10, %v5218_v32  ;;  %v1246_v7 = vpack.c.b16 %v4277_v31, %v4277_v31  ;;  %v4580_v31 = vld [vmem:[#allocation2 + $0x94] sm:$0x8] }
 0x137   : > { %6661 = vst [vmem:[#allocation19_spill] sm:$0xff] %v5397_v19  ;;  %v2251_v24 = vsel %vm2247_vm5, %v2186_v5, %v5369_v23  ;;  %v1539_v17 = vsel %vm1028_vm1, %v1537_v12, %v1538_v0  ;;  %v2677_v32 = vshrl.u32 %v5126_v29, 16  ;;  %v2680_v48 = vshll.u32 %v5126_v29, 16  ;;  %v4738_v5 = vld [vmem:[#allocation2 + $0x20] sm:$0xff]  }
 0x138   : > { %v2645_v3 = vsel %vm2504_vm4, %v2636_v37, %v2644_v25  ;;  %v2040_v52 = vpack.c.b16 %v2024_v41, %v2024_v41  ;;  %v2512_v41 = vshrl.u32 %v2251_v24, 16  ;;  %v2515_v0 = vshll.u32 %v2251_v24, 16 }
 0x139   : > { %4637 = vmatpush.bf16.msrb.mxu3 %v4188_v49  ;;  %4155 = vmatmul.msk.bf16.gmra.mxu2 %vm2101_vm2, %v2645_v3  ;;  %v1883_v3 = vrot.slane %v1881_v2, 5  ;;  %v1350_v24 = vshrl.u32 %v4738_v5, 16 }
 0x13a   : > { %v2063_v37 = vrot.slane %v2040_v52, 5  ;;  %v2682_v52 = vrot.slane %v2680_v48, 4 }
 0x13b   : > { %1327 = vrot.lane.b32.xlu1 %v5254_v55, %s4808_s22  ;;  %1285 = vrot.lane.b32.xlu2 %v4517_v58, %s4808_s22  ;;  %v1878_v55 = vshrl.u32 %v5403_v54, 16  ;;  %v2104_v58 = vsel %vm2101_vm2, %v4437_v26, %v5185_v51  ;;  %v1011_v26 = vunpack.c.l.b16 %v545_v20  ;;  %v1352_v63 = vrot.slane %v1350_v24, 4 }
 0x13c   : > { %1325 = vrot.lane.b32.xlu0 %v4557_v22, %s4808_s22  ;;  %v4341_v22 = vunpack.c.h.b16 %v5403_v54  ;;  %v2184_v23 = vsel %vm2182_vm3, %v2104_v58, %v5257_v35  ;;  %v4680_v35 = vld [vmem:[#allocation2 + $0x94] sm:$0xf0]  }
 0x13d   : > { %v5414_v40 = vpop.permute.xlu1 %1119  ;;  %v5416_v49 = vpop.permute.xlu2 %1273  ;;  %4638 = vmatpush.bf16.msrb.mxu3 %v5374_v9  ;;  %v1880_v34 = vrot.slane %v1878_v55, 4  ;;  %v2064_v9 = vsel %vm1028_vm1, %v5126_v29, %v2063_v37  ;;  %v2679_v55 = vrot.slane %v2677_v32, 3  ;;  %v1353_v37 = vshll.u32 %v4738_v5, 16 }
 0x13e   : > { %6662 = vst [vmem:[#allocation20_spill] sm:$0xff] %v5414_v40  ;;  %v5422_v25 = vpop.permute.xlu0 %1117  ;;  %v2685_v51 = vshrl.u32 %v2064_v9, 16  ;;  %v2688_v10 = vshll.u32 %v2064_v9, 16  ;;  %v2514_v9 = vrot.slane %v2512_v41, 3  ;;  %v2517_v32 = vrot.slane %v2515_v0, 4 }
 0x13f   : > { %6663 = vst [vmem:[#allocation21_spill] sm:$0xff] %v5422_v25  ;;  %v2683_v40 = vor.u32 %v2682_v52, %v2679_v55  ;;  %v1027_v19 = vpack.c.b16 %v1011_v26, %v1011_v26  ;;  %v4675_v26 = vld [vmem:[#allocation2 + $0x184] sm:$0xf0]  }
 0x140   : > { %v2690_v20 = vrot.slane %v2688_v10, 4 }
 0x141   : > { %4639 = vmatpush.bf16.msrb.mxu3 %v5387_v43  ;;  %v5446_v43 = vpack.c.b16 %v4341_v22, %v4341_v22  ;;  %v4581_v22 = vor.u32 %v4680_v35, %v4580_v31  ;;  %v1075_v0 = vrot.slane %v1027_v19, 5  ;;  %v4560_v31 = vld [vmem:[#allocation2 + $0x184] sm:$0x8]  ;;  %v5466_v35 = vrot.slane %v5403_v54, 5 }
 0x143   : > { %1589 = vrot.lane.b32.xlu1 %v1537_v12, %s4806_s14  ;;  %1591 = vrot.lane.b32.xlu2 %v1539_v17, %s4806_s14  ;;  %v2687_v12 = vrot.slane %v2685_v51, 3  ;;  %v4645_v51 = vld [vmem:[#allocation2 + $0x1c] sm:$0xf0]   ;;  %v2724_v54 = vshrl.u32 %v5466_v35, 16 }
 0x144   : > { %1287 = vrot.lane.b32.xlu0 %v1246_v7, %s4808_s22  ;;  %v1884_v7 = vor.u32 %v1883_v3, %v1880_v34  ;;  %v631_v34 = vld [vmem:[#allocation2 + $0xa0] sm:$0x1]  ;;  %v2518_v3 = vor.u32 %v2517_v32, %v2514_v9  ;;  %v2727_v9 = vshll.u32 %v5466_v35, 16 }
 0x145   : > { %v1270_v29 = vpop.permute.xlu1 %1269  ;;  %v5444_v2 = vpop.permute.xlu2 %1579  ;;  %4640 = vmatpush.bf16.msrb.mxu3 %v5400_v21  ;;  %v2691_v28 = vor.u32 %v2690_v20, %v2687_v12  ;;  %v2025_v41 = vunpack.c.l.b16 %v631_v34  ;;  %v570_v12 = vld [vmem:[#allocation2 + $0xa0] sm:$0x1]  ;;  %v2726_v34 = vrot.slane %v2724_v54, 3 }
 0x146   : > { %v2249_v17 = vsel %vm2247_vm5, %v2184_v23, %v1270_v29  ;;  %v5449_v58 = vpop.permute.xlu0 %1123  ;;  %v1355_v23 = vrot.slane %v1353_v37, 5  ;;  %v5470_v37 = vld [vmem:[#allocation2 + $0x188] sm:$0xff]  }
 0x147   : > { %v2505_v48 = vshrl.u32 %v2249_v17, 16  ;;  %v2508_v25 = vshll.u32 %v2249_v17, 16  ;;  %v2692_v29 = vsel %vm2504_vm4, %v2683_v40, %v2691_v28  ;;  %v4441_v28 = vor.u32 %v4645_v51, %v4440_v14 }
 0x148   : > { %v2041_v52 = vpack.c.b16 %v2025_v41, %v2025_v41 }
 0x149   : > { %v2507_v6 = vrot.slane %v2505_v48, 3  ;;  %v2510_v5 = vrot.slane %v2508_v25, 4  ;;  %4641 = vmatpush.bf16.msrb.mxu3 %v5410_v11  ;;  %v5459_v25 = vrot.slane %v5086_v38, 5  ;;  %4156 = vmatmul.msk.bf16.gmra.mxu2 %vm2101_vm2, %v2692_v29  ;;  %v4561_v38 = vor.u32 %v4675_v26, %v4560_v31  ;;  %v4665_v48 = vld [vmem:[#allocation2 + $0x94] sm:$0xf0]  }
 0x14a   : > { %v2066_v24 = vrot.slane %v2041_v52, 5  ;;  %v2109_v14 = vsel %vm2101_vm2, %v4441_v28, %v5206_v62  ;;  %v4520_v62 = vld [vmem:[#allocation2 + $0x94] sm:$0x8]  ;;  %v1498_v29 = vunpack.c.l.b16 %v570_v12 }
 0x14b   : > { %1783 = vrot.lane.b32.xlu1 %v5446_v43, %s4807_s16  ;;  %1981 = vrot.lane.b32.xlu2 %v1884_v7, %s4808_s22  ;;  %v2511_v21 = vor.u32 %v2510_v5, %v2507_v6  ;;  %v1356_v6 = vor.u32 %v1355_v23, %v1352_v63  ;;  %v1076_v19 = vsel %vm1028_vm1, %v5459_v25, %v1075_v0  ;;  %v4739_v63 = vld [vmem:[#allocation2 + $0x38] sm:$0xff]  }
 0x14c   : > { %1781 = vrot.lane.b32.xlu0 %v4581_v22, %s4807_s16  ;;  %v2067_v17 = vsel %vm1028_vm1, %v5466_v35, %v2066_v24  ;;  %v1358_v7 = vshrl.u32 %v4739_v63, 16  ;;  %v2188_v32 = vsel %vm2182_vm3, %v2109_v14, %v5283_v39  ;;  %v4321_v22 = vunpack.c.h.b16 %v5470_v37 }
 0x14d   : > { %v1576_v11 = vpop.permute.xlu1 %1575  ;;  %v5462_v40 = vpop.permute.xlu2 %1975  ;;  %v2519_v55 = vsel %vm2504_vm4, %v2511_v21, %v2518_v3  ;;  %v2732_v5 = vshrl.u32 %v2067_v17, 16  ;;  %v2735_v51 = vshll.u32 %v2067_v17, 16  ;;  %v2729_v21 = vrot.slane %v2727_v9, 4 }
 0x14e   : > { %v1574_v10 = vpop.permute.xlu0 %1573  ;;  %3456 = vmatmul.bf16.vlgmr.msra.gmra.mxu0 %v2519_v55  ;;  %v2316_v23 = vsel %vm2101_vm2, %v1356_v6, %v1576_v11  ;;  %v1361_v3 = vshll.u32 %v4739_v63, 16  ;;  %v2253_v28 = vsel %vm2247_vm5, %v2188_v32, %v5416_v49  ;;  %v4521_v52 = vor.u32 %v4665_v48, %v4520_v62 }
 0x14f   : > { %v2314_v20 = vsel %vm2101_vm2, %v1356_v6, %v1574_v10  ;;  %v2734_v31 = vrot.slane %v2732_v5, 3  ;;  %v2737_v26 = vrot.slane %v2735_v51, 4  ;;  %v2730_v6 = vor.u32 %v2729_v21, %v2726_v34  ;;  %v4423_v5 = vld [vmem:[#allocation2 + $0xb0] sm:$0xff]   ;;  %v4584_v21 = vld [vmem:[#allocation2 + $0xac] sm:$0x8] }
 0x150   : > { %v2393_v41 = vsel %vm2182_vm3, %v2314_v20, %v5393_v56  ;;  %v5496_v56 = vpack.c.b16 %v4321_v22, %v4321_v22  ;;  %v1514_v12 = vpack.c.b16 %v1498_v29, %v1498_v29  ;;  %v2552_v49 = vshrl.u32 %v2253_v28, 16 }
 0x151   : > { %v1360_v9 = vrot.slane %v1358_v7, 4  ;;  %v1363_v32 = vrot.slane %v1361_v3, 5  ;;  %v2555_v48 = vshll.u32 %v2253_v28, 16  ;;  %v4681_v7 = vld [vmem:[#allocation2 + $0xac] sm:$0xf0]  }
 0x152   : > { %v1541_v29 = vrot.slane %v1514_v12, 5  ;;  %v2554_v28 = vrot.slane %v2552_v49, 3 }
 0x153   : > { %1139 = vrot.lane.b32.xlu1 %v1076_v19, %s4807_s16  ;;  %1329 = vrot.lane.b32.xlu2 %v4561_v38, %s4808_s22  ;;  %v2738_v19 = vor.u32 %v2737_v26, %v2734_v31  ;;  %v1886_v31 = vshrl.u32 %v4423_v5, 16  ;;  %v1889_v26 = vshll.u32 %v4423_v5, 16 }
 0x154   : > { %1137 = vrot.lane.b32.xlu0 %v5459_v25, %s4807_s16 }
 0x155   : > { %v1974_v39 = vpop.permute.xlu1 %1973  ;;  %v5489_v0 = vpop.permute.xlu2 %1317  ;;  %v2739_v62 = vsel %vm2504_vm4, %v2730_v6, %v2738_v19  ;;  %v2557_v6 = vrot.slane %v2555_v48, 4  ;;  %v5510_v19 = vld [vmem:[#allocation2 + $0x124] sm:$0x8]  ;;  %v1891_v49 = vrot.slane %v1889_v26, 5 }
 0x156   : > { %v2457_v11 = vsel %vm2247_vm5, %v2393_v41, %v1974_v39  ;;  %v1768_v55 = vpop.permute.xlu0 %1767 }
 0x157   : > { %v2520_v10 = vshrl.u32 %v2457_v11, 16  ;;  %v2523_v38 = vshll.u32 %v2457_v11, 16  ;;  %v2395_v24 = vsel %vm2182_vm3, %v2316_v23, %v1768_v55  ;;  %v635_v23 = vld [vmem:[#allocation2 + $0xb8] sm:$0x1]  ;;  %v1364_v11 = vor.u32 %v1363_v32, %v1360_v9 }
 0x158   : > { %v2458_v14 = vsel %vm2247_vm5, %v2395_v24, %v1974_v39  ;;  %v4585_v24 = vor.u32 %v4681_v7, %v4584_v21  ;;  %v5516_v32 = vrot.slane %v4423_v5, 5 }
 0x159   : > { %v2522_v17 = vrot.slane %v2520_v10, 3  ;;  %v2525_v63 = vrot.slane %v2523_v38, 4  ;;  %v2527_v20 = vshrl.u32 %v2458_v14, 16  ;;  %v2530_v54 = vshll.u32 %v2458_v14, 16  ;;  %4157 = vmatmul.msk.bf16.gmra.mxu2 %vm2101_vm2, %v2739_v62  ;;  %v5512_v14 = vld [vmem:[#allocation2 + $0x124] sm:$0xf0]  }
 0x15a   : > { %v2771_v21 = vshrl.u32 %v5516_v32, 16 }
 0x15b   : > { %v2529_v51 = vrot.slane %v2527_v20, 3  ;;  %v2532_v34 = vrot.slane %v2530_v54, 4  ;;  %1289 = vrot.lane.b32.xlu1 %v4521_v52, %s4808_s22  ;;  %1291 = vrot.lane.b32.xlu2 %v5446_v43, %s4808_s22  ;;  %v2526_v22 = vor.u32 %v2525_v63, %v2522_v17  ;;  %v598_v43 = vld [vmem:[#allocation2 + $0x148] sm:$0x1]  ;;  %v2026_v52 = vunpack.c.l.b16 %v635_v23 }
 0x15c   : > { %1331 = vrot.lane.b32.xlu0 %v5496_v56, %s4808_s22  ;;  %v1542_v63 = vsel %vm1028_vm1, %v5466_v35, %v1541_v29  ;;  %v4345_v20 = vunpack.c.h.b16 %v4423_v5  ;;  %v1888_v54 = vrot.slane %v1886_v31, 4  ;;  %v1505_v9 = vunpack.c.l.b16 %v598_v43 }
 0x15d   : > { %v1578_v3 = vpop.permute.xlu1 %1577  ;;  %v5505_v39 = vpop.permute.xlu2 %1279  ;;  %v2533_v41 = vor.u32 %v2532_v34, %v2529_v51  ;;  %v2042_v34 = vpack.c.b16 %v2026_v52, %v2026_v52  ;;  %v2321_v23 = vsel %vm2101_vm2, %v1364_v11, %v5444_v2  ;;  %v2558_v29 = vor.u32 %v2557_v6, %v2554_v28 }
 0x15e   : > { %v1276_v55 = vpop.permute.xlu0 %1275  ;;  %v2319_v5 = vsel %vm2101_vm2, %v1364_v11, %v1578_v3  ;;  %v2774_v31 = vshll.u32 %v5516_v32, 16  ;;  %v1892_v2 = vor.u32 %v1891_v49, %v1888_v54  ;;  %v5531_v43 = vpack.c.b16 %v4345_v20, %v4345_v20  ;;  %v4430_v54 = vld [vmem:[#allocation2 + $0x158] sm:$0xff]  }
 0x15f   : > { %v2255_v10 = vsel %vm2247_vm5, %v5281_v33, %v1276_v55  ;;  %v2534_v38 = vsel %vm2504_vm4, %v2526_v22, %v2533_v41  ;;  %v4740_v33 = vld [vmem:[#allocation2 + $0x128] sm:$0xff]   ;;  %v4485_v22 = vor.u32 %v5512_v14, %v5510_v19  ;;  %v2069_v41 = vrot.slane %v2042_v34, 5 }
 0x160   : > { %v2559_v12 = vshrl.u32 %v2255_v10, 16  ;;  %v2562_v17 = vshll.u32 %v2255_v10, 16  ;;  %3545 = vmatmul.bf16.vlgmr.msra.gmra.mxu1 %v2534_v38  ;;  %v4245_v62 = vunpack.c.h.b16 %v4740_v33  ;;  %v5533_v52 = vpack.c.b16 %v1505_v9, %v1505_v9  ;;  %v4444_v9 = vld [vmem:[#allocation2 + $0x34] sm:$0x8] }
 0x161   : > { %v2773_v28 = vrot.slane %v2771_v21, 3  ;;  %v2776_v11 = vrot.slane %v2774_v31, 4  ;;  %v1942_v21 = vshrl.u32 %v4430_v54, 16  ;;  %v4612_v31 = vld [vmem:[#allocation2 + $0x154] sm:$0x8] }
 0x162   : > { %v2561_v48 = vrot.slane %v2559_v12, 3  ;;  %v2564_v51 = vrot.slane %v2562_v17, 4  ;;  %v4646_v12 = vld [vmem:[#allocation2 + $0x34] sm:$0xf0]  }
 0x163   : > { %1595 = vrot.lane.b32.xlu1 %v1542_v63, %s4806_s14  ;;  %1785 = vrot.lane.b32.xlu2 %v4585_v24, %s4807_s16  ;;  %v2777_v49 = vor.u32 %v2776_v11, %v2773_v28  ;;  %v639_v11 = vld [vmem:[#allocation2 + $0xd0] sm:$0x1] }
 0x164   : > { %1593 = vrot.lane.b32.xlu0 %v5466_v35, %s4806_s14  ;;  %v2565_v7 = vor.u32 %v2564_v51, %v2561_v48  ;;  %v2070_v35 = vsel %vm1028_vm1, %v5516_v32, %v2069_v41 }
 0x165   : > { %v1772_v26 = vpop.permute.xlu1 %1771  ;;  %v5529_v55 = vpop.permute.xlu2 %1773  ;;  %v2779_v19 = vshrl.u32 %v2070_v35, 16  ;;  %v2782_v14 = vshll.u32 %v2070_v35, 16 }
 0x166   : > { %v2399_v6 = vsel %vm2182_vm3, %v2321_v23, %v1772_v26  ;;  %v1770_v10 = vpop.permute.xlu0 %1769  ;;  %v2566_v3 = vsel %vm2504_vm4, %v2558_v29, %v2565_v7  ;;  %v4373_v26 = vunpack.c.h.b16 %v4430_v54 }
 0x167   : > { %v2461_v38 = vsel %vm2247_vm5, %v2399_v6, %v5462_v40  ;;  %v2397_v24 = vsel %vm2182_vm3, %v2319_v5, %v1770_v10  ;;  %3461 = vmatmul.bf16.gmra.mxu0 %v2566_v3  ;;  %v2781_v51 = vrot.slane %v2779_v19, 3  ;;  %v2784_v34 = vrot.slane %v2782_v14, 4 }
 0x168   : > { %v2574_v17 = vshrl.u32 %v2461_v38, 16  ;;  %v2577_v63 = vshll.u32 %v2461_v38, 16  ;;  %v2460_v20 = vsel %vm2247_vm5, %v2397_v24, %v5462_v40  ;;  %v1945_v5 = vshll.u32 %v4430_v54, 16  ;;  %v4688_v40 = vld [vmem:[#allocation2 + $0x154] sm:$0xf0]  }
 0x169   : > { %v2567_v33 = vshrl.u32 %v2460_v20, 16  ;;  %v2570_v48 = vshll.u32 %v2460_v20, 16  ;;  %v2785_v28 = vor.u32 %v2784_v34, %v2781_v51  ;;  %v4445_v6 = vor.u32 %v4646_v12, %v4444_v9  ;;  %v4524_v51 = vld [vmem:[#allocation2 + $0xac] sm:$0x8]  ;;  %v4666_v34 = vld [vmem:[#allocation2 + $0xac] sm:$0xf0]  }
 0x16a   : > { %v2576_v23 = vrot.slane %v2574_v17, 3  ;;  %v2579_v29 = vrot.slane %v2577_v63, 4  ;;  %v797_v10 = vpack.c.b16 %v4245_v62, %v4245_v62  ;;  %v2259_v3 = vsel %vm2247_vm5, %v5313_v1, %v5505_v39  ;;  %v574_v39 = vld [vmem:[#allocation2 + $0xb8] sm:$0x1] }
 0x16b   : > { %v2569_v7 = vrot.slane %v2567_v33, 3  ;;  %v2572_v41 = vrot.slane %v2570_v48, 4  ;;  %1983 = vrot.lane.b32.xlu1 %v1892_v2, %s4808_s22  ;;  %1621 = vrot.lane.b32.xlu2 %v5287_v18, %s4806_s14  ;;  %v2164_v2 = vsel %vm2101_vm2, %v4485_v22, %v5249_v46  ;;  %v1562_v14 = vrot.slane %v5533_v52, 5 }
 0x16c   : > { %1787 = vrot.lane.b32.xlu0 %v5531_v43, %s4807_s16  ;;  %v2580_v35 = vor.u32 %v2579_v29, %v2576_v23  ;;  %v2786_v62 = vsel %vm2504_vm4, %v2777_v49, %v2785_v28  ;;  %v4613_v17 = vor.u32 %v4688_v40, %v4612_v31  ;;  %v5558_v63 = vrot.slane %v1942_v21, 4  ;;  %v4741_v31 = vld [vmem:[#allocation2 + $0x50] sm:$0xff]  }
 0x16d   : > { %v1128_v38 = vpop.permute.xlu1 %1127  ;;  %v5554_v24 = vpop.permute.xlu2 %1129  ;;  %v2573_v19 = vor.u32 %v2572_v41, %v2569_v7  ;;  %v5560_v1 = vrot.slane %v1945_v5, 5  ;;  %4158 = vmatmul.msk.bf16.gmra.mxu2 %vm2101_vm2, %v2786_v62  ;;  %v2027_v20 = vunpack.c.l.b16 %v639_v11  ;;  %v2606_v54 = vshrl.u32 %v2259_v3, 16  ;;  %v5573_v41 = vld [vmem:[#allocation2 + $0xc8] sm:$0xff]  }
 0x16e   : > { %v1126_v12 = vpop.permute.xlu0 %1125  ;;  %v1758_v33 = vpack.c.b16 %v4373_v26, %v4373_v26  ;;  %v2114_v52 = vsel %vm2101_vm2, %v4445_v6, %v5183_v36  ;;  %v2609_v49 = vshll.u32 %v2259_v3, 16  ;;  %v1563_v5 = vsel %vm1028_vm1, %v5287_v18, %v1562_v14 }
 0x16f   : > { %v2232_v22 = vsel %vm2182_vm3, %v2164_v2, %v1126_v12  ;;  %v2581_v9 = vsel %vm2504_vm4, %v2573_v19, %v2580_v35  ;;  %v2043_v23 = vpack.c.b16 %v2027_v20, %v2027_v20  ;;  %v2192_v29 = vsel %vm2182_vm3, %v2114_v52, %v5229_v53 }
 0x170   : > { %v2297_v48 = vsel %vm2247_vm5, %v2232_v22, %v5489_v0  ;;  %3550 = vmatmul.bf16.gmra.mxu1 %v2581_v9  ;;  %v1499_v7 = vunpack.c.l.b16 %v574_v39  ;;  %v2166_v36 = vsel %vm2101_vm2, %v797_v10, %v5249_v46  ;;  %v1948_v0 = vor.u32 %v5560_v1, %v5558_v63 }
 0x171   : > { %v3069_v21 = vshrl.u32 %v2297_v48, 16  ;;  %v1366_v40 = vshrl.u32 %v4741_v31, 16  ;;  %v5580_v26 = vrot.slane %v5573_v41, 5  ;;  %v2608_v28 = vrot.slane %v2606_v54, 3 }
 0x172   : > { %v4525_v53 = vor.u32 %v4666_v34, %v4524_v51  ;;  %v1369_v18 = vshll.u32 %v4741_v31, 16  ;;  %v2072_v6 = vrot.slane %v2043_v23, 5  ;;  %v2611_v3 = vrot.slane %v2609_v49, 4 }
 0x173   : > { %1813 = vrot.lane.b32.xlu1 %v4613_v17, %s4807_s16  ;;  %1815 = vrot.lane.b32.xlu2 %v1758_v33, %s4807_s16  ;;  %v3072_v35 = vshll.u32 %v2297_v48, 16  ;;  %v2818_v46 = vshrl.u32 %v5580_v26, 16  ;;  %v2821_v10 = vshll.u32 %v5580_v26, 16  ;;  %v2234_v11 = vsel %vm2182_vm3, %v2166_v36, %v1128_v38 }
 0x174   : > { %1623 = vrot.lane.b32.xlu0 %v1563_v5, %s4806_s14  ;;  %v3071_v2 = vrot.slane %v3069_v21, 3  ;;  %v1515_v62 = vpack.c.b16 %v1499_v7, %v1499_v7  ;;  %v2073_v12 = vsel %vm1028_vm1, %v5580_v26, %v2072_v6  ;;  %v1371_v36 = vrot.slane %v1369_v18, 5 }
 0x175   : > { %v1278_v19 = vpop.permute.xlu1 %1277  ;;  %v5588_v14 = vpop.permute.xlu2 %1323  ;;  %v2820_v1 = vrot.slane %v2818_v46, 3  ;;  %v2823_v39 = vrot.slane %v2821_v10, 4  ;;  %v2826_v20 = vshrl.u32 %v2073_v12, 16  ;;  %v2829_v33 = vshll.u32 %v2073_v12, 16  ;;  %v4588_v46 = vld [vmem:[#allocation2 + $0xc4] sm:$0x8] }
 0x176   : > { %v2257_v17 = vsel %vm2247_vm5, %v2192_v29, %v1278_v19  ;;  %v1320_v63 = vpop.permute.xlu0 %1319  ;;  %v3074_v38 = vrot.slane %v3072_v35, 4  ;;  %v1368_v29 = vrot.slane %v1366_v40, 4  ;;  %v2612_v6 = vor.u32 %v2611_v3, %v2608_v28  ;;  %v4682_v12 = vld [vmem:[#allocation2 + $0xc4] sm:$0xf0]  }
 0x177   : > { %v2599_v54 = vshrl.u32 %v2257_v17, 16  ;;  %v2602_v22 = vshll.u32 %v2257_v17, 16  ;;  %v2299_v9 = vsel %vm2247_vm5, %v2234_v11, %v1320_v63  ;;  %v2828_v48 = vrot.slane %v2826_v20, 3  ;;  %v643_v17 = vld [vmem:[#allocation2 + $0xe8] sm:$0x1] }
 0x178   : > { %v3076_v52 = vshrl.u32 %v2299_v9, 16  ;;  %v3079_v49 = vshll.u32 %v2299_v9, 16  ;;  %v2824_v23 = vor.u32 %v2823_v39, %v2820_v1  ;;  %v2831_v21 = vrot.slane %v2829_v33, 4  ;;  %v4657_v20 = vld [vmem:[#allocation2 + $0x13c] sm:$0xf0]  }
 0x179   : > { %v2601_v51 = vrot.slane %v2599_v54, 3  ;;  %v2604_v34 = vrot.slane %v2602_v22, 4  ;;  %v3075_v10 = vor.u32 %v3074_v38, %v3071_v2  ;;  %v1544_v19 = vrot.slane %v1515_v62, 5  ;;  %v5606_v62 = vld [vmem:[#allocation2 + $0x13c] sm:$0x8]  ;;  %v5610_v9 = vld [vmem:[#allocation2 + $0xe0] sm:$0xff]  }
 0x17a   : > { %v3078_v5 = vrot.slane %v3076_v52, 3  ;;  %v3081_v7 = vrot.slane %v3079_v49, 4  ;;  %v2832_v35 = vor.u32 %v2831_v21, %v2828_v48  ;;  %v2028_v18 = vunpack.c.l.b16 %v643_v17  ;;  %v602_v22 = vld [vmem:[#allocation2 + $0x160] sm:$0x1]  ;;  %v4742_v38 = vld [vmem:[%s4886_s10 + $0x88] sm:$0xff] }
 0x17b   : > { %1293 = vrot.lane.b32.xlu1 %v4525_v53, %s4808_s22  ;;  %1295 = vrot.lane.b32.xlu2 %v5531_v43, %s4808_s22  ;;  %v2605_v31 = vor.u32 %v2604_v34, %v2601_v51  ;;  %v1372_v43 = vor.u32 %v1371_v36, %v1368_v29  ;;  %v1897_v2 = vshll.u32 %v5573_v41, 16  ;;  %v4589_v39 = vor.u32 %v4682_v12, %v4588_v46 }
 0x17c   : > { %1997 = vrot.lane.b32.xlu0 %v1948_v0, %s4808_s22  ;;  %v3082_v11 = vor.u32 %v3081_v7, %v3078_v5  ;;  %v2833_v53 = vsel %vm2504_vm4, %v2824_v23, %v2832_v35  ;;  %v1894_v0 = vshrl.u32 %v5573_v41, 16  ;;  %v1545_v54 = vsel %vm1028_vm1, %v5516_v32, %v1544_v19 }
 0x17d   : > { %v1584_v63 = vpop.permute.xlu1 %1583  ;;  %v5598_v1 = vpop.permute.xlu2 %1585  ;;  %v2613_v40 = vsel %vm2504_vm4, %v2605_v31, %v2612_v6  ;;  %4159 = vmatmul.msk.bf16.gmra.mxu2 %vm2101_vm2, %v2833_v53  ;;  %v2044_v33 = vpack.c.b16 %v2028_v18, %v2028_v18  ;;  %v4349_v52 = vunpack.c.h.b16 %v5573_v41  ;;  %v5615_v49 = vrot.slane %v5610_v9, 5  ;;  %v4743_v31 = vld [vmem:[%s4886_s10 + $0x80] sm:$0xff] }
 0x17e   : > { %v1582_v28 = vpop.permute.xlu0 %1581  ;;  %3466 = vmatmul.bf16.gmra.mxu0 %v2613_v40  ;;  %v3083_v3 = vsel %vm2504_vm4, %v3075_v10, %v3082_v11  ;;  %v1896_v51 = vrot.slane %v1894_v0, 4  ;;  %v1899_v34 = vrot.slane %v1897_v2, 5  ;;  %v4489_v21 = vor.u32 %v4657_v20, %v5606_v62  ;;  %v4647_v20 = vld [vmem:[#allocation2 + $0x4c] sm:$0xf0]  }
 0x17f   : > { %3516 = vmatmul.bf16.vlgmr.msra.gmra.mxu3 %v3083_v3  ;;  %v2324_v48 = vsel %vm2101_vm2, %v1372_v43, %v1582_v28  ;;  %v2075_v23 = vrot.slane %v2044_v33, 5  ;;  %v1506_v5 = vunpack.c.l.b16 %v602_v22  ;;  %v2326_v7 = vsel %vm2101_vm2, %v1372_v43, %v1584_v63  ;;  %v5637_v28 = vld [vmem:[#allocation2 + $0x170] sm:$0xff]  }
 0x180   : > { %4642 = vmatpush.bf16.msra.mxu3 %v4742_v38  ;;  %v2865_v29 = vshrl.u32 %v5615_v49, 16  ;;  %v2868_v36 = vshll.u32 %v5615_v49, 16  ;;  %v2401_v46 = vsel %vm2182_vm3, %v2324_v48, %v5529_v55  ;;  %v5633_v10 = vpack.c.b16 %v4349_v52, %v4349_v52  ;;  %v4448_v55 = vld [vmem:[#allocation2 + $0x4c] sm:$0x8]  ;;  %v4689_v48 = vld [vmem:[#allocation2 + $0x16c] sm:$0xf0]  }
 0x181   : > { %v2076_v41 = vsel %vm1028_vm1, %v5615_v49, %v2075_v23  ;;  %v1900_v17 = vor.u32 %v1899_v34, %v1896_v51  ;;  %v1522_v2 = vpack.c.b16 %v1506_v5, %v1506_v5  ;;  %v4616_v52 = vld [vmem:[#allocation2 + $0x16c] sm:$0x8]  ;;  %v4377_v51 = vunpack.c.h.b16 %v5637_v28 }
 0x182   : > { %v2873_v11 = vshrl.u32 %v2076_v41, 16  ;;  %v2876_v19 = vshll.u32 %v2076_v41, 16  ;;  %v2867_v63 = vrot.slane %v2865_v29, 3  ;;  %v2870_v40 = vrot.slane %v2868_v36, 4 }
 0x183   : > { %1599 = vrot.lane.b32.xlu1 %v1545_v54, %s4806_s14  ;;  %1789 = vrot.lane.b32.xlu2 %v4589_v39, %s4807_s16  ;;  %v4449_v41 = vor.u32 %v4647_v20, %v4448_v55  ;;  %v2169_v29 = vsel %vm2101_vm2, %v4489_v21, %v5240_v42  ;;  %v1565_v36 = vrot.slane %v1522_v2, 5  ;;  %v1760_v42 = vpack.c.b16 %v4377_v51, %v4377_v51 }
 0x184   : > { %1597 = vrot.lane.b32.xlu0 %v5516_v32, %s4806_s14  ;;  %4643 = vmatpush.bf16.msra.mxu3 %v4743_v31  ;;  %v2875_v3 = vrot.slane %v2873_v11, 3  ;;  %v2871_v62 = vor.u32 %v2870_v40, %v2867_v63  ;;  %v2878_v39 = vrot.slane %v2876_v19, 4  ;;  %v1950_v21 = vshrl.u32 %v5637_v28, 16 }
 0x185   : > { %v1978_v6 = vpop.permute.xlu1 %1977  ;;  %v5631_v35 = vpop.permute.xlu2 %1779  ;;  %v2119_v55 = vsel %vm2101_vm2, %v4449_v41, %v5199_v59  ;;  %v1566_v2 = vsel %vm1028_vm1, %v5365_v47, %v1565_v36 }
 0x186   : > { %v2463_v32 = vsel %vm2247_vm5, %v2401_v46, %v1978_v6  ;;  %v1776_v12 = vpop.permute.xlu0 %1775  ;;  %v2879_v34 = vor.u32 %v2878_v39, %v2875_v3  ;;  %v2236_v46 = vsel %vm2182_vm3, %v2169_v29, %v5554_v24  ;;  %v1952_v59 = vrot.slane %v1950_v21, 4 }
 0x187   : > { %v2614_v53 = vshrl.u32 %v2463_v32, 16  ;;  %v2617_v18 = vshll.u32 %v2463_v32, 16  ;;  %v2403_v43 = vsel %vm2182_vm3, %v2326_v7, %v1776_v12  ;;  %v4617_v12 = vor.u32 %v4689_v48, %v4616_v52 }
 0x188   : > { %v2464_v0 = vsel %vm2247_vm5, %v2403_v43, %v1978_v6  ;;  %v2880_v31 = vsel %vm2504_vm4, %v2871_v62, %v2879_v34  ;;  %v647_v6 = vld [vmem:[#allocation2 + $0x100] sm:$0x1]  ;;  %v5666_v62 = vld [vmem:[#allocation2 + $0xf8] sm:$0xff]  }
 0x189   : > { %v2616_v54 = vrot.slane %v2614_v53, 3  ;;  %v2619_v22 = vrot.slane %v2617_v18, 4  ;;  %v2621_v33 = vshrl.u32 %v2464_v0, 16  ;;  %v2624_v38 = vshll.u32 %v2464_v0, 16 }
 0x18a   : > { %v1953_v53 = vshll.u32 %v5637_v28, 16  ;;  %v578_v28 = vld [vmem:[#allocation2 + $0xd0] sm:$0x1]  ;;  %v5671_v52 = vrot.slane %v5666_v62, 5 }
 0x18b   : > { %v2623_v23 = vrot.slane %v2621_v33, 3  ;;  %v2626_v7 = vrot.slane %v2624_v38, 4  ;;  %1985 = vrot.lane.b32.xlu1 %v1900_v17, %s4808_s22  ;;  %1625 = vrot.lane.b32.xlu2 %v5365_v47, %s4806_s14  ;;  %v2620_v5 = vor.u32 %v2619_v22, %v2616_v54  ;;  %v2029_v17 = vunpack.c.l.b16 %v647_v6  ;;  %v4528_v38 = vld [vmem:[#allocation2 + $0xc4] sm:$0x8]  ;;  %v4667_v47 = vld [vmem:[#allocation2 + $0xc4] sm:$0xf0]  }
 0x18c   : > { %1791 = vrot.lane.b32.xlu0 %v5633_v10, %s4807_s16  ;;  %v2196_v33 = vsel %vm2182_vm3, %v2119_v55, %v5304_v13  ;;  %v1955_v34 = vrot.slane %v1953_v53, 5  ;;  %v2912_v29 = vshrl.u32 %v5671_v52, 16 }
 0x18d   : > { %v1322_v11 = vpop.permute.xlu1 %1321  ;;  %v5651_v19 = vpop.permute.xlu2 %1135  ;;  %v2627_v32 = vor.u32 %v2626_v7, %v2623_v23  ;;  %4160 = vmatmul.msk.bf16.gmra.mxu2 %vm2101_vm2, %v2880_v31  ;;  %v2045_v39 = vpack.c.b16 %v2029_v17, %v2029_v17  ;;  %v1500_v23 = vunpack.c.l.b16 %v578_v28  ;;  %v4744_v7 = vld [vmem:[#allocation2 + $0x68] sm:$0xff]  }
 0x18e   : > { %v2301_v63 = vsel %vm2247_vm5, %v2236_v46, %v1322_v11  ;;  %v1132_v40 = vpop.permute.xlu0 %1131  ;;  %v1377_v36 = vshll.u32 %v4744_v7, 16  ;;  %v2915_v11 = vshll.u32 %v5671_v52, 16 }
 0x18f   : > { %v3116_v18 = vshrl.u32 %v2301_v63, 16  ;;  %v3119_v43 = vshll.u32 %v2301_v63, 16  ;;  %v2238_v24 = vsel %vm2182_vm3, %v5244_v44, %v1132_v40  ;;  %v2628_v3 = vsel %vm2504_vm4, %v2620_v5, %v2627_v32 }
 0x190   : > { %v2303_v0 = vsel %vm2247_vm5, %v2238_v24, %v5588_v14  ;;  %3555 = vmatmul.bf16.gmra.mxu1 %v2628_v3  ;;  %v2078_v14 = vrot.slane %v2045_v39, 5  ;;  %v1374_v5 = vshrl.u32 %v4744_v7, 16  ;;  %v4529_v63 = vor.u32 %v4667_v47, %v4528_v38  ;;  %v4683_v47 = vld [vmem:[#allocation2 + $0xdc] sm:$0xf0]   ;;  %v651_v7 = vld [vmem:[#allocation2 + $0x118] sm:$0x1] }
 0x191   : > { %v3118_v20 = vrot.slane %v3116_v18, 3  ;;  %v3121_v54 = vrot.slane %v3119_v43, 4  ;;  %v3123_v22 = vshrl.u32 %v2303_v0, 16  ;;  %v3126_v44 = vshll.u32 %v2303_v0, 16 }
 0x192   : > { %v2079_v41 = vsel %vm1028_vm1, %v5671_v52, %v2078_v14  ;;  %v2914_v40 = vrot.slane %v2912_v29, 3  ;;  %v1956_v18 = vor.u32 %v1955_v34, %v1952_v59  ;;  %v1516_v43 = vpack.c.b16 %v1500_v23, %v1500_v23  ;;  %v4648_v29 = vld [vmem:[#allocation2 + $0x64] sm:$0xf0]  }
 0x193   : > { %v3125_v48 = vrot.slane %v3123_v22, 3  ;;  %v3128_v51 = vrot.slane %v3126_v44, 4  ;;  %1817 = vrot.lane.b32.xlu1 %v4617_v12, %s4807_s16  ;;  %1819 = vrot.lane.b32.xlu2 %v1760_v42, %s4807_s16  ;;  %v3122_v13 = vor.u32 %v3121_v54, %v3118_v20  ;;  %v2920_v32 = vshrl.u32 %v2079_v41, 16 }
 0x194   : > { %1627 = vrot.lane.b32.xlu0 %v1566_v2, %s4806_s14  ;;  %v2923_v42 = vshll.u32 %v2079_v41, 16  ;;  %v2917_v55 = vrot.slane %v2915_v11, 4  ;;  %v1376_v22 = vrot.slane %v1374_v5, 4  ;;  %v1379_v44 = vrot.slane %v1377_v36, 5  ;;  %v4452_v36 = vld [vmem:[#allocation2 + $0x64] sm:$0x8] }
 0x195   : > { %v1284_v31 = vpop.permute.xlu1 %1283  ;;  %v5679_v6 = vpop.permute.xlu2 %1285  ;;  %v3129_v46 = vor.u32 %v3128_v51, %v3125_v48  ;;  %v2922_v0 = vrot.slane %v2920_v32, 3  ;;  %v1547_v38 = vrot.slane %v1516_v43, 5  ;;  %v1902_v59 = vshrl.u32 %v5610_v9, 16  ;;  %v5697_v32 = vld [vmem:[#allocation2 + $0x7c] sm:$0x8] }
 0x196   : > { %v2263_v12 = vsel %vm2247_vm5, %v5247_v45, %v1284_v31  ;;  %v1282_v17 = vpop.permute.xlu0 %1281  ;;  %v2918_v45 = vor.u32 %v2917_v55, %v2914_v40  ;;  %v2925_v54 = vrot.slane %v2923_v42, 4  ;;  %v5691_v23 = vpop.f32.mrf.mxu2  ;;  %v1905_v41 = vshll.u32 %v5610_v9, 16  ;;  %v606_v40 = vld [vmem:[#allocation2 + $0x178] sm:$0x1] }
 0x197   : > { %v2653_v21 = vshrl.u32 %v2263_v12, 16  ;;  %v2656_v53 = vshll.u32 %v2263_v12, 16  ;;  %v2261_v24 = vsel %vm2247_vm5, %v2196_v33, %v1282_v17  ;;  %v3130_v3 = vsel %vm2504_vm4, %v3122_v13, %v3129_v46  ;;  %v4592_v33 = vld [vmem:[#allocation2 + $0xdc] sm:$0x8]  ;;  %v5699_v12 = vld [vmem:[#allocation2 + $0x7c] sm:$0xf0]  }
 0x198   : > { %3521 = vmatmul.bf16.gmra.mxu3 %v3130_v3  ;;  %v2646_v39 = vshrl.u32 %v2261_v24, 16  ;;  %v2649_v20 = vshll.u32 %v2261_v24, 16  ;;  %v2926_v34 = vor.u32 %v2925_v54, %v2922_v0  ;;  %v1380_v17 = vor.u32 %v1379_v44, %v1376_v22  ;;  %v5705_v24 = vld [vmem:[#allocation2 + $0x110] sm:$0xff]   ;;  %v4658_v3 = vld [vmem:[#allocation2 + $0x154] sm:$0xf0]  }
 0x199   : > { %v2655_v2 = vrot.slane %v2653_v21, 3  ;;  %v2658_v28 = vrot.slane %v2656_v53, 4  ;;  %v4492_v21 = vld [vmem:[#allocation2 + $0x154] sm:$0x8]  ;;  %v1904_v43 = vrot.slane %v1902_v59, 4  ;;  %v1907_v55 = vrot.slane %v1905_v41, 5 }
 0x19a   : > { %v2648_v14 = vrot.slane %v2646_v39, 3  ;;  %v2651_v48 = vrot.slane %v2649_v20, 4  ;;  %v2927_v11 = vsel %vm2504_vm4, %v2918_v45, %v2926_v34  ;;  %v4353_v0 = vunpack.c.h.b16 %v5610_v9 }
 0x19b   : > { %1297 = vrot.lane.b32.xlu1 %v4529_v63, %s4808_s22  ;;  %1299 = vrot.lane.b32.xlu2 %v5633_v10, %s4808_s22  ;;  %v2659_v51 = vor.u32 %v2658_v28, %v2655_v2  ;;  %v2030_v10 = vunpack.c.l.b16 %v651_v7  ;;  %v4593_v63 = vor.u32 %v4683_v47, %v4592_v33  ;;  %v5709_v2 = vrot.slane %v5705_v24, 5 }
 0x19c   : > { %1999 = vrot.lane.b32.xlu0 %v1956_v18, %s4808_s22  ;;  %v2652_v46 = vor.u32 %v2651_v48, %v2648_v14  ;;  %v1548_v18 = vsel %vm1028_vm1, %v5580_v26, %v1547_v38  ;;  %v4453_v39 = vor.u32 %v4648_v29, %v4452_v36  ;;  %v4457_v20 = vor.u32 %v5699_v12, %v5697_v32  ;;  %v5726_v14 = vld [vmem:[#allocation2 + $0x80] sm:$0xff]   ;;  %v4748_v32 = vld [vmem:[#allocation2 + $0x158] sm:$0xff]  }
 0x19d   : > { %v1778_v5 = vpop.permute.xlu1 %1777  ;;  %v5693_v13 = vpop.permute.xlu2 %1591  ;;  %4161 = vmatmul.msk.bf16.gmra.mxu2 %vm2101_vm2, %v2927_v11  ;;  %v2046_v42 = vpack.c.b16 %v2030_v10, %v2030_v10  ;;  %v1507_v45 = vunpack.c.l.b16 %v606_v40  ;;  %v2329_v54 = vsel %vm2101_vm2, %v1380_v17, %v5598_v1  ;;  %v4493_v44 = vor.u32 %v4658_v3, %v4492_v21 }
 0x19e   : > { %v1588_v31 = vpop.permute.xlu0 %1587  ;;  %v2660_v53 = vsel %vm2504_vm4, %v2652_v46, %v2659_v51  ;;  %v5722_v38 = vpop.f32.mrf.mxu2  ;;  %v2959_v33 = vshrl.u32 %v5709_v2, 16  ;;  %v2962_v59 = vshll.u32 %v5709_v2, 16  ;;  %v1382_v48 = vshrl.u32 %v5726_v14, 16 }
 0x19f   : > { %3471 = vmatmul.bf16.gmra.mxu0 %v2660_v53  ;;  %v2081_v28 = vrot.slane %v2046_v42, 5  ;;  %v2331_v22 = vsel %vm2101_vm2, %v1380_v17, %v1588_v31  ;;  %v1908_v34 = vor.u32 %v1907_v55, %v1904_v43  ;;  %v5731_v7 = vpack.c.b16 %v4353_v0, %v4353_v0 }
 0x1a0   : > { %v2407_v10 = vsel %vm2182_vm3, %v2331_v22, %v5631_v35  ;;  %v1523_v36 = vpack.c.b16 %v1507_v45, %v1507_v45  ;;  %v2961_v31 = vrot.slane %v2959_v33, 3  ;;  %v2964_v17 = vrot.slane %v2962_v59, 4  ;;  %v4620_v35 = vld [vmem:[#allocation2 + $0x184] sm:$0x8] }
 0x1a1   : > { %v2082_v9 = vsel %vm1028_vm1, %v5709_v2, %v2081_v28  ;;  %v1385_v33 = vshll.u32 %v5726_v14, 16  ;;  %v5869_v12 = vrot.slane %v4748_v32, 5 }
 0x1a2   : > { %v2967_v1 = vshrl.u32 %v2082_v9, 16  ;;  %v2970_v41 = vshll.u32 %v2082_v9, 16  ;;  %v2965_v43 = vor.u32 %v2964_v17, %v2961_v31  ;;  %v5744_v9 = vrot.slane %v1382_v48, 4 }
 0x1a3   : > { %1603 = vrot.lane.b32.xlu1 %v1548_v18, %s4806_s14  ;;  %1793 = vrot.lane.b32.xlu2 %v4593_v63, %s4807_s16  ;;  %v2124_v18 = vsel %vm2101_vm2, %v4453_v39, %v5155_v15  ;;  %v2242_v39 = vsel %vm2182_vm3, %v5204_v61, %v5651_v19 }
 0x1a4   : > { %1601 = vrot.lane.b32.xlu0 %v5580_v26, %s4806_s14  ;;  %v2405_v26 = vsel %vm2182_vm3, %v2329_v54, %v1778_v5  ;;  %v2969_v63 = vrot.slane %v2967_v1, 3  ;;  %v2174_v5 = vsel %vm2101_vm2, %v4493_v44, %v5197_v60  ;;  %v2972_v3 = vrot.slane %v2970_v41, 4  ;;  %v4690_v54 = vld [vmem:[#allocation2 + $0x184] sm:$0xf0]   ;;  %v655_v1 = vld [vmem:[#allocation2 + $0x130] sm:$0x1] }
 0x1a5   : > { %v1134_v51 = vpop.permute.xlu1 %1133  ;;  %v5729_v47 = vpop.permute.xlu2 %1981  ;;  %v2200_v22 = vsel %vm2182_vm3, %v2124_v18, %v5328_v16  ;;  %v1568_v16 = vrot.slane %v1523_v36, 5  ;;  %v4621_v41 = vor.u32 %v4690_v54, %v4620_v35  ;;  %v1958_v36 = vshrl.u32 %v5470_v37, 16  ;;  %v4659_v35 = vld [vmem:[#allocation2 + $0x16c] sm:$0xf0]  }
 0x1a6   : > { %v1980_v29 = vpop.permute.xlu0 %1979  ;;  %v2973_v60 = vor.u32 %v2972_v3, %v2969_v63  ;;  %v2265_v14 = vsel %vm2247_vm5, %v2200_v22, %v5679_v6  ;;  %v2240_v61 = vsel %vm2182_vm3, %v2174_v5, %v1134_v51  ;;  %v5771_v5 = vld [vmem:[#allocation2 + $0x128] sm:$0xff]  }
 0x1a7   : > { %v2466_v46 = vsel %vm2247_vm5, %v2405_v26, %v1980_v29  ;;  %v2467_v11 = vsel %vm2247_vm5, %v2407_v10, %v1980_v29  ;;  %v582_v26 = vld [vmem:[#allocation2 + $0xe8] sm:$0x1]  ;;  %v2031_v29 = vunpack.c.l.b16 %v655_v1  ;;  %v2696_v22 = vshll.u32 %v2265_v14, 16  ;;  %v4532_v1 = vld [vmem:[#allocation2 + $0xdc] sm:$0x8] }
 0x1a8   : > { %v2661_v40 = vshrl.u32 %v2466_v46, 16  ;;  %v2664_v42 = vshll.u32 %v2466_v46, 16  ;;  %v2668_v21 = vshrl.u32 %v2467_v11, 16  ;;  %v2671_v53 = vshll.u32 %v2467_v11, 16 }
 0x1a9   : > { %v2974_v10 = vsel %vm2504_vm4, %v2965_v43, %v2973_v60  ;;  %v5764_v11 = vpop.f32.mrf.mxu2  ;;  %v1501_v18 = vunpack.c.l.b16 %v582_v26  ;;  %v1960_v60 = vrot.slane %v1958_v36, 4 }
 0x1aa   : > { %v2663_v55 = vrot.slane %v2661_v40, 3  ;;  %v2666_v0 = vrot.slane %v2664_v42, 4  ;;  %v2670_v28 = vrot.slane %v2668_v21, 3  ;;  %v2673_v45 = vrot.slane %v2671_v53, 4  ;;  %v4496_v42 = vld [vmem:[#allocation2 + $0x16c] sm:$0x8] }
 0x1ab   : > { %1987 = vrot.lane.b32.xlu1 %v1908_v34, %s4808_s22  ;;  %1629 = vrot.lane.b32.xlu2 %v5459_v25, %s4806_s14  ;;  %v1961_v40 = vshll.u32 %v5470_v37, 16  ;;  %v1569_v53 = vsel %vm1028_vm1, %v5459_v25, %v1568_v16  ;;  %v1387_v37 = vrot.slane %v1385_v33, 5  ;;  %v4497_v33 = vor.u32 %v4659_v35, %v4496_v42 }
 0x1ac   : > { %1795 = vrot.lane.b32.xlu0 %v5731_v7, %s4807_s16  ;;  %v2667_v44 = vor.u32 %v2666_v0, %v2663_v55  ;;  %v2674_v59 = vor.u32 %v2673_v45, %v2670_v28  ;;  %v2047_v55 = vpack.c.b16 %v2031_v29, %v2031_v29  ;;  %v5774_v0 = vrot.slane %v5771_v5, 5 }
 0x1ad   : > { %v1328_v48 = vpop.permute.xlu1 %1327  ;;  %v5757_v34 = vpop.permute.xlu2 %1329  ;;  %4162 = vmatmul.msk.bf16.gmra.mxu2 %vm2101_vm2, %v2974_v10  ;;  %v2693_v28 = vshrl.u32 %v2265_v14, 16  ;;  %v4668_v14 = vld [vmem:[#allocation2 + $0xdc] sm:$0xf0]  }
 0x1ae   : > { %v2307_v19 = vsel %vm2247_vm5, %v2242_v39, %v1328_v48  ;;  %v1326_v31 = vpop.permute.xlu0 %1325  ;;  %v2675_v46 = vsel %vm2504_vm4, %v2667_v44, %v2674_v59  ;;  %v1963_v39 = vrot.slane %v1961_v40, 5  ;;  %v2126_v44 = vsel %vm2101_vm2, %v5290_v50, %v5155_v15 }
 0x1af   : > { %v3170_v6 = vshrl.u32 %v2307_v19, 16  ;;  %v3173_v17 = vshll.u32 %v2307_v19, 16  ;;  %v2305_v63 = vsel %vm2247_vm5, %v2240_v61, %v1326_v31  ;;  %3560 = vmatmul.bf16.gmra.mxu1 %v2675_v46  ;;  %v2131_v59 = vsel %vm2101_vm2, %v5352_v8, %v5163_v27 }
 0x1b0   : > { %v3163_v51 = vshrl.u32 %v2305_v63, 16  ;;  %v3166_v21 = vshll.u32 %v2305_v63, 16  ;;  %v2084_v26 = vrot.slane %v2047_v55, 5  ;;  %v3006_v10 = vshrl.u32 %v5774_v0, 16 }
 0x1b1   : > { %v3172_v43 = vrot.slane %v3170_v6, 3  ;;  %v3175_v3 = vrot.slane %v3173_v17, 4  ;;  %v3009_v29 = vshll.u32 %v5774_v0, 16  ;;  %v2202_v15 = vsel %vm2182_vm3, %v2126_v44, %v5324_v57  ;;  %v5794_v31 = vpop.f32.mrf.mxu2 }
 0x1b2   : > { %v3165_v45 = vrot.slane %v3163_v51, 3  ;;  %v3168_v54 = vrot.slane %v3166_v21, 4  ;;  %v2695_v50 = vrot.slane %v2693_v28, 3  ;;  %v1388_v8 = vor.u32 %v1387_v37, %v5744_v9 }
 0x1b3   : > { %1821 = vrot.lane.b32.xlu1 %v4621_v41, %s4807_s16  ;;  %1823 = vrot.lane.b32.xlu2 %v5496_v56, %s4807_s16  ;;  %v3176_v25 = vor.u32 %v3175_v3, %v3172_v43  ;;  %v1517_v56 = vpack.c.b16 %v1501_v18, %v1501_v18  ;;  %v2698_v46 = vrot.slane %v2696_v22, 4  ;;  %v4533_v6 = vor.u32 %v4668_v14, %v4532_v1  ;;  %v4684_v3 = vld [vmem:[#allocation2 + $0xf4] sm:$0xf0]  }
 0x1b4   : > { %1631 = vrot.lane.b32.xlu0 %v1569_v53, %s4806_s14  ;;  %v3169_v16 = vor.u32 %v3168_v54, %v3165_v45  ;;  %v1964_v17 = vor.u32 %v1963_v39, %v1960_v60  ;;  %v2085_v42 = vsel %vm1028_vm1, %v5774_v0, %v2084_v26  ;;  %v3008_v57 = vrot.slane %v3006_v10, 3  ;;  %v4596_v53 = vld [vmem:[#allocation2 + $0xf4] sm:$0x8]  ;;  %v610_v54 = vld [vmem:[#allocation2 + $0x190] sm:$0x1] }
 0x1b5   : > { %v1590_v48 = vpop.permute.xlu1 %1589  ;;  %v5786_v41 = vpop.permute.xlu2 %1291  ;;  %v5801_v9 = vsel %vm2101_vm2, %v4497_v33, %v5261_v4  ;;  %v5805_v51 = vsel %vm2182_vm3, %v2131_v59, %v5348_v30  ;;  %v1550_v21 = vrot.slane %v1517_v56, 5  ;;  %v3011_v18 = vrot.slane %v3009_v29, 4  ;;  %v659_v39 = vld [vmem:[#allocation2 + $0x148] sm:$0x1] }
 0x1b6   : > { %v1288_v61 = vpop.permute.xlu0 %1287  ;;  %v3177_v19 = vsel %vm2504_vm4, %v3169_v16, %v3176_v25  ;;  %v3014_v55 = vshrl.u32 %v2085_v42, 16  ;;  %v3017_v28 = vshll.u32 %v2085_v42, 16  ;;  %v2336_v37 = vsel %vm2101_vm2, %v1388_v8, %v5693_v13 }
 0x1b7   : > { %v2267_v36 = vsel %vm2247_vm5, %v2202_v15, %v1288_v61  ;;  %3526 = vmatmul.bf16.gmra.mxu3 %v3177_v19  ;;  %v2334_v45 = vsel %vm2101_vm2, %v1388_v8, %v1590_v48  ;;  %v2699_v4 = vor.u32 %v2698_v46, %v2695_v50  ;;  %v3012_v22 = vor.u32 %v3011_v18, %v3008_v57 }
 0x1b8   : > { %v2700_v63 = vshrl.u32 %v2267_v36, 16  ;;  %v2703_v40 = vshll.u32 %v2267_v36, 16  ;;  %v3016_v25 = vrot.slane %v3014_v55, 3  ;;  %v3019_v60 = vrot.slane %v3017_v28, 4 }
 0x1b9   : > { %v4597_v13 = vor.u32 %v4684_v3, %v4596_v53  ;;  %v1910_v33 = vshrl.u32 %v5666_v62, 16  ;;  %v1913_v16 = vshll.u32 %v5666_v62, 16  ;;  %v2032_v1 = vunpack.c.l.b16 %v659_v39  ;;  %v5837_v3 = vld [vmem:[#allocation2 + $0x1a0] sm:$0xff]  }
 0x1ba   : > { %v2702_v35 = vrot.slane %v2700_v63, 3  ;;  %v2705_v43 = vrot.slane %v2703_v40, 4  ;;  %v1551_v56 = vsel %vm1028_vm1, %v5615_v49, %v1550_v21  ;;  %v3020_v26 = vor.u32 %v3019_v60, %v3016_v25 }
 0x1bb   : > { %1301 = vrot.lane.b32.xlu1 %v4533_v6, %s4808_s22  ;;  %1303 = vrot.lane.b32.xlu2 %v5731_v7, %s4808_s22  ;;  %v1508_v15 = vunpack.c.l.b16 %v610_v54  ;;  %v2048_v8 = vpack.c.b16 %v2032_v1, %v2032_v1  ;;  %v5830_v6 = vld [vmem:[#allocation2 + $0x140] sm:$0xff]   ;;  %v1912_v40 = vrot.slane %v1910_v33, 4  ;;  %v1915_v42 = vrot.slane %v1913_v16, 5 }
 0x1bc   : > { %2001 = vrot.lane.b32.xlu0 %v1964_v17, %s4808_s22  ;;  %v2706_v30 = vor.u32 %v2705_v43, %v2702_v35  ;;  %v5825_v50 = vpop.f32.mrf.mxu2  ;;  %v3021_v36 = vsel %vm2504_vm4, %v3012_v22, %v3020_v26  ;;  %v2086_v53 = vrot.slane %v5830_v6, 5  ;;  %v4624_v26 = vld [vmem:[#allocation2 + $0x19c] sm:$0x8] }
 0x1bd   : > { %v1784_v44 = vpop.permute.xlu1 %1783  ;;  %v5814_v59 = vpop.permute.xlu2 %1785  ;;  %4163 = vmatmul.msk.bf16.gmra.mxu2 %vm2101_vm2, %v3021_v36  ;;  %v2087_v18 = vrot.slane %v2048_v8, 5  ;;  %v1524_v55 = vpack.c.b16 %v1508_v15, %v1508_v15  ;;  %v1916_v60 = vor.u32 %v1915_v42, %v1912_v40  ;;  %v4747_v15 = vld [vmem:[#allocation2 + $0x98] sm:$0xff]   ;;  %v6664_v36 = vld [vmem:[#allocation9_spill] sm:$0xff] }
 0x1be   : > { %v2411_v7 = vsel %vm2182_vm3, %v2336_v37, %v1784_v44  ;;  %v1782_v14 = vpop.permute.xlu0 %1781  ;;  %v2707_v48 = vsel %vm2504_vm4, %v2699_v4, %v2706_v30  ;;  %v3056_v4 = vshll.u32 %v2086_v53, 16  ;;  %v5842_v30 = vld [vmem:[#allocation2 + $0x188] sm:$0xff]   ;;  %v1393_v40 = vshll.u32 %v4747_v15, 16 }
 0x1bf   : > { %v2470_v10 = vsel %vm2247_vm5, %v2411_v7, %v5729_v47  ;;  %v2409_v29 = vsel %vm2182_vm3, %v2334_v45, %v1782_v14  ;;  %3476 = vmatmul.bf16.gmra.mxu0 %v2707_v48  ;;  %v2088_v37 = vsel %vm1028_vm1, %v2086_v53, %v2087_v18  ;;  %v3053_v45 = vshrl.u32 %v2086_v53, 16  ;;  %v663_v18 = vld [vmem:[#allocation2 + $0x160] sm:$0x1] }
 0x1c0   : > { %v2715_v61 = vshrl.u32 %v2470_v10, 16  ;;  %v2718_v19 = vshll.u32 %v2470_v10, 16  ;;  %v2469_v46 = vsel %vm2247_vm5, %v2409_v29, %v5729_v47  ;;  %v4357_v47 = vunpack.c.h.b16 %v5666_v62  ;;  %v4691_v10 = vld [vmem:[#allocation2 + $0x19c] sm:$0xf0]  }
 0x1c1   : > { %v2708_v17 = vshrl.u32 %v2469_v46, 16  ;;  %v2711_v63 = vshll.u32 %v2469_v46, 16  ;;  %v5845_v54 = vrot.slane %v5842_v30, 5  ;;  %v3061_v39 = vshrl.u32 %v2088_v37, 16 }
 0x1c2   : > { %v2717_v57 = vrot.slane %v2715_v61, 3  ;;  %v2720_v21 = vrot.slane %v2718_v19, 4  ;;  %v3055_v33 = vrot.slane %v3053_v45, 3  ;;  %v3058_v16 = vrot.slane %v3056_v4, 4  ;;  %v6665_v45 = vld [vmem:[#allocation10_spill] sm:$0xff] }
 0x1c3   : > { %v2710_v35 = vrot.slane %v2708_v17, 3  ;;  %v2713_v43 = vrot.slane %v2711_v63, 4  ;;  %1607 = vrot.lane.b32.xlu1 %v1551_v56, %s4806_s14  ;;  %1797 = vrot.lane.b32.xlu2 %v4597_v13, %s4807_s16  ;;  %v4385_v13 = vunpack.c.h.b16 %v5837_v3  ;;  %v3063_v48 = vrot.slane %v3061_v39, 3 }
 0x1c4   : > { %1605 = vrot.lane.b32.xlu0 %v5615_v49, %s4806_s14  ;;  %v2721_v28 = vor.u32 %v2720_v21, %v2717_v57  ;;  %v2271_v49 = vsel %vm2247_vm5, %v5805_v51, %v5786_v41  ;;  %v5856_v14 = vpop.f32.mrf.mxu2  ;;  %v3064_v56 = vshll.u32 %v2088_v37, 16  ;;  %v2129_v41 = vsel %vm2101_vm2, %v4457_v20, %v5163_v27 }
 0x1c5   : > { %v1140_v22 = vpop.permute.xlu1 %1139  ;;  %v5847_v25 = vpop.permute.xlu2 %1621  ;;  %v2714_v62 = vor.u32 %v2713_v43, %v2710_v35  ;;  %v5863_v51 = vpack.c.b16 %v4357_v47, %v4357_v47  ;;  %v1571_v29 = vrot.slane %v1524_v55, 5  ;;  %v2747_v8 = vshrl.u32 %v2271_v49, 16 }
 0x1c6   : > { %v1138_v44 = vpop.permute.xlu0 %1137  ;;  %v2750_v61 = vshll.u32 %v2271_v49, 16  ;;  %v3066_v46 = vrot.slane %v3064_v56, 4  ;;  %v2204_v17 = vsel %vm2182_vm3, %v2129_v41, %v6664_v36  ;;  %v3059_v27 = vor.u32 %v3058_v16, %v3055_v33 }
 0x1c7   : > { %v2244_v1 = vsel %vm2182_vm3, %v5801_v9, %v1138_v44  ;;  %v2722_v7 = vsel %vm2504_vm4, %v2714_v62, %v2721_v28  ;;  %v1390_v9 = vshrl.u32 %v4747_v15, 16  ;;  %v4625_v20 = vor.u32 %v4691_v10, %v4624_v26  ;;  %v586_v26 = vld [vmem:[#allocation2 + $0x100] sm:$0x1] }
 0x1c8   : > { %3565 = vmatmul.bf16.gmra.mxu1 %v2722_v7  ;;  %v2309_v19 = vsel %vm2247_vm5, %v2244_v1, %v5757_v34  ;;  %v1764_v63 = vpack.c.b16 %v4385_v13, %v4385_v13  ;;  %v3067_v42 = vor.u32 %v3066_v46, %v3063_v48  ;;  %v1572_v34 = vsel %vm1028_vm1, %v5845_v54, %v1571_v29 }
 0x1c9   : > { %v3210_v57 = vshrl.u32 %v2309_v19, 16  ;;  %v3213_v21 = vshll.u32 %v2309_v19, 16  ;;  %v1392_v53 = vrot.slane %v1390_v9, 4  ;;  %v2749_v35 = vrot.slane %v2747_v8, 3 }
 0x1ca   : > { %v2752_v43 = vrot.slane %v2750_v61, 4  ;;  %v1966_v28 = vshrl.u32 %v5837_v3, 16  ;;  %v2033_v37 = vunpack.c.l.b16 %v663_v18  ;;  %v2246_v4 = vsel %vm2182_vm3, %v6665_v45, %v1140_v22 }
 0x1cb   : > { %1989 = vrot.lane.b32.xlu1 %v1916_v60, %s4808_s22  ;;  %1633 = vrot.lane.b32.xlu2 %v5845_v54, %s4806_s14  ;;  %v1969_v39 = vshll.u32 %v5837_v3, 16  ;;  %v3068_v49 = vsel %vm2504_vm4, %v3059_v27, %v3067_v42  ;;  %v3212_v7 = vrot.slane %v3210_v57, 3  ;;  %v3215_v48 = vrot.slane %v3213_v21, 4  ;;  %v3457_v32 = vpop.f32.mrf.mxu0  ;;  %v4536_v42 = vld [vmem:[#allocation2 + $0xf4] sm:$0x8] }
 0x1cc   : > { %1799 = vrot.lane.b32.xlu0 %v5863_v51, %s4807_s16  ;;  %v5887_v16 = vpop.f32.mrf.mxu2  ;;  %v2049_v1 = vpack.c.b16 %v2033_v37, %v2033_v37  ;;  %v1395_v29 = vrot.slane %v1393_v40, 5  ;;  %v2753_v8 = vor.u32 %v2752_v43, %v2749_v35  ;;  %v1968_v61 = vrot.slane %v1966_v28, 4  ;;  %v4669_v57 = vld [vmem:[#allocation2 + $0xf4] sm:$0xf0]  }
 0x1cd   : > { %v1290_v47 = vpop.permute.xlu1 %1289  ;;  %v5878_v55 = vpop.permute.xlu2 %1815  ;;  %4164 = vmatmul.msk.bf16.gmra.mxu2 %vm2101_vm2, %v3068_v49  ;;  %v1971_v46 = vrot.slane %v1969_v39, 5  ;;  %v1502_v36 = vunpack.c.l.b16 %v586_v26  ;;  %v3216_v27 = vor.u32 %v3215_v48, %v3212_v7  ;;  %v3100_v21 = vshrl.u32 %v5869_v12, 16  ;;  %v4749_v48 = vld [vmem:[#allocation2 + $0x98] sm:$0xff]  }
 0x1ce   : > { %v2269_v62 = vsel %vm2247_vm5, %v2204_v17, %v1290_v47  ;;  %v1332_v60 = vpop.permute.xlu0 %1331  ;;  %v2090_v3 = vrot.slane %v2049_v1, 5  ;;  %v1396_v47 = vor.u32 %v1395_v29, %v1392_v53  ;;  %v4537_v45 = vor.u32 %v4669_v57, %v4536_v42  ;;  %v4685_v53 = vld [vmem:[#allocation2 + $0x10c] sm:$0xf0]   ;;  %v4750_v29 = vld [vmem:[#allocation2 + $0x140] sm:$0xff]  }
 0x1cf   : > { %v2740_v44 = vshrl.u32 %v2269_v62, 16  ;;  %v2743_v13 = vshll.u32 %v2269_v62, 16  ;;  %v2311_v33 = vsel %vm2247_vm5, %v2246_v4, %v1332_v60  ;;  %v3102_v37 = vrot.slane %v3100_v21, 3  ;;  %v5904_v60 = vld [vmem:[%s4876_s30] ss:$0 sm:$0xff] }
 0x1d0   : > { %v3217_v56 = vshrl.u32 %v2311_v33, 16  ;;  %v3220_v41 = vshll.u32 %v2311_v33, 16  ;;  %v2091_v17 = vsel %vm1028_vm1, %v5869_v12, %v2090_v3  ;;  %v1972_v4 = vor.u32 %v1971_v46, %v1968_v61  ;;  %v4600_v33 = vld [vmem:[#allocation2 + $0x10c] sm:$0x8] }
 0x1d1   : > { %v2742_v22 = vrot.slane %v2740_v44, 3  ;;  %v2745_v10 = vrot.slane %v2743_v13, 4  ;;  %v3108_v43 = vshrl.u32 %v2091_v17, 16  ;;  %v3111_v44 = vshll.u32 %v2091_v17, 16 }
 0x1d2   : > { %v3219_v15 = vrot.slane %v3217_v56, 3  ;;  %v3222_v9 = vrot.slane %v3220_v41, 4  ;;  %v4221_v56 = vunpack.c.h.b16 %v4749_v48  ;;  %v3458_v41 = vadd.f32 %v5904_v60, %v3457_v32 }
 0x1d3   : > { %1825 = vrot.lane.b32.xlu1 %v4625_v20, %s4807_s16  ;;  %1827 = vrot.lane.b32.xlu2 %v1764_v63, %s4807_s16  ;;  %v2746_v19 = vor.u32 %v2745_v10, %v2742_v22  ;;  %v3103_v20 = vshll.u32 %v5869_v12, 16  ;;  %v1518_v12 = vpack.c.b16 %v1502_v36, %v1502_v36  ;;  %v3110_v49 = vrot.slane %v3108_v43, 3 }
 0x1d4   : > { %1635 = vrot.lane.b32.xlu0 %v1572_v34, %s4806_s14  ;;  %v3223_v40 = vor.u32 %v3222_v9, %v3219_v15  ;;  %v5901_v62 = vpop.f32.mrf.mxu2  ;;  %v3113_v7 = vrot.slane %v3111_v44, 4  ;;  %v1446_v3 = vshrl.u32 %v4750_v29, 16  ;;  %v1449_v15 = vshll.u32 %v4750_v29, 16  ;;  %v4650_v44 = vld [vmem:[#allocation2 + $0x94] sm:$0xf0]  }
 0x1d5   : > { %v1596_v18 = vpop.permute.xlu1 %1595  ;;  %v5897_v63 = vpop.permute.xlu2 %1295  ;;  %v2754_v35 = vsel %vm2504_vm4, %v2746_v19, %v2753_v8  ;;  %v3105_v39 = vrot.slane %v3103_v20, 4  ;;  %v1553_v22 = vrot.slane %v1518_v12, 5  ;;  %v4601_v19 = vor.u32 %v4685_v53, %v4600_v33 }
 0x1d6   : > { %v1594_v28 = vpop.permute.xlu0 %1593  ;;  %3481 = vmatmul.bf16.gmra.mxu0 %v2754_v35  ;;  %v3224_v34 = vsel %vm2504_vm4, %v3216_v27, %v3223_v40  ;;  %v2341_v26 = vsel %vm2101_vm2, %v1396_v47, %v1596_v18  ;;  %v3114_v10 = vor.u32 %v3113_v7, %v3110_v49  ;;  %v1918_v32 = vshrl.u32 %v5705_v24, 16  ;;  %v3459_v40 = vpop.f32.mrf.mxu0 }
 0x1d7   : > { %3531 = vmatmul.bf16.gmra.mxu3 %v3224_v34  ;;  %v2339_v13 = vsel %vm2101_vm2, %v1396_v47, %v1594_v28  ;;  %v3106_v1 = vor.u32 %v3105_v39, %v3102_v37  ;;  %v1921_v20 = vshll.u32 %v5705_v24, 16  ;;  %v1554_v47 = vsel %vm1028_vm1, %v5671_v52, %v1553_v22  ;;  %v6667_v22 = vld [vmem:[#allocation11_spill] sm:$0xff] }
 0x1d8   : > { %v2413_v61 = vsel %vm2182_vm3, %v2339_v13, %v5814_v59  ;;  %v785_v59 = vpack.c.b16 %v4221_v56, %v4221_v56  ;;  %v1448_v12 = vrot.slane %v1446_v3, 4  ;;  %v1451_v39 = vrot.slane %v1449_v15, 5  ;;  %v4540_v56 = vld [vmem:[#allocation2 + $0x10c] sm:$0x8] }
 0x1d9   : > { %v3115_v27 = vsel %vm2504_vm4, %v3106_v1, %v3114_v10  ;;  %v1920_v49 = vrot.slane %v1918_v32, 4  ;;  %v1923_v53 = vrot.slane %v1921_v20, 5  ;;  %v6666_v1 = vld [vmem:[#allocation6_spill] sm:$0xff]  ;;  %v3460_v48 = vadd.f32 %v5904_v60, %v3459_v40  ;;  %v590_v40 = vld [vmem:[#allocation2 + $0x118] sm:$0x1] }
 0x1da   : > { %v2136_v7 = vsel %vm2101_vm2, %v785_v59, %v6666_v1 }
 0x1db   : > { %1305 = vrot.lane.b32.xlu1 %v4537_v45, %s4808_s22  ;;  %1307 = vrot.lane.b32.xlu2 %v5863_v51, %s4808_s22  ;;  %v2210_v10 = vsel %vm2182_vm3, %v2136_v7, %v6667_v22  ;;  %v5946_v32 = vor.u32 %v1923_v53, %v1920_v49 }
 0x1dc   : > { %2003 = vrot.lane.b32.xlu0 %v1972_v4, %s4808_s22  ;;  %v5922_v18 = vpop.f32.mrf.mxu2  ;;  %v4460_v4 = vld [vmem:[#allocation2 + $0x94] sm:$0x8] }
 0x1dd   : > { %v3546_v9 = vpop.f32.mrf.mxu1  ;;  %v1984_v8 = vpop.permute.xlu1 %1983  ;;  %4165 = vmatmul.msk.bf16.gmra.mxu2 %vm2101_vm2, %v3115_v27 }
 0x1de   : > { %v3547_v46 = vadd.f32 %v3546_v9, %v3458_v41  ;;  %v2472_v51 = vsel %vm2247_vm5, %v2413_v61, %v1984_v8  ;;  %v5916_v36 = vpop.permute.xlu2 %1789  ;;  %v1788_v17 = vpop.permute.xlu0 %1787  ;;  %v4670_v41 = vld [vmem:[#allocation2 + $0x10c] sm:$0xf0]   ;;  %v4461_v9 = vor.u32 %v4650_v44, %v4460_v4 }
 0x1df   : > { %v2755_v42 = vshrl.u32 %v2472_v51, 16  ;;  %v2758_v57 = vshll.u32 %v2472_v51, 16  ;;  %v2415_v21 = vsel %vm2182_vm3, %v2341_v26, %v1788_v17  ;;  %v4361_v26 = vunpack.c.h.b16 %v5705_v24 }
 0x1e0   : > { %v5925_v35 = vadd.f32 %v5691_v23, %v3547_v46  ;;  %v2473_v43 = vsel %vm2247_vm5, %v2415_v21, %v1984_v8  ;;  %v2275_v8 = vsel %vm2247_vm5, %v2210_v10, %v5897_v63  ;;  %v1452_v51 = vor.u32 %v1451_v39, %v1448_v12  ;;  %v4751_v63 = vld [vmem:[#allocation2 + $0xb0] sm:$0xff]  }
 0x1e1   : > { %v2757_v28 = vrot.slane %v2755_v42, 3  ;;  %v2760_v34 = vrot.slane %v2758_v57, 4  ;;  %v2762_v37 = vshrl.u32 %v2473_v43, 16  ;;  %v2765_v45 = vshll.u32 %v2473_v43, 16 }
 0x1e2   : > { %v4541_v24 = vor.u32 %v4670_v41, %v4540_v56  ;;  %v1752_v57 = vpack.c.b16 %v4361_v26, %v4361_v26  ;;  %v1398_v21 = vshrl.u32 %v4751_v63, 16  ;;  %v2794_v20 = vshrl.u32 %v2275_v8, 16 }
 0x1e3   : > { %v2764_v13 = vrot.slane %v2762_v37, 3  ;;  %v2767_v33 = vrot.slane %v2765_v45, 4  ;;  %1611 = vrot.lane.b32.xlu1 %v1554_v47, %s4806_s14  ;;  %1801 = vrot.lane.b32.xlu2 %v4601_v19, %s4807_s16  ;;  %v2761_v23 = vor.u32 %v2760_v34, %v2757_v28  ;;  %v2797_v59 = vshll.u32 %v2275_v8, 16  ;;  %v6668_v45 = vld [vmem:[#allocation14_spill] sm:$0xff] }
 0x1e4   : > { %1609 = vrot.lane.b32.xlu0 %v5671_v52, %s4806_s14  ;;  %v3462_v52 = vpop.f32.mrf.mxu0  ;;  %v5948_v27 = vpop.f32.mrf.mxu2  ;;  %v1401_v43 = vshll.u32 %v4751_v63, 16  ;;  %v1503_v47 = vunpack.c.l.b16 %v590_v40  ;;  %v2134_v28 = vsel %vm2101_vm2, %v4461_v9, %v6666_v1  ;;  %v2374_v34 = vsel %vm2101_vm2, %v1452_v51, %v5847_v25 }
 0x1e5   : > { %v3548_v29 = vpop.f32.mrf.mxu1  ;;  %v1814_v3 = vpop.permute.xlu1 %1813  ;;  %v2768_v15 = vor.u32 %v2767_v33, %v2764_v13  ;;  %v2208_v4 = vsel %vm2182_vm3, %v2134_v28, %v6668_v45  ;;  %v3463_v12 = vadd.f32 %v5904_v60, %v3462_v52  ;;  %v1400_v39 = vrot.slane %v1398_v21, 4  ;;  %v4752_v28 = vld [vmem:[#allocation2 + $0x170] sm:$0xff]  }
 0x1e6   : > { %v3549_v61 = vadd.f32 %v3548_v29, %v3460_v48  ;;  %v5943_v19 = vpop.permute.xlu2 %1625  ;;  %v1624_v46 = vpop.permute.xlu0 %1623  ;;  %v2796_v49 = vrot.slane %v2794_v20, 3  ;;  %v2799_v44 = vrot.slane %v2797_v59, 4  ;;  %v1403_v33 = vrot.slane %v1401_v43, 5  ;;  %v667_v20 = vld [vmem:[#allocation2 + $0x178] sm:$0x1] }
 0x1e7   : > { %v2769_v17 = vsel %vm2504_vm4, %v2761_v23, %v2768_v15  ;;  %v2376_v37 = vsel %vm2101_vm2, %v1452_v51, %v1624_v46  ;;  %v2441_v53 = vsel %vm2182_vm3, %v2374_v34, %v1814_v3  ;;  %v4365_v21 = vunpack.c.h.b16 %v5771_v5 }
 0x1e8   : > { %v5951_v42 = vadd.f32 %v5722_v38, %v3549_v61  ;;  %3570 = vmatmul.bf16.gmra.mxu1 %v2769_v17  ;;  %v1519_v38 = vpack.c.b16 %v1503_v47, %v1503_v47  ;;  %v2443_v56 = vsel %vm2182_vm3, %v2376_v37, %v5878_v55  ;;  %v2800_v43 = vor.u32 %v2799_v44, %v2796_v49  ;;  %v4686_v49 = vld [vmem:[#allocation2 + $0x124] sm:$0xf0]  }
 0x1e9   : > { %v1926_v47 = vshrl.u32 %v5771_v5, 16  ;;  %v2092_v34 = vrot.slane %v4752_v28, 5  ;;  %v1929_v45 = vshll.u32 %v5771_v5, 16  ;;  %v4753_v5 = vld [vmem:[#allocation2 + $0xb0] sm:$0xff]  }
 0x1ea   : > { %v1556_v23 = vrot.slane %v1519_v38, 5 }
 0x1eb   : > { %1991 = vrot.lane.b32.xlu1 %v5946_v32, %s4808_s22  ;;  %1309 = vrot.lane.b32.xlu2 %v4541_v24, %s4808_s22  ;;  %v1928_v44 = vrot.slane %v1926_v47, 4 }
 0x1ec   : > { %1803 = vrot.lane.b32.xlu0 %v1752_v57, %s4807_s16  ;;  %v3464_v61 = vpop.f32.mrf.mxu0  ;;  %v1557_v55 = vsel %vm1028_vm1, %v5709_v2, %v1556_v23  ;;  %v2034_v23 = vunpack.c.l.b16 %v667_v20  ;;  %v4754_v20 = vld [vmem:[#allocation2 + $0x158] sm:$0xff]  }
 0x1ed   : > { %v3551_v13 = vpop.f32.mrf.mxu1  ;;  %v1294_v25 = vpop.permute.xlu1 %1293  ;;  %v3465_v37 = vadd.f32 %v5904_v60, %v3464_v61 }
 0x1ee   : > { %v3552_v1 = vadd.f32 %v3551_v13, %v3463_v12  ;;  %v2273_v7 = vsel %vm2247_vm5, %v2208_v4, %v1294_v25  ;;  %v5967_v48 = vpop.permute.xlu2 %1819  ;;  %v1998_v41 = vpop.permute.xlu0 %1997  ;;  %v4604_v25 = vld [vmem:[#allocation2 + $0x124] sm:$0x8] }
 0x1ef   : > { %v2787_v26 = vshrl.u32 %v2273_v7, 16  ;;  %v2790_v22 = vshll.u32 %v2273_v7, 16  ;;  %v2493_v10 = vsel %vm2247_vm5, %v2441_v53, %v1998_v41  ;;  %v2494_v29 = vsel %vm2247_vm5, %v2443_v56, %v1998_v41 }
 0x1f0   : > { %v5974_v15 = vadd.f32 %v5764_v11, %v3552_v1  ;;  %v3084_v9 = vshrl.u32 %v2493_v10, 16  ;;  %v3087_v3 = vshll.u32 %v2493_v10, 16  ;;  %v3091_v8 = vshrl.u32 %v2494_v29, 16  ;;  %v5976_v17 = vpop.f32.mrf.mxu2 }
 0x1f1   : > { %v2789_v46 = vrot.slane %v2787_v26, 3  ;;  %v2792_v51 = vrot.slane %v2790_v22, 4  ;;  %v3094_v52 = vshll.u32 %v2494_v29, 16  ;;  %v1404_v1 = vor.u32 %v1403_v33, %v1400_v39 }
 0x1f2   : > { %v3086_v24 = vrot.slane %v3084_v9, 3  ;;  %v3089_v40 = vrot.slane %v3087_v3, 4  ;;  %v3093_v63 = vrot.slane %v3091_v8, 3  ;;  %v1931_v41 = vrot.slane %v1929_v45, 5  ;;  %v594_v9 = vld [vmem:[#allocation2 + $0x130] sm:$0x1] }
 0x1f3   : > { %v3096_v11 = vrot.slane %v3094_v52, 4  ;;  %1613 = vrot.lane.b32.xlu1 %v5709_v2, %s4806_s14  ;;  %v2793_v59 = vor.u32 %v2792_v51, %v2789_v46  ;;  %1615 = vrot.lane.b32.xlu2 %v1557_v55, %s4806_s14  ;;  %v1754_v26 = vpack.c.b16 %v4365_v21, %v4365_v21  ;;  %v4225_v22 = vunpack.c.h.b16 %v4753_v5  ;;  %v4544_v51 = vld [vmem:[#allocation2 + $0x124] sm:$0x8]  ;;  %v4671_v52 = vld [vmem:[#allocation2 + $0x124] sm:$0xf0]  }
 0x1f4   : > { %v3090_v38 = vor.u32 %v3089_v40, %v3086_v24  ;;  %1311 = vrot.lane.b32.xlu0 %v1752_v57, %s4808_s22  ;;  %v4605_v29 = vor.u32 %v4686_v49, %v4604_v25  ;;  %v5997_v8 = vor.u32 %v1931_v41, %v1928_v44  ;;  %v2050_v39 = vpack.c.b16 %v2034_v23, %v2034_v23 }
 0x1f5   : > { %v3097_v4 = vor.u32 %v3096_v11, %v3093_v63  ;;  %v3553_v12 = vpop.f32.mrf.mxu1  ;;  %v1600_v13 = vpop.permute.xlu1 %1599  ;;  %v2801_v2 = vsel %vm2504_vm4, %v2793_v59, %v2800_v43  ;;  %v3147_v33 = vshrl.u32 %v2092_v34, 16  ;;  %v3150_v46 = vshll.u32 %v2092_v34, 16 }
 0x1f6   : > { %v3554_v53 = vadd.f32 %v3553_v12, %v3465_v37  ;;  %v5989_v7 = vpop.permute.xlu2 %1299  ;;  %v1598_v56 = vpop.permute.xlu0 %1597  ;;  %3486 = vmatmul.bf16.gmra.mxu0 %v2801_v2  ;;  %v1504_v55 = vunpack.c.l.b16 %v594_v9  ;;  %v787_v24 = vpack.c.b16 %v4225_v22, %v4225_v22  ;;  %v2346_v40 = vsel %vm2101_vm2, %v1404_v1, %v1600_v13  ;;  %v4464_v22 = vld [vmem:[#allocation2 + $0xac] sm:$0x8] }
 0x1f7   : > { %v3098_v57 = vsel %vm2504_vm4, %v3090_v38, %v3097_v4  ;;  %v2344_v61 = vsel %vm2101_vm2, %v1404_v1, %v1598_v56  ;;  %v3149_v63 = vrot.slane %v3147_v33, 3  ;;  %v3152_v21 = vrot.slane %v3150_v46, 4 }
 0x1f8   : > { %v5993_v10 = vadd.f32 %v5794_v31, %v3554_v53  ;;  %3605 = vmatmul.bf16.vlgmr.msrb.gmra.mxu3 %v3098_v57  ;;  %v5995_v3 = vpop.f32.mrf.mxu2  ;;  %v2093_v31 = vrot.slane %v2050_v39, 5  ;;  %v1454_v11 = vshrl.u32 %v4754_v20, 16  ;;  %v1457_v59 = vshll.u32 %v4754_v20, 16  ;;  %v4651_v39 = vld [vmem:[#allocation2 + $0xac] sm:$0xf0]  }
 0x1f9   : > { %v2417_v47 = vsel %vm2182_vm3, %v2344_v61, %v5916_v36  ;;  %v4545_v4 = vor.u32 %v4671_v52, %v4544_v51  ;;  %v1520_v44 = vpack.c.b16 %v1504_v55, %v1504_v55  ;;  %v3153_v53 = vor.u32 %v3152_v21, %v3149_v63  ;;  %v6669_v52 = vld [vmem:[#allocation5_spill] sm:$0xff] }
 0x1fa   : > { %v2094_v28 = vsel %vm1028_vm1, %v2092_v34, %v2093_v31  ;;  %v1459_v33 = vrot.slane %v1457_v59, 5  ;;  %v2141_v55 = vsel %vm2101_vm2, %v787_v24, %v6669_v52  ;;  %v4608_v31 = vld [vmem:[#allocation2 + $0x13c] sm:$0x8]  ;;  %v4369_v20 = vunpack.c.h.b16 %v5830_v6 }
 0x1fb   : > { %1807 = vrot.lane.b32.xlu1 %v1754_v26, %s4807_s16  ;;  %1993 = vrot.lane.b32.xlu2 %v5997_v8, %s4808_s22  ;;  %v3155_v12 = vshrl.u32 %v2094_v28, 16  ;;  %v3158_v13 = vshll.u32 %v2094_v28, 16  ;;  %v1559_v63 = vrot.slane %v1520_v44, 5  ;;  %v1937_v28 = vshll.u32 %v5830_v6, 16 }
 0x1fc   : > { %1805 = vrot.lane.b32.xlu0 %v4605_v29, %s4807_s16  ;;  %v1456_v29 = vrot.slane %v1454_v11, 4  ;;  %v6670_v11 = vld [vmem:[#allocation16_spill] sm:$0xff]  ;;  %v4465_v24 = vor.u32 %v4651_v39, %v4464_v22  ;;  %v4755_v22 = vld [vmem:[#allocation2 + $0xc8] sm:$0xff]  }
 0x1fd   : > { %v1986_v43 = vpop.permute.xlu1 %1985  ;;  %v3157_v1 = vrot.slane %v3155_v12, 3  ;;  %v3160_v36 = vrot.slane %v3158_v13, 4  ;;  %v2214_v59 = vsel %vm2182_vm3, %v2141_v55, %v6670_v11  ;;  %v3467_v12 = vpop.f32.mrf.mxu0  ;;  %v1560_v44 = vsel %vm1028_vm1, %v5774_v0, %v1559_v63 }
 0x1fe   : > { %v2475_v37 = vsel %vm2247_vm5, %v2417_v47, %v1986_v43  ;;  %v6009_v38 = vpop.permute.xlu2 %1793  ;;  %v1792_v45 = vpop.permute.xlu0 %1791  ;;  %v1934_v47 = vshrl.u32 %v5830_v6, 16 }
 0x1ff   : > { %v2802_v2 = vshrl.u32 %v2475_v37, 16  ;;  %v2805_v25 = vshll.u32 %v2475_v37, 16  ;;  %v2419_v49 = vsel %vm2182_vm3, %v2346_v40, %v1792_v45  ;;  %v3161_v9 = vor.u32 %v3160_v36, %v3157_v1  ;;  %v4687_v40 = vld [vmem:[#allocation2 + $0x13c] sm:$0xf0]  }
 0x200   : > { %v2476_v23 = vsel %vm2247_vm5, %v2419_v49, %v1986_v43  ;;  %v6013_v5 = vpop.f32.mrf.mxu2  ;;  %v2279_v37 = vsel %vm2247_vm5, %v2214_v59, %v5989_v7  ;;  %v1756_v49 = vpack.c.b16 %v4369_v20, %v4369_v20  ;;  %v1939_v1 = vrot.slane %v1937_v28, 5 }
 0x201   : > { %v2804_v56 = vrot.slane %v2802_v2, 3  ;;  %v2807_v34 = vrot.slane %v2805_v25, 4  ;;  %v2809_v41 = vshrl.u32 %v2476_v23, 16  ;;  %v2812_v57 = vshll.u32 %v2476_v23, 16 }
 0x202   : > { %v3162_v21 = vsel %vm2504_vm4, %v3153_v53, %v3161_v9  ;;  %v4609_v25 = vor.u32 %v4687_v40, %v4608_v31  ;;  %v2841_v6 = vshrl.u32 %v2279_v37, 16  ;;  %v2844_v23 = vshll.u32 %v2279_v37, 16 }
 0x203   : > { %v2811_v61 = vrot.slane %v2809_v41, 3  ;;  %v2814_v46 = vrot.slane %v2812_v57, 4  ;;  %1315 = vrot.lane.b32.xlu1 %v1754_v26, %s4808_s22  ;;  %v2808_v51 = vor.u32 %v2807_v34, %v2804_v56  ;;  %1617 = vrot.lane.b32.xlu2 %v5774_v0, %s4806_s14  ;;  %v1936_v53 = vrot.slane %v1934_v47, 4  ;;  %v6671_v41 = vld [vmem:[#allocation17_spill] sm:$0xff] }
 0x204   : > { %1313 = vrot.lane.b32.xlu0 %v4545_v4, %s4808_s22  ;;  %4166 = vmatmul.msk.bf16.gmra.mxu2 %vm2101_vm2, %v3162_v21  ;;  %v1460_v4 = vor.u32 %v1459_v33, %v1456_v29  ;;  %v2139_v7 = vsel %vm2101_vm2, %v4465_v24, %v6669_v52  ;;  %v3468_v57 = vadd.f32 %v5904_v60, %v3467_v12  ;;  %v1406_v29 = vshrl.u32 %v4755_v22, 16 }
 0x205   : > { %v1818_v26 = vpop.permute.xlu1 %1817  ;;  %v2815_v43 = vor.u32 %v2814_v46, %v2811_v61  ;;  %v2212_v0 = vsel %vm2182_vm3, %v2139_v7, %v6671_v41  ;;  %v2843_v9 = vrot.slane %v2841_v6, 3  ;;  %v2846_v39 = vrot.slane %v2844_v23, 4 }
 0x206   : > { %v1628_v45 = vpop.permute.xlu0 %1627  ;;  %v6030_v13 = vpop.permute.xlu2 %1629  ;;  %v2379_v56 = vsel %vm2101_vm2, %v1460_v4, %v5943_v19  ;;  %v1940_v19 = vor.u32 %v1939_v1, %v1936_v53  ;;  %v1409_v46 = vshll.u32 %v4755_v22, 16 }
 0x207   : > { %v2816_v2 = vsel %vm2504_vm4, %v2808_v51, %v2815_v43  ;;  %v2381_v34 = vsel %vm2101_vm2, %v1460_v4, %v1628_v45  ;;  %v2445_v51 = vsel %vm2182_vm3, %v2379_v56, %v1818_v26  ;;  %v3469_v26 = vpop.f32.mrf.mxu0  ;;  %v2847_v23 = vor.u32 %v2846_v39, %v2843_v9 }
 0x208   : > { %3575 = vmatmul.bf16.gmra.mxu1 %v2816_v2  ;;  %v6035_v36 = vpop.f32.mrf.mxu2  ;;  %v2447_v31 = vsel %vm2182_vm3, %v2381_v34, %v5967_v48  ;;  %v1408_v48 = vrot.slane %v1406_v29, 4 }
 0x20b   : > { %1809 = vrot.lane.b32.xlu1 %v4609_v25, %s4807_s16  ;;  %1811 = vrot.lane.b32.xlu2 %v1756_v49, %s4807_s16  ;;  %v1411_v49 = vrot.slane %v1409_v46, 5 }
 0x20c   : > { %1619 = vrot.lane.b32.xlu0 %v1560_v44, %s4806_s14 }
 0x20d   : > { %v3556_v33 = vpop.f32.mrf.mxu1  ;;  %v1298_v61 = vpop.permute.xlu1 %1297 }
 0x20e   : > { %v3557_v52 = vadd.f32 %v3556_v33, %v3468_v57  ;;  %v2277_v55 = vsel %vm2247_vm5, %v2212_v0, %v1298_v61  ;;  %v2000_v40 = vpop.permute.xlu0 %1999  ;;  %v6057_v45 = vpop.permute.xlu2 %1823  ;;  %v1412_v57 = vor.u32 %v1411_v49, %v1408_v48  ;;  %v4756_v61 = vld [vmem:[#allocation2 + $0xc8] sm:$0xff]   ;;  %v4468_v49 = vld [vmem:[#allocation2 + $0xc4] sm:$0x8] }
 0x20f   : > { %v2834_v63 = vshrl.u32 %v2277_v55, 16  ;;  %v2837_v21 = vshll.u32 %v2277_v55, 16  ;;  %v2496_v20 = vsel %vm2247_vm5, %v2445_v51, %v2000_v40  ;;  %v2497_v11 = vsel %vm2247_vm5, %v2447_v31, %v2000_v40  ;;  %v4757_v40 = vld [vmem:[#allocation2 + $0x170] sm:$0xff]  }
 0x210   : > { %v6055_v59 = vadd.f32 %v5825_v50, %v3557_v52  ;;  %v3131_v43 = vshrl.u32 %v2496_v20, 16  ;;  %v3134_v47 = vshll.u32 %v2496_v20, 16  ;;  %v3138_v28 = vshrl.u32 %v2497_v11, 16  ;;  %v6061_v1 = vpop.f32.mrf.mxu2 }
 0x211   : > { %v2836_v24 = vrot.slane %v2834_v63, 3  ;;  %v2839_v37 = vrot.slane %v2837_v21, 4  ;;  %v3141_v4 = vshll.u32 %v2497_v11, 16  ;;  %v3470_v50 = vadd.f32 %v5904_v60, %v3469_v26 }
 0x212   : > { %v3133_v12 = vrot.slane %v3131_v43, 3  ;;  %v3136_v2 = vrot.slane %v3134_v47, 4  ;;  %v3140_v25 = vrot.slane %v3138_v28, 3  ;;  %v1462_v63 = vshrl.u32 %v4757_v40, 16 }
 0x213   : > { %v3143_v44 = vrot.slane %v3141_v4, 4  ;;  %v2840_v6 = vor.u32 %v2839_v37, %v2836_v24 }
 0x214   : > { %1995 = vrot.lane.b32.xlu0 %v1940_v19, %s4808_s22  ;;  %v3137_v53 = vor.u32 %v3136_v2, %v3133_v12  ;;  %v4229_v19 = vunpack.c.h.b16 %v4756_v61 }
 0x215   : > { %v3558_v7 = vpop.f32.mrf.mxu1  ;;  %v1604_v56 = vpop.permute.xlu1 %1603  ;;  %v2848_v34 = vsel %vm2504_vm4, %v2840_v6, %v2847_v23  ;;  %v3144_v41 = vor.u32 %v3143_v44, %v3140_v25  ;;  %v4652_v44 = vld [vmem:[#allocation2 + $0xc4] sm:$0xf0]   ;;  %v6672_v6 = vld [vmem:[#allocation3_spill] sm:$0xff] }
 0x216   : > { %v3559_v0 = vadd.f32 %v3558_v7, %v3470_v50  ;;  %v1602_v22 = vpop.permute.xlu0 %1601  ;;  %3491 = vmatmul.bf16.gmra.mxu0 %v2848_v34  ;;  %v1304_v33 = vpop.permute.xlu2 %1303  ;;  %v2351_v46 = vsel %vm2101_vm2, %v1412_v57, %v1604_v56  ;;  %v789_v47 = vpack.c.b16 %v4229_v19, %v4229_v19  ;;  %v6673_v7 = vld [vmem:[#allocation19_spill] sm:$0xff] }
 0x217   : > { %v3145_v29 = vsel %vm2504_vm4, %v3137_v53, %v3144_v41  ;;  %v2349_v39 = vsel %vm2101_vm2, %v1412_v57, %v1602_v22 }
 0x218   : > { %v6066_v9 = vadd.f32 %v5856_v14, %v3559_v0  ;;  %3610 = vmatmul.bf16.gmra.mxu3 %v3145_v29  ;;  %v2421_v52 = vsel %vm2182_vm3, %v2349_v39, %v6009_v38  ;;  %v6073_v31 = vpop.f32.mrf.mxu2  ;;  %v1465_v14 = vshll.u32 %v4757_v40, 16  ;;  %v1464_v38 = vrot.slane %v1462_v63, 4  ;;  %v4758_v63 = vld [vmem:[#allocation2 + $0xe0] sm:$0xff]  }
 0x219   : > { %v2146_v23 = vsel %vm2101_vm2, %v789_v47, %v6672_v6  ;;  %v4469_v29 = vor.u32 %v4652_v44, %v4468_v49  ;;  %v1417_v47 = vshll.u32 %v4758_v63, 16 }
 0x21a   : > { %v1467_v48 = vrot.slane %v1465_v14, 5  ;;  %v2218_v56 = vsel %vm2182_vm3, %v2146_v23, %v6673_v7  ;;  %v1414_v14 = vshrl.u32 %v4758_v63, 16 }
 0x21b   : > { %v2283_v57 = vsel %vm2247_vm5, %v2218_v56, %v1304_v33 }
 0x21c   : > { %v3472_v34 = vpop.f32.mrf.mxu0  ;;  %v1468_v0 = vor.u32 %v1467_v48, %v1464_v38  ;;  %v2888_v19 = vshrl.u32 %v2283_v57, 16 }
 0x21d   : > { %v1988_v51 = vpop.permute.xlu1 %1987 }
 0x21e   : > { %v2478_v55 = vsel %vm2247_vm5, %v2421_v52, %v1988_v51  ;;  %v1796_v11 = vpop.permute.xlu0 %1795  ;;  %v6079_v50 = vpop.permute.xlu2 %1797  ;;  %v3473_v52 = vadd.f32 %v5904_v60, %v3472_v34 }
 0x21f   : > { %v2849_v21 = vshrl.u32 %v2478_v55, 16  ;;  %v2852_v20 = vshll.u32 %v2478_v55, 16  ;;  %v2423_v43 = vsel %vm2182_vm3, %v2351_v46, %v1796_v11  ;;  %v2891_v46 = vshll.u32 %v2283_v57, 16  ;;  %v6106_v34 = vpop.f32.mrf.mxu3 }
 0x220   : > { %v2479_v24 = vsel %vm2247_vm5, %v2423_v43, %v1988_v51  ;;  %v6085_v61 = vpop.f32.mrf.mxu2  ;;  %v2384_v51 = vsel %vm2101_vm2, %v1468_v0, %v6030_v13  ;;  %v2144_v55 = vsel %vm2101_vm2, %v4469_v29, %v6672_v6  ;;  %v1416_v6 = vrot.slane %v1414_v14, 4 }
 0x221   : > { %v2851_v28 = vrot.slane %v2849_v21, 3  ;;  %v2854_v26 = vrot.slane %v2852_v20, 4  ;;  %v2856_v37 = vshrl.u32 %v2479_v24, 16  ;;  %v2859_v4 = vshll.u32 %v2479_v24, 16  ;;  %v6674_v21 = vld [vmem:[#allocation12_spill] sm:$0xff] }
 0x222   : > { %v2216_v20 = vsel %vm2182_vm3, %v2144_v55, %v6674_v21 }
 0x223   : > { %v2858_v12 = vrot.slane %v2856_v37, 3  ;;  %v2861_v2 = vrot.slane %v2859_v4, 4  ;;  %v2855_v25 = vor.u32 %v2854_v26, %v2851_v28  ;;  %v2890_v28 = vrot.slane %v2888_v19, 3 }
 0x224   : > { %v2893_v26 = vrot.slane %v2891_v46, 4 }
 0x225   : > { %v1822_v53 = vpop.permute.xlu1 %1821  ;;  %v2862_v41 = vor.u32 %v2861_v2, %v2858_v12 }
 0x226   : > { %v1632_v22 = vpop.permute.xlu0 %1631  ;;  %v2449_v13 = vsel %vm2182_vm3, %v2384_v51, %v1822_v53  ;;  %v6097_v37 = vpop.permute.xlu2 %1633  ;;  %v2894_v57 = vor.u32 %v2893_v26, %v2890_v28  ;;  %v4759_v26 = vld [vmem:[#allocation2 + $0xe0] sm:$0xff]  }
 0x227   : > { %v2863_v39 = vsel %vm2504_vm4, %v2855_v25, %v2862_v41  ;;  %v2386_v40 = vsel %vm2101_vm2, %v1468_v0, %v1632_v22  ;;  %v3474_v25 = vpop.f32.mrf.mxu0  ;;  %v1419_v0 = vrot.slane %v1417_v47, 5 }
 0x228   : > { %3580 = vmatmul.bf16.gmra.mxu1 %v2863_v39  ;;  %v2451_v12 = vsel %vm2182_vm3, %v2386_v40, %v6057_v45  ;;  %v6108_v22 = vpop.f32.mrf.mxu2  ;;  %v3475_v45 = vadd.f32 %v5904_v60, %v3474_v25 }
 0x229   : > { %v1420_v14 = vor.u32 %v1419_v0, %v1416_v6 }
 0x22c   : > { %v3561_v33 = vpop.f32.mrf.mxu1 }
 0x22d   : > { %v3562_v11 = vadd.f32 %v3561_v33, %v3473_v52  ;;  %v1302_v43 = vpop.permute.xlu1 %1301 }
 0x22e   : > { %v2281_v24 = vsel %vm2247_vm5, %v2216_v20, %v1302_v43  ;;  %v2002_v2 = vpop.permute.xlu0 %2001  ;;  %v6116_v47 = vpop.permute.xlu2 %1827 }
 0x22f   : > { %v6100_v4 = vadd.f32 %v5887_v16, %v3562_v11  ;;  %v2881_v38 = vshrl.u32 %v2281_v24, 16  ;;  %v2884_v48 = vshll.u32 %v2281_v24, 16  ;;  %v2499_v49 = vsel %vm2247_vm5, %v2449_v13, %v2002_v2  ;;  %v6119_v24 = vpop.f32.mrf.mxu3 }
 0x230   : > { %v2500_v44 = vsel %vm2247_vm5, %v2451_v12, %v2002_v2  ;;  %v3178_v7 = vshrl.u32 %v2499_v49, 16  ;;  %v3181_v56 = vshll.u32 %v2499_v49, 16  ;;  %v4233_v13 = vunpack.c.h.b16 %v4759_v26 }
 0x231   : > { %v2883_v23 = vrot.slane %v2881_v38, 3  ;;  %v2886_v53 = vrot.slane %v2884_v48, 4  ;;  %v3185_v16 = vshrl.u32 %v2500_v44, 16  ;;  %v3188_v41 = vshll.u32 %v2500_v44, 16  ;;  %v6121_v38 = vpop.f32.mrf.mxu2 }
 0x232   : > { %v3180_v29 = vrot.slane %v3178_v7, 3  ;;  %v3183_v39 = vrot.slane %v3181_v56, 4  ;;  %v791_v25 = vpack.c.b16 %v4233_v13, %v4233_v13  ;;  %v1470_v49 = vshrl.u32 %v5842_v30, 16 }
 0x233   : > { %v2887_v19 = vor.u32 %v2886_v53, %v2883_v23  ;;  %v3187_v46 = vrot.slane %v3185_v16, 3  ;;  %v3190_v51 = vrot.slane %v3188_v41, 4  ;;  %v1473_v7 = vshll.u32 %v5842_v30, 16 }
 0x234   : > { %v3563_v52 = vpop.f32.mrf.mxu1  ;;  %v3184_v63 = vor.u32 %v3183_v39, %v3180_v29  ;;  %v6675_v29 = vld [vmem:[#allocation8_spill] sm:$0xff] }
 0x235   : > { %v3564_v55 = vadd.f32 %v3563_v52, %v3475_v45  ;;  %v1608_v40 = vpop.permute.xlu1 %1607  ;;  %v2895_v33 = vsel %vm2504_vm4, %v2887_v19, %v2894_v57  ;;  %v3191_v21 = vor.u32 %v3190_v51, %v3187_v46  ;;  %v2151_v39 = vsel %vm2101_vm2, %v791_v25, %v6675_v29  ;;  %v4653_v51 = vld [vmem:[#allocation2 + $0xdc] sm:$0xf0]  }
 0x236   : > { %3496 = vmatmul.bf16.gmra.mxu0 %v2895_v33  ;;  %v1606_v11 = vpop.permute.xlu0 %1605  ;;  %v2356_v48 = vsel %vm2101_vm2, %v1420_v14, %v1608_v40  ;;  %v1472_v19 = vrot.slane %v1470_v49, 4  ;;  %v1308_v46 = vpop.permute.xlu2 %1307 }
 0x237   : > { %v6113_v20 = vadd.f32 %v5901_v62, %v3564_v55  ;;  %v3192_v43 = vsel %vm2504_vm4, %v3184_v63, %v3191_v21  ;;  %v2354_v28 = vsel %vm2101_vm2, %v1420_v14, %v1606_v11  ;;  %v6133_v52 = vpop.f32.mrf.mxu3  ;;  %v1475_v55 = vrot.slane %v1473_v7, 5  ;;  %v6676_v63 = vld [vmem:[#allocation13_spill] sm:$0xff] }
 0x238   : > { %3615 = vmatmul.bf16.gmra.mxu3 %v3192_v43  ;;  %v2425_v62 = vsel %vm2182_vm3, %v2354_v28, %v6079_v50  ;;  %v4472_v50 = vld [vmem:[#allocation2 + $0xdc] sm:$0x8]  ;;  %v2222_v14 = vsel %vm2182_vm3, %v2151_v39, %v6676_v63 }
 0x239   : > { %v2287_v28 = vsel %vm2247_vm5, %v2222_v14, %v1308_v46  ;;  %v1476_v25 = vor.u32 %v1475_v55, %v1472_v19 }
 0x23c   : > { %v3477_v44 = vpop.f32.mrf.mxu0 }
 0x23d   : > { %v1990_v12 = vpop.permute.xlu1 %1989  ;;  %v3478_v30 = vadd.f32 %v5904_v60, %v3477_v44  ;;  %v2935_v44 = vshrl.u32 %v2287_v28, 16 }
 0x23e   : > { %v2481_v2 = vsel %vm2247_vm5, %v2425_v62, %v1990_v12  ;;  %v1800_v53 = vpop.permute.xlu0 %1799 }
 0x23f   : > { %v2896_v6 = vshrl.u32 %v2481_v2, 16  ;;  %v2899_v23 = vshll.u32 %v2481_v2, 16  ;;  %v2427_v56 = vsel %vm2182_vm3, %v2356_v48, %v1800_v53  ;;  %v6139_v48 = vpop.f32.mrf.mxu2  ;;  %v671_v2 = vld [vmem:[#allocation2 + $0x190] sm:$0x1]  ;;  %v2938_v53 = vshll.u32 %v2287_v28, 16 }
 0x240   : > { %v2482_v0 = vsel %vm2247_vm5, %v2427_v56, %v1990_v12  ;;  %v4473_v12 = vor.u32 %v4653_v51, %v4472_v50  ;;  %v2035_v7 = vunpack.c.l.b16 %v671_v2  ;;  %v2937_v39 = vrot.slane %v2935_v44, 3 }
 0x241   : > { %v2898_v16 = vrot.slane %v2896_v6, 3  ;;  %v2901_v41 = vrot.slane %v2899_v23, 4  ;;  %v2903_v57 = vshrl.u32 %v2482_v0, 16  ;;  %v2906_v45 = vshll.u32 %v2482_v0, 16 }
 0x242   : > { %v2149_v56 = vsel %vm2101_vm2, %v4473_v12, %v6675_v29  ;;  %v2940_v55 = vrot.slane %v2938_v53, 4 }
 0x243   : > { %v2905_v40 = vrot.slane %v2903_v57, 3  ;;  %v2908_v33 = vrot.slane %v2906_v45, 4  ;;  %v2902_v43 = vor.u32 %v2901_v41, %v2898_v16  ;;  %v2389_v16 = vsel %vm2101_vm2, %v1476_v25, %v6097_v37  ;;  %v4760_v57 = vld [vmem:[#allocation2 + $0xf8] sm:$0xff]   ;;  %v6677_v45 = vld [vmem:[#allocation18_spill] sm:$0xff] }
 0x244   : > { %v3479_v6 = vpop.f32.mrf.mxu0  ;;  %v2220_v50 = vsel %vm2182_vm3, %v2149_v56, %v6677_v45  ;;  %v1425_v51 = vshll.u32 %v4760_v57, 16  ;;  %v4654_v45 = vld [vmem:[#allocation2 + $0xf4] sm:$0xf0]  }
 0x245   : > { %v3566_v21 = vpop.f32.mrf.mxu1  ;;  %v1826_v11 = vpop.permute.xlu1 %1825  ;;  %v2909_v13 = vor.u32 %v2908_v33, %v2905_v40  ;;  %v3480_v41 = vadd.f32 %v5904_v60, %v3479_v6  ;;  %v2051_v40 = vpack.c.b16 %v2035_v7, %v2035_v7 }
 0x246   : > { %v3567_v26 = vadd.f32 %v3566_v21, %v3478_v30  ;;  %v1636_v62 = vpop.permute.xlu0 %1635  ;;  %v6154_v33 = vpop.f32.mrf.mxu3  ;;  %v2453_v60 = vsel %vm2182_vm3, %v2389_v16, %v1826_v11  ;;  %v1427_v53 = vrot.slane %v1425_v51, 5  ;;  %v675_v51 = vld [vmem:[#allocation2 + $0x1a8] sm:$0x1] }
 0x247   : > { %v2910_v23 = vsel %vm2504_vm4, %v2902_v43, %v2909_v13  ;;  %v2391_v0 = vsel %vm2101_vm2, %v1476_v25, %v1636_v62  ;;  %v1802_v43 = vpop.permute.xlu2 %1801  ;;  %v6164_v62 = vpop.f32.mrf.mxu2 }
 0x248   : > { %v6142_v49 = vadd.f32 %v5922_v18, %v3567_v26  ;;  %3585 = vmatmul.bf16.gmra.mxu1 %v2910_v23  ;;  %v1422_v18 = vshrl.u32 %v4760_v57, 16  ;;  %v2455_v14 = vsel %vm2182_vm3, %v2391_v0, %v6116_v47  ;;  %v2941_v47 = vor.u32 %v2940_v55, %v2937_v39  ;;  %v4476_v57 = vld [vmem:[#allocation2 + $0xf4] sm:$0x8] }
 0x249   : > { %v4477_v55 = vor.u32 %v4654_v45, %v4476_v57 }
 0x24a   : > { %v1424_v12 = vrot.slane %v1422_v18, 4 }
 0x24d   : > { %v3568_v19 = vpop.f32.mrf.mxu1  ;;  %v1306_v46 = vpop.permute.xlu1 %1305 }
 0x24e   : > { %v3569_v30 = vadd.f32 %v3568_v19, %v3480_v41  ;;  %v2285_v29 = vsel %vm2247_vm5, %v2220_v50, %v1306_v46  ;;  %v2004_v21 = vpop.permute.xlu0 %2003  ;;  %v1428_v46 = vor.u32 %v1427_v53, %v1424_v12 }
 0x24f   : > { %v2928_v37 = vshrl.u32 %v2285_v29, 16  ;;  %v2931_v63 = vshll.u32 %v2285_v29, 16  ;;  %v2502_v26 = vsel %vm2247_vm5, %v2453_v60, %v2004_v21  ;;  %v2503_v13 = vsel %vm2247_vm5, %v2455_v14, %v2004_v21  ;;  %v6167_v29 = vpop.f32.mrf.mxu3  ;;  %v1310_v14 = vpop.permute.xlu2 %1309 }
 0x250   : > { %v6160_v28 = vadd.f32 %v5948_v27, %v3569_v30  ;;  %v3225_v11 = vshrl.u32 %v2502_v26, 16  ;;  %v3228_v44 = vshll.u32 %v2502_v26, 16  ;;  %v3232_v6 = vshrl.u32 %v2503_v13, 16  ;;  %v6175_v26 = vpop.f32.mrf.mxu2 }
 0x251   : > { %v2930_v2 = vrot.slane %v2928_v37, 3  ;;  %v2933_v25 = vrot.slane %v2931_v63, 4  ;;  %v3235_v23 = vshll.u32 %v2503_v13, 16  ;;  %v2096_v27 = vrot.slane %v2051_v40, 5 }
 0x252   : > { %v3227_v7 = vrot.slane %v3225_v11, 3  ;;  %v3230_v56 = vrot.slane %v3228_v44, 4  ;;  %v3234_v41 = vrot.slane %v3232_v6, 3  ;;  %v3194_v37 = vshrl.u32 %v5845_v54, 16  ;;  %v6678_v44 = vld [vmem:[#allocation7_spill] sm:$0xff] }
 0x253   : > { %v2934_v16 = vor.u32 %v2933_v25, %v2930_v2  ;;  %v3237_v0 = vrot.slane %v3235_v23, 4  ;;  %v2097_v39 = vsel %vm1028_vm1, %v5845_v54, %v2096_v27  ;;  %v3197_v63 = vshll.u32 %v5845_v54, 16  ;;  %v4761_v25 = vld [vmem:[#allocation2 + $0xf8] sm:$0xff]   ;;  %v3482_v45 = vpop.f32.mrf.mxu0 }
 0x254   : > { %v3231_v19 = vor.u32 %v3230_v56, %v3227_v7  ;;  %v3202_v13 = vshrl.u32 %v2097_v39, 16  ;;  %v3205_v12 = vshll.u32 %v2097_v39, 16  ;;  %v2036_v2 = vunpack.c.l.b16 %v675_v51  ;;  %v4762_v39 = vld [vmem:[#allocation2 + $0x1a0] sm:$0xff]  }
 0x255   : > { %v1612_v50 = vpop.permute.xlu1 %1611  ;;  %v2942_v18 = vsel %vm2504_vm4, %v2934_v16, %v2941_v47  ;;  %v3238_v30 = vor.u32 %v3237_v0, %v3234_v41  ;;  %v4237_v11 = vunpack.c.h.b16 %v4761_v25  ;;  %v2154_v6 = vsel %vm2101_vm2, %v4477_v55, %v6678_v44  ;;  %v6679_v0 = vld [vmem:[#allocation21_spill] sm:$0xff] }
 0x256   : > { %3501 = vmatmul.bf16.gmra.mxu0 %v2942_v18  ;;  %v1610_v60 = vpop.permute.xlu0 %1609  ;;  %v2361_v23 = vsel %vm2101_vm2, %v1428_v46, %v1612_v50  ;;  %v3196_v7 = vrot.slane %v3194_v37, 3  ;;  %v3199_v54 = vrot.slane %v3197_v63, 4  ;;  %v3204_v16 = vrot.slane %v3202_v13, 3 }
 0x257   : > { %v3239_v40 = vsel %vm2504_vm4, %v3231_v19, %v3238_v30  ;;  %v2359_v21 = vsel %vm2101_vm2, %v1428_v46, %v1610_v60  ;;  %v3207_v27 = vrot.slane %v3205_v12, 4  ;;  %v2052_v41 = vpack.c.b16 %v2036_v2, %v2036_v2  ;;  %v6186_v51 = vpop.f32.mrf.mxu3  ;;  %v1616_v12 = vpop.permute.xlu2 %1615 }
 0x258   : > { %3620 = vmatmul.bf16.gmra.mxu3 %v3239_v40  ;;  %v2429_v47 = vsel %vm2182_vm3, %v2359_v21, %v1802_v43  ;;  %v2224_v57 = vsel %vm2182_vm3, %v2154_v6, %v6679_v0  ;;  %v793_v60 = vpack.c.b16 %v4237_v11, %v4237_v11  ;;  %v2098_v50 = vrot.slane %v4762_v39, 5 }
 0x259   : > { %v2289_v43 = vsel %vm2247_vm5, %v2224_v57, %v1310_v14  ;;  %v3200_v63 = vor.u32 %v3199_v54, %v3196_v7  ;;  %v3208_v2 = vor.u32 %v3207_v27, %v3204_v16  ;;  %v2099_v25 = vrot.slane %v2052_v41, 5  ;;  %v6193_v57 = vpop.f32.mrf.mxu2 }
 0x25a   : > { %v2975_v11 = vshrl.u32 %v2289_v43, 16  ;;  %v2978_v6 = vshll.u32 %v2289_v43, 16 }
 0x25b   : > { %v3209_v16 = vsel %vm2504_vm4, %v3200_v63, %v3208_v2  ;;  %v2100_v41 = vsel %vm1028_vm1, %v2098_v50, %v2099_v25  ;;  %v3484_v63 = vpop.f32.mrf.mxu0 }
 0x25c   : > { %v2980_v39 = vrot.slane %v2978_v6, 4  ;;  %v3249_v2 = vshrl.u32 %v2100_v41, 16  ;;  %v3252_v25 = vshll.u32 %v2100_v41, 16 }
 0x25d   : > { %v1992_v53 = vpop.permute.xlu1 %1991 }
 0x25e   : > { %v2484_v56 = vsel %vm2247_vm5, %v2429_v47, %v1992_v53  ;;  %v1804_v30 = vpop.permute.xlu0 %1803  ;;  %v6190_v47 = vld [vmem:[%s4876_s30] ss:$0 sm:$0xff]  ;;  %v3251_v41 = vrot.slane %v3249_v2, 3 }
 0x25f   : > { %v2943_v18 = vshrl.u32 %v2484_v56, 16  ;;  %v2946_v19 = vshll.u32 %v2484_v56, 16  ;;  %v2431_v46 = vsel %vm2182_vm3, %v2361_v23, %v1804_v30  ;;  %v3483_v14 = vadd.f32 %v6190_v47, %v3482_v45 }
 0x260   : > { %v2485_v37 = vsel %vm2247_vm5, %v2431_v46, %v1992_v53  ;;  %v2156_v53 = vsel %vm2101_vm2, %v793_v60, %v6678_v44  ;;  %v2977_v45 = vrot.slane %v2975_v11, 3  ;;  %v3241_v46 = vshrl.u32 %v2098_v50, 16  ;;  %v4764_v11 = vld [vmem:[#allocation2 + $0x110] sm:$0xff]  }
 0x261   : > { %v2945_v55 = vrot.slane %v2943_v18, 3  ;;  %v2948_v40 = vrot.slane %v2946_v19, 4  ;;  %v2950_v21 = vshrl.u32 %v2485_v37, 16  ;;  %v2953_v13 = vshll.u32 %v2485_v37, 16  ;;  %v6680_v19 = vld [vmem:[#allocation20_spill] sm:$0xff]  ;;  %v6206_v37 = vpop.f32.mrf.mxu3 }
 0x262   : > { %v2226_v30 = vsel %vm2182_vm3, %v2156_v53, %v6680_v19  ;;  %v4241_v6 = vunpack.c.h.b16 %v4764_v11  ;;  %v3243_v53 = vrot.slane %v3241_v46, 3 }
 0x263   : > { %v2952_v56 = vrot.slane %v2950_v21, 3  ;;  %v2955_v23 = vrot.slane %v2953_v13, 4  ;;  %v2949_v0 = vor.u32 %v2948_v40, %v2945_v55  ;;  %v3244_v40 = vshll.u32 %v2098_v50, 16  ;;  %v1994_v50 = vpop.permute.xlu2 %1993 }
 0x265   : > { %v3571_v7 = vpop.f32.mrf.mxu1  ;;  %v1614_v54 = vpop.permute.xlu1 %1613  ;;  %v2956_v27 = vor.u32 %v2955_v23, %v2952_v56  ;;  %v2366_v56 = vsel %vm2101_vm2, %v5946_v32, %v1616_v12  ;;  %v3485_v23 = vadd.f32 %v6190_v47, %v3484_v63  ;;  %v795_v12 = vpack.c.b16 %v4241_v6, %v4241_v6 }
 0x266   : > { %v3572_v18 = vadd.f32 %v3571_v7, %v3483_v14  ;;  %v1312_v43 = vpop.permute.xlu0 %1311  ;;  %v3246_v7 = vrot.slane %v3244_v40, 4 }
 0x267   : > { %v2291_v44 = vsel %vm2247_vm5, %v2226_v30, %v1312_v43  ;;  %v2957_v60 = vsel %vm2504_vm4, %v2949_v0, %v2956_v27  ;;  %v2981_v0 = vor.u32 %v2980_v39, %v2977_v45  ;;  %v3254_v30 = vrot.slane %v3252_v25, 4  ;;  %v4480_v43 = vld [vmem:[#allocation2 + $0x10c] sm:$0x8]  ;;  %v6217_v39 = vpop.f32.mrf.mxu2 }
 0x268   : > { %v6202_v55 = vadd.f32 %v5976_v17, %v3572_v18  ;;  %v2982_v21 = vshrl.u32 %v2291_v44, 16  ;;  %v2985_v13 = vshll.u32 %v2291_v44, 16  ;;  %4167 = vmatmul.msk.bf16.vlgmr.msra.gmra.mxu3 %vm2101_vm2, %v3209_v16  ;;  %3590 = vmatmul.bf16.gmra.mxu1 %v2957_v60  ;;  %v2364_v18 = vsel %vm2101_vm2, %v5946_v32, %v1614_v54  ;;  %v4655_v44 = vld [vmem:[#allocation2 + $0x10c] sm:$0xf0]  }
 0x269   : > { %v4481_v2 = vor.u32 %v4655_v44, %v4480_v43  ;;  %v3247_v11 = vor.u32 %v3246_v7, %v3243_v53  ;;  %v3255_v6 = vor.u32 %v3254_v30, %v3251_v41  ;;  %v6682_v30 = vld [vmem:[#allocation15_spill] sm:$0xff] }
 0x26a   : > { %v2984_v14 = vrot.slane %v2982_v21, 3  ;;  %v2987_v17 = vrot.slane %v2985_v13, 4 }
 0x26b   : > { %v3256_v7 = vsel %vm2504_vm4, %v3247_v11, %v3255_v6  ;;  %v1618_v11 = vpop.permute.xlu2 %1617 }
 0x26c   : > { %v2988_v19 = vor.u32 %v2987_v17, %v2984_v14 }
 0x26d   : > { %v3573_v16 = vpop.f32.mrf.mxu1  ;;  %v1808_v27 = vpop.permute.xlu1 %1807 }
 0x26e   : > { %v3574_v60 = vadd.f32 %v3573_v16, %v3485_v23  ;;  %v2435_v21 = vsel %vm2182_vm3, %v2366_v56, %v1808_v27  ;;  %v1806_v13 = vpop.permute.xlu0 %1805  ;;  %v2989_v45 = vsel %vm2504_vm4, %v2981_v0, %v2988_v19  ;;  %v6224_v0 = vpop.f32.mrf.mxu3  ;;  %v6681_v16 = vld [vmem:[#allocation4_spill] sm:$0xff] }
 0x26f   : > { %v2488_v63 = vsel %vm2247_vm5, %v2435_v21, %v1994_v50  ;;  %v2433_v54 = vsel %vm2182_vm3, %v2364_v18, %v1806_v13  ;;  %3506 = vmatmul.bf16.gmra.mxu0 %v2989_v45 }
 0x270   : > { %v6220_v32 = vadd.f32 %v5995_v3, %v3574_v60  ;;  %v2997_v46 = vshrl.u32 %v2488_v63, 16  ;;  %v3000_v40 = vshll.u32 %v2488_v63, 16  ;;  %v2487_v25 = vsel %vm2247_vm5, %v2433_v54, %v1994_v50 }
 0x271   : > { %v2990_v14 = vshrl.u32 %v2487_v25, 16  ;;  %v2993_v17 = vshll.u32 %v2487_v25, 16  ;;  %v2161_v3 = vsel %vm2101_vm2, %v795_v12, %v6681_v16  ;;  %v2159_v50 = vsel %vm2101_vm2, %v4481_v2, %v6681_v16  ;;  %v3695_v2 = vpop.f32.mrf.mxu2 }
 0x272   : > { %v2999_v56 = vrot.slane %v2997_v46, 3  ;;  %v3002_v23 = vrot.slane %v3000_v40, 4  ;;  %v2230_v60 = vsel %vm2182_vm3, %v2161_v3, %v5449_v58  ;;  %v2228_v44 = vsel %vm2182_vm3, %v2159_v50, %v6682_v30 }
 0x273   : > { %v2992_v27 = vrot.slane %v2990_v14, 3  ;;  %v2995_v19 = vrot.slane %v2993_v17, 4  ;;  %v3518_v25 = vadd.f32 %v6190_v47, %v6106_v34  ;;  %v1812_v30 = vpop.permute.xlu2 %1811 }
 0x274   : > { %v3003_v18 = vor.u32 %v3002_v23, %v2999_v56 }
 0x275   : > { %v1316_v43 = vpop.permute.xlu1 %1315  ;;  %v2996_v41 = vor.u32 %v2995_v19, %v2992_v27  ;;  %v3487_v27 = vpop.f32.mrf.mxu0 }
 0x276   : > { %v2295_v53 = vsel %vm2247_vm5, %v2230_v60, %v1316_v43  ;;  %v1314_v13 = vpop.permute.xlu0 %1313  ;;  %v3520_v60 = vadd.f32 %v6190_v47, %v6119_v24  ;;  %v3488_v34 = vadd.f32 %v6190_v47, %v3487_v27 }
 0x277   : > { %v3029_v21 = vshrl.u32 %v2295_v53, 16  ;;  %v3032_v12 = vshll.u32 %v2295_v53, 16  ;;  %v2293_v63 = vsel %vm2247_vm5, %v2228_v44, %v1314_v13  ;;  %v3004_v45 = vsel %vm2504_vm4, %v2996_v41, %v3003_v18 }
 0x278   : > { %v3022_v46 = vshrl.u32 %v2293_v63, 16  ;;  %v3025_v40 = vshll.u32 %v2293_v63, 16  ;;  %4168 = vmatmul.msk.bf16.gmra.mxu3 %vm2101_vm2, %v3256_v7  ;;  %3595 = vmatmul.bf16.gmra.mxu1 %v3004_v45  ;;  %v2369_v53 = vsel %vm2101_vm2, %v5997_v8, %v1618_v11 }
 0x279   : > { %v3031_v58 = vrot.slane %v3029_v21, 3  ;;  %v3034_v54 = vrot.slane %v3032_v12, 4  ;;  %v3697_v50 = vpop.f32.mrf.mxu2 }
 0x27a   : > { %v3024_v6 = vrot.slane %v3022_v46, 3  ;;  %v3027_v14 = vrot.slane %v3025_v40, 4 }
 0x27b   : > { %v3606_v17 = vpop.f32.mrf.mxu3  ;;  %v3035_v56 = vor.u32 %v3034_v54, %v3031_v58 }
 0x27c   : > { %v3607_v23 = vadd.f32 %v3606_v17, %v3518_v25  ;;  %v3028_v16 = vor.u32 %v3027_v14, %v3024_v6 }
 0x27d   : > { %v1810_v7 = vpop.permute.xlu1 %1809  ;;  %v3489_v40 = vpop.f32.mrf.mxu0 }
 0x27e   : > { %v6241_v3 = vadd.f32 %v3695_v2, %v3607_v23  ;;  %v1620_v19 = vpop.permute.xlu0 %1619  ;;  %v3036_v18 = vsel %vm2504_vm4, %v3028_v16, %v3035_v56  ;;  %v2437_v63 = vsel %vm2182_vm3, %v2369_v53, %v1810_v7  ;;  %v3490_v23 = vadd.f32 %v6190_v47, %v3489_v40 }
 0x27f   : > { %3511 = vmatmul.bf16.gmra.mxu0 %v3036_v18  ;;  %v2371_v41 = vsel %vm2101_vm2, %v5997_v8, %v1620_v19 }
 0x280   : > { %v2439_v24 = vsel %vm2182_vm3, %v2371_v41, %v1812_v30  ;;  %v3525_v30 = vadd.f32 %v6190_v47, %v6154_v33 }
 0x283   : > { %v3608_v43 = vpop.f32.mrf.mxu3 }
 0x284   : > { %v3609_v44 = vadd.f32 %v3608_v43, %v3520_v60 }
 0x285   : > { %v3576_v21 = vpop.f32.mrf.mxu1 }
 0x286   : > { %v6251_v12 = vadd.f32 %v3697_v50, %v3609_v44  ;;  %v3577_v13 = vadd.f32 %v3576_v21, %v3488_v34  ;;  %v1996_v45 = vpop.permute.xlu0 %1995  ;;  %v3523_v50 = vadd.f32 %v6190_v47, %v6133_v52 }
 0x287   : > { %v2490_v54 = vsel %vm2247_vm5, %v2437_v63, %v1996_v45  ;;  %v2491_v46 = vsel %vm2247_vm5, %v2439_v24, %v1996_v45  ;;  %v3700_v43 = vpop.f32.mrf.mxu2 }
 0x288   : > { %v6256_v58 = vadd.f32 %v6013_v5, %v3577_v13  ;;  %v3037_v8 = vshrl.u32 %v2490_v54, 16  ;;  %v3040_v2 = vshll.u32 %v2490_v54, 16  ;;  %v3044_v25 = vshrl.u32 %v2491_v46, 16 }
 0x289   : > { %v3047_v11 = vshll.u32 %v2491_v46, 16 }
 0x28a   : > { %v3039_v6 = vrot.slane %v3037_v8, 3  ;;  %v3042_v14 = vrot.slane %v3040_v2, 4  ;;  %v3046_v17 = vrot.slane %v3044_v25, 3 }
 0x28b   : > { %v3049_v56 = vrot.slane %v3047_v11, 4 }
 0x28c   : > { %v3043_v27 = vor.u32 %v3042_v14, %v3039_v6 }
 0x28d   : > { %v3578_v16 = vpop.f32.mrf.mxu1  ;;  %v3050_v19 = vor.u32 %v3049_v56, %v3046_v17 }
 0x28e   : > { %v3579_v5 = vadd.f32 %v3578_v16, %v3490_v23 }
 0x28f   : > { %v3051_v18 = vsel %vm2504_vm4, %v3043_v27, %v3050_v19  ;;  %v3702_v21 = vpop.f32.mrf.mxu2 }
 0x290   : > { %v6263_v60 = vadd.f32 %v6035_v36, %v3579_v5  ;;  %3600 = vmatmul.bf16.gmra.mxu1 %v3051_v18 }
 0x293   : > { %v3492_v41 = vpop.f32.mrf.mxu0 }
 0x294   : > { %v3493_v63 = vadd.f32 %v6190_v47, %v3492_v41 }
 0x29b   : > { %v3611_v34 = vpop.f32.mrf.mxu3  ;;  %v3494_v52 = vpop.f32.mrf.mxu0 }
 0x29c   : > { %v3612_v53 = vadd.f32 %v3611_v34, %v3523_v50  ;;  %v3495_v46 = vadd.f32 %v6190_v47, %v3494_v52 }
 0x29e   : > { %v6267_v7 = vadd.f32 %v3700_v43, %v3612_v53 }
 0x2a3   : > { %v3613_v44 = vpop.f32.mrf.mxu3 }
 0x2a4   : > { %v3614_v13 = vadd.f32 %v3613_v44, %v3525_v30 }
 0x2a5   : > { %v3581_v24 = vpop.f32.mrf.mxu1 }
 0x2a6   : > { %v6272_v36 = vadd.f32 %v3702_v21, %v3614_v13  ;;  %v3582_v45 = vadd.f32 %v3581_v24, %v3493_v63 }
 0x2a8   : > { %v6275_v54 = vadd.f32 %v6061_v1, %v3582_v45  ;;  %v3530_v45 = vadd.f32 %v6190_v47, %v6186_v51 }
 0x2ad   : > { %v3583_v40 = vpop.f32.mrf.mxu1 }
 0x2ae   : > { %v3584_v8 = vadd.f32 %v3583_v40, %v3495_v46 }
 0x2b0   : > { %v6279_v2 = vadd.f32 %v6073_v31, %v3584_v8 }
 0x2b3   : > { %v3497_v33 = vpop.f32.mrf.mxu0 }
 0x2b4   : > { %v3498_v25 = vadd.f32 %v6190_v47, %v3497_v33 }
 0x2bb   : > { %v3616_v14 = vpop.f32.mrf.mxu3  ;;  %v3499_v56 = vpop.f32.mrf.mxu0 }
 0x2bc   : > { %v3500_v1 = vadd.f32 %v6190_v47, %v3499_v56 }
 0x2c3   : > { %v3618_v19 = vpop.f32.mrf.mxu3 }
 0x2c4   : > { %v3619_v46 = vadd.f32 %v3618_v19, %v3530_v45 }
 0x2c5   : > { %v3586_v11 = vpop.f32.mrf.mxu1 }
 0x2c6   : > { %v3587_v6 = vadd.f32 %v3586_v11, %v3498_v25  ;;  %v3533_v25 = vadd.f32 %v6190_v47, %v6206_v37 }
 0x2c8   : > { %v6283_v17 = vadd.f32 %v6085_v61, %v3587_v6  ;;  %v3528_v61 = vadd.f32 %v6190_v47, %v6167_v29 }
 0x2ca   : > { %v3617_v30 = vadd.f32 %v3616_v14, %v3528_v61 }
 0x2cd   : > { %v3588_v23 = vpop.f32.mrf.mxu1 }
 0x2ce   : > { %v3589_v16 = vadd.f32 %v3588_v23, %v3500_v1 }
 0x2d0   : > { %v6287_v27 = vadd.f32 %v6108_v22, %v3589_v16  ;;  %v3535_v16 = vadd.f32 %v6190_v47, %v6224_v0 }
 0x2d3   : > { %v3502_v5 = vpop.f32.mrf.mxu0 }
 0x2d4   : > { %v3503_v43 = vadd.f32 %v6190_v47, %v3502_v5 }
 0x2db   : > { %v3621_v31 = vpop.f32.mrf.mxu3  ;;  %v3504_v53 = vpop.f32.mrf.mxu0 }
 0x2dc   : > { %v3505_v22 = vadd.f32 %v6190_v47, %v3504_v53  ;;  %v3622_v14 = vadd.f32 %v3621_v31, %v3533_v25 }
 0x2e3   : > { %v3623_v18 = vpop.f32.mrf.mxu3 }
 0x2e4   : > { %v3624_v5 = vadd.f32 %v3623_v18, %v3535_v16 }
 0x2e5   : > { %v3591_v50 = vpop.f32.mrf.mxu1 }
 0x2e6   : > { %v3592_v34 = vadd.f32 %v3591_v50, %v3503_v43 }
 0x2e8   : > { %v6293_v41 = vadd.f32 %v6121_v38, %v3592_v34 }
 0x2eb   : > { %v3705_v44 = vpop.f32.mrf.mxu3 }
 0x2ec   : > { %v6296_v21 = vadd.f32 %v3705_v44, %v3617_v30  ;;  %v3507_v24 = vpop.f32.mrf.mxu0 }
 0x2ed   : > { %v3593_v13 = vpop.f32.mrf.mxu1  ;;  %v3508_v38 = vadd.f32 %v6190_v47, %v3507_v24 }
 0x2ee   : > { %v3594_v63 = vadd.f32 %v3593_v13, %v3505_v22 }
 0x2f0   : > { %v6301_v52 = vadd.f32 %v6139_v48, %v3594_v63 }
 0x2f3   : > { %v3707_v29 = vpop.f32.mrf.mxu3 }
 0x2f4   : > { %v6304_v40 = vadd.f32 %v3707_v29, %v3619_v46  ;;  %v3509_v6 = vpop.f32.mrf.mxu0 }
 0x2f5   : > { %v3596_v8 = vpop.f32.mrf.mxu1  ;;  %v3510_v48 = vadd.f32 %v6190_v47, %v3509_v6 }
 0x2f6   : > { %v3597_v33 = vadd.f32 %v3596_v8, %v3508_v38 }
 0x2f8   : > { %v6309_v11 = vadd.f32 %v6164_v62, %v3597_v33 }
 0x2fb   : > { %v3710_v51 = vpop.f32.mrf.mxu3 }
 0x2fc   : > { %v6312_v56 = vadd.f32 %v3710_v51, %v3622_v14  ;;  %v3512_v62 = vpop.f32.mrf.mxu0 }
 0x2fd   : > { %v3598_v1 = vpop.f32.mrf.mxu1  ;;  %v3513_v31 = vadd.f32 %v6190_v47, %v3512_v62 }
 0x2fe   : > { %v3599_v23 = vadd.f32 %v3598_v1, %v3510_v48 }
 0x300   : > { %v6317_v19 = vadd.f32 %v6175_v26, %v3599_v23 }
 0x303   : > { %v3712_v37 = vpop.f32.mrf.mxu3 }
 0x304   : > { %v6319_v43 = vadd.f32 %v3712_v37, %v3624_v5  ;;  %v3514_v61 = vpop.f32.mrf.mxu0 }
 0x305   : > { %v3515_v30 = vadd.f32 %v6190_v47, %v3514_v61 }
 0x30d   : > { %v3601_v50 = vpop.f32.mrf.mxu1 }
 0x30e   : > { %v3602_v34 = vadd.f32 %v3601_v50, %v3513_v31 }
 0x310   : > { %v6323_v53 = vadd.f32 %v6193_v57, %v3602_v34 }
 0x314   : > { %3718 = sbr.rel (%p4169_p8) target bundleno = 829 (0x33d), region = 40 }
 0x315   : > { %v3603_v44 = vpop.f32.mrf.mxu1 }
 0x316   : > { %v3604_v0 = vadd.f32 %v3603_v44, %v3515_v30 }
 0x318   : > { %v6327_v26 = vadd.f32 %v6217_v39, %v3604_v0 }
 0x319   : > { %v3719_v18 = vmax.f32 %v5925_v35, 0.0  ;;  %v3720_v22 = vmax.f32 %v5951_v42, 0.0  ;;  %v3721_v13 = vmax.f32 %v5974_v15, 0.0  ;;  %vm3783_vm6 = vcmask 257024  }
 0x31a   : > { %v3722_v57 = vmax.f32 %v5993_v10, 0.0  ;;  %v3723_v63 = vmax.f32 %v6055_v59, 0.0  ;;  %v3724_v47 = vmax.f32 %v6066_v9, 0.0  ;;  %v3725_v46 = vmax.f32 %v6100_v4, 0.0 }
 0x31b   : > { %v3751_v24 = vpack.c.bf16 %v3719_v18, %v3719_v18  ;;  %v3752_v45 = vpack.c.bf16 %v3720_v22, %v3720_v22  ;;  %v3753_v39 = vpack.c.bf16 %v3721_v13, %v3721_v13  ;;  %v3726_v38 = vmax.f32 %v6113_v20, 0.0 }
 0x31c   : > { %v3754_v29 = vpack.c.bf16 %v3722_v57, %v3722_v57  ;;  %v3755_v8 = vpack.c.bf16 %v3723_v63, %v3723_v63  ;;  %v3727_v33 = vmax.f32 %v6142_v49, 0.0  ;;  %v3756_v25 = vpack.c.bf16 %v3724_v47, %v3724_v47 }
 0x31d   : > { %3784 = vst.msk [vmem:[#allocation2 + $0x20] sm:$0xf] %vm3783_vm6, %v3751_v24  ;;  %v3728_v6 = vmax.f32 %v6160_v28, 0.0  ;;  %v3757_v14 = vpack.c.bf16 %v3725_v46, %v3725_v46  ;;  %v3729_v51 = vmax.f32 %v6202_v55, 0.0  ;;  %v3758_v48 = vpack.c.bf16 %v3726_v38, %v3726_v38 }
 0x31e   : > { %3785 = vst.msk [vmem:[#allocation2 + $0x24] sm:$0xf] %vm3783_vm6, %v3752_v45  ;;  %v3730_v1 = vmax.f32 %v6220_v32, 0.0  ;;  %v3759_v23 = vpack.c.bf16 %v3727_v33, %v3727_v33  ;;  %v3731_v16 = vmax.f32 %v6256_v58, 0.0  ;;  %v3732_v37 = vmax.f32 %v6263_v60, 0.0 }
 0x31f   : > { %3786 = vst.msk [vmem:[#allocation2 + $0x38] sm:$0xf] %vm3783_vm6, %v3753_v39  ;;  %v3760_v5 = vpack.c.bf16 %v3728_v6, %v3728_v6  ;;  %v3761_v62 = vpack.c.bf16 %v3729_v51, %v3729_v51  ;;  %v3733_v31 = vmax.f32 %v6275_v54, 0.0  ;;  %v3734_v34 = vmax.f32 %v6279_v2, 0.0 }
 0x320   : > { %3787 = vst.msk [vmem:[#allocation2 + $0x3c] sm:$0xf] %vm3783_vm6, %v3754_v29  ;;  %v3762_v50 = vpack.c.bf16 %v3730_v1, %v3730_v1  ;;  %v3763_v61 = vpack.c.bf16 %v3731_v16, %v3731_v16  ;;  %v3735_v30 = vmax.f32 %v6283_v17, 0.0  ;;  %v3764_v44 = vpack.c.bf16 %v3732_v37, %v3732_v37 }
 0x321   : > { %3788 = vst.msk [vmem:[#allocation2 + $0x50] sm:$0xf] %vm3783_vm6, %v3755_v8  ;;  %v3736_v0 = vmax.f32 %v6287_v27, 0.0  ;;  %v3765_v18 = vpack.c.bf16 %v3733_v31, %v3733_v31  ;;  %v3737_v22 = vmax.f32 %v6293_v41, 0.0  ;;  %v3766_v13 = vpack.c.bf16 %v3734_v34, %v3734_v34 }
 0x322   : > { %3789 = vst.msk [vmem:[#allocation2 + $0x54] sm:$0xf] %vm3783_vm6, %v3756_v25  ;;  %v3738_v57 = vmax.f32 %v6301_v52, 0.0  ;;  %v3767_v63 = vpack.c.bf16 %v3735_v30, %v3735_v30  ;;  %v3739_v47 = vmax.f32 %v6309_v11, 0.0  ;;  %v3740_v45 = vmax.f32 %v6317_v19, 0.0 }
 0x323   : > { %3790 = vst.msk [vmem:[#allocation2 + $0x68] sm:$0xf] %vm3783_vm6, %v3757_v14  ;;  %v3768_v24 = vpack.c.bf16 %v3736_v0, %v3736_v0  ;;  %v3769_v39 = vpack.c.bf16 %v3737_v22, %v3737_v22  ;;  %v3741_v46 = vmax.f32 %v6323_v53, 0.0  ;;  %v3742_v38 = vmax.f32 %v6327_v26, 0.0 }
 0x324   : > { %3791 = vst.msk [vmem:[#allocation2 + $0x6c] sm:$0xf] %vm3783_vm6, %v3758_v48  ;;  %v3770_v29 = vpack.c.bf16 %v3738_v57, %v3738_v57  ;;  %v3771_v8 = vpack.c.bf16 %v3739_v47, %v3739_v47  ;;  %v3743_v33 = vmax.f32 %v6241_v3, 0.0  ;;  %v3772_v25 = vpack.c.bf16 %v3740_v45, %v3740_v45 }
 0x325   : > { %3792 = vst.msk [vmem:[#allocation2 + $0x80] sm:$0xf] %vm3783_vm6, %v3759_v23  ;;  %v3744_v6 = vmax.f32 %v6251_v12, 0.0  ;;  %v3773_v14 = vpack.c.bf16 %v3741_v46, %v3741_v46  ;;  %v3745_v51 = vmax.f32 %v6267_v7, 0.0  ;;  %v3774_v48 = vpack.c.bf16 %v3742_v38, %v3742_v38 }
 0x326   : > { %3793 = vst.msk [vmem:[#allocation2 + $0x84] sm:$0xf] %vm3783_vm6, %v3760_v5  ;;  %v3746_v1 = vmax.f32 %v6272_v36, 0.0  ;;  %v3775_v23 = vpack.c.bf16 %v3743_v33, %v3743_v33  ;;  %v3747_v16 = vmax.f32 %v6296_v21, 0.0  ;;  %v3748_v37 = vmax.f32 %v6304_v40, 0.0 }
 0x327   : > { %3794 = vst.msk [vmem:[#allocation2 + $0x98] sm:$0xf] %vm3783_vm6, %v3761_v62  ;;  %v3776_v5 = vpack.c.bf16 %v3744_v6, %v3744_v6  ;;  %v3777_v62 = vpack.c.bf16 %v3745_v51, %v3745_v51  ;;  %v3749_v31 = vmax.f32 %v6312_v56, 0.0  ;;  %v3750_v34 = vmax.f32 %v6319_v43, 0.0 }
 0x328   : > { %3795 = vst.msk [vmem:[#allocation2 + $0x9c] sm:$0xf] %vm3783_vm6, %v3762_v50  ;;  %v3778_v50 = vpack.c.bf16 %v3746_v1, %v3746_v1  ;;  %v3780_v30 = vpack.c.bf16 %v3748_v37, %v3748_v37 }
 0x329   : > { %3796 = vst.msk [vmem:[#allocation2 + $0xb0] sm:$0xf] %vm3783_vm6, %v3763_v61  ;;  %v3779_v61 = vpack.c.bf16 %v3747_v16, %v3747_v16  ;;  %v3782_v0 = vpack.c.bf16 %v3750_v34, %v3750_v34 }
 0x32a   : > { %3797 = vst.msk [vmem:[#allocation2 + $0xb4] sm:$0xf] %vm3783_vm6, %v3764_v44  ;;  %v3781_v44 = vpack.c.bf16 %v3749_v31, %v3749_v31 }
 0x32b   : > { %3798 = vst.msk [vmem:[#allocation2 + $0xc8] sm:$0xf] %vm3783_vm6, %v3765_v18 }
 0x32c   : > { %3799 = vst.msk [vmem:[#allocation2 + $0xcc] sm:$0xf] %vm3783_vm6, %v3766_v13 }
 0x32d   : > { %3800 = vst.msk [vmem:[#allocation2 + $0xe0] sm:$0xf] %vm3783_vm6, %v3767_v63 }
 0x32e   : > { %3801 = vst.msk [vmem:[#allocation2 + $0xe4] sm:$0xf] %vm3783_vm6, %v3768_v24 }
 0x32f   : > { %3802 = vst.msk [vmem:[#allocation2 + $0xf8] sm:$0xf] %vm3783_vm6, %v3769_v39 }
 0x330   : > { %3803 = vst.msk [vmem:[#allocation2 + $0xfc] sm:$0xf] %vm3783_vm6, %v3770_v29 }
 0x331   : > { %3804 = vst.msk [vmem:[#allocation2 + $0x110] sm:$0xf] %vm3783_vm6, %v3771_v8 }
 0x332   : > { %3805 = vst.msk [vmem:[#allocation2 + $0x114] sm:$0xf] %vm3783_vm6, %v3772_v25 }
 0x333   : > { %3806 = vst.msk [vmem:[#allocation2 + $0x128] sm:$0xf] %vm3783_vm6, %v3773_v14 }
 0x334   : > { %3807 = vst.msk [vmem:[#allocation2 + $0x12c] sm:$0xf] %vm3783_vm6, %v3774_v48 }
 0x335   : > { %3808 = vst.msk [vmem:[#allocation2 + $0x140] sm:$0xf] %vm3783_vm6, %v3775_v23 }
 0x336   : > { %3809 = vst.msk [vmem:[#allocation2 + $0x144] sm:$0xf] %vm3783_vm6, %v3776_v5 }
 0x337   : > { %3810 = vst.msk [vmem:[#allocation2 + $0x158] sm:$0xf] %vm3783_vm6, %v3777_v62 }
 0x338   : > { %3811 = vst.msk [vmem:[#allocation2 + $0x15c] sm:$0xf] %vm3783_vm6, %v3778_v50 }
 0x339   : > { %3812 = vst.msk [vmem:[#allocation2 + $0x170] sm:$0xf] %vm3783_vm6, %v3779_v61 }
 0x33a   : > { %3813 = vst.msk [vmem:[#allocation2 + $0x174] sm:$0xf] %vm3783_vm6, %v3780_v30 }
 0x33b   : > { %3814 = vst.msk [vmem:[#allocation2 + $0x188] sm:$0xf] %vm3783_vm6, %v3781_v44 }
 0x33c   : > { %3815 = vst.msk [vmem:[#allocation2 + $0x18c] sm:$0xf] %vm3783_vm6, %v3782_v0 }
 0x33d PF: > { %p4170_p9 = scmp.ne.s32.totalorder %s4787_s15, 15 }
 0x33f   : > { %3819 = sbr.rel (%p4170_p9) target bundleno = 900 (0x384), region = 44 }
 0x344   : > { %3820 = vst.msk [vmem:[%s4881_s7] sm:$0xff] %vm2101_vm2, %v5925_v35  ;;  %v3852_v18 = vld [vmem:[%s4871_s26] sm:$0xff]  ;;  %v3853_v22 = vld [vmem:[%s4871_s26 + $0x8] sm:$0xff]  ;;  %v3854_v13 = vld [vmem:[%s4871_s26 + $0x10] sm:$0xff] }
 0x345   : > { %3821 = vst.msk [vmem:[%s4881_s7 + $0x8] sm:$0xff] %vm2101_vm2, %v5951_v42  ;;  %v3884_v57 = vadd.f32 %v3852_v18, %v5925_v35  ;;  %v3855_v63 = vld [vmem:[%s4871_s26 + $0x18] sm:$0xff]  ;;  %v3885_v47 = vadd.f32 %v3853_v22, %v5951_v42  ;;  %v3856_v24 = vld [vmem:[%s4871_s26 + $0x20] sm:$0xff]  ;;  %v3886_v45 = vadd.f32 %v3854_v13, %v5974_v15  ;;  %v3857_v39 = vld [vmem:[%s4871_s26 + $0x28] sm:$0xff] }
 0x346   : > { %3822 = vst.msk [vmem:[%s4881_s7 + $0x10] sm:$0xff] %vm2101_vm2, %v5974_v15  ;;  %v3887_v35 = vadd.f32 %v3855_v63, %v5993_v10  ;;  %v3858_v46 = vld [vmem:[%s4871_s26 + $0x30] sm:$0xff]  ;;  %v3888_v42 = vadd.f32 %v3856_v24, %v6055_v59  ;;  %v3859_v29 = vld [vmem:[%s4871_s26 + $0x38] sm:$0xff]  ;;  %v3889_v15 = vadd.f32 %v3857_v39, %v6066_v9  ;;  %v3860_v38 = vld [vmem:[%s4871_s26 + $0x40] sm:$0xff] }
 0x347   : > { %3823 = vst.msk [vmem:[%s4881_s7 + $0x18] sm:$0xff] %vm2101_vm2, %v5993_v10  ;;  %v3890_v10 = vadd.f32 %v3858_v46, %v6100_v4  ;;  %v3861_v8 = vld [vmem:[%s4871_s26 + $0x48] sm:$0xff]  ;;  %v3862_v33 = vld [vmem:[%s4871_s26 + $0x50] sm:$0xff]  ;;  %v3863_v25 = vld [vmem:[%s4871_s26 + $0x58] sm:$0xff] }
 0x348   : > { %3824 = vst.msk [vmem:[%s4881_s7 + $0x20] sm:$0xff] %vm2101_vm2, %v6055_v59  ;;  %v3891_v59 = vadd.f32 %v3859_v29, %v6113_v20  ;;  %v3864_v6 = vld [vmem:[%s4871_s26 + $0x60] sm:$0xff]  ;;  %v3865_v14 = vld [vmem:[%s4871_s26 + $0x68] sm:$0xff]  ;;  %v3866_v51 = vld [vmem:[%s4871_s26 + $0x70] sm:$0xff] }
 0x349   : > { %3825 = vst.msk [vmem:[%s4881_s7 + $0x28] sm:$0xff] %vm2101_vm2, %v6066_v9  ;;  %v3892_v9 = vadd.f32 %v3860_v38, %v6142_v49  ;;  %v3867_v48 = vld [vmem:[%s4871_s26 + $0x78] sm:$0xff]  ;;  %v3868_v1 = vld [vmem:[%s4871_s26 + $0x80] sm:$0xff]  ;;  %v3869_v23 = vld [vmem:[%s4871_s26 + $0x88] sm:$0xff] }
 0x34a   : > { %3826 = vst.msk [vmem:[%s4881_s7 + $0x30] sm:$0xff] %vm2101_vm2, %v6100_v4  ;;  %v3893_v4 = vadd.f32 %v3861_v8, %v6160_v28  ;;  %v3870_v16 = vld [vmem:[%s4871_s26 + $0x90] sm:$0xff]  ;;  %v3871_v5 = vld [vmem:[%s4871_s26 + $0x98] sm:$0xff]  ;;  %v3872_v37 = vld [vmem:[%s4871_s26 + $0xa0] sm:$0xff] }
 0x34b   : > { %3827 = vst.msk [vmem:[%s4881_s7 + $0x38] sm:$0xff] %vm2101_vm2, %v6113_v20  ;;  %v3894_v20 = vadd.f32 %v3862_v33, %v6202_v55  ;;  %v3873_v62 = vld [vmem:[%s4871_s26 + $0xa8] sm:$0xff]  ;;  %v3874_v31 = vld [vmem:[%s4871_s26 + $0xb0] sm:$0xff]  ;;  %v3875_v50 = vld [vmem:[%s4871_s26 + $0xb8] sm:$0xff] }
 0x34c   : > { %3828 = vst.msk [vmem:[%s4881_s7 + $0x40] sm:$0xff] %vm2101_vm2, %v6142_v49  ;;  %v3895_v49 = vadd.f32 %v3863_v25, %v6220_v32  ;;  %v3876_v34 = vld [vmem:[%s4871_s26 + $0xc0] sm:$0xff]  ;;  %v3877_v61 = vld [vmem:[%s4871_s26 + $0xc8] sm:$0xff]  ;;  %v3878_v30 = vld [vmem:[%s4871_s26 + $0xd0] sm:$0xff] }
 0x34d   : > { %3829 = vst.msk [vmem:[%s4881_s7 + $0x48] sm:$0xff] %vm2101_vm2, %v6160_v28  ;;  %v3896_v28 = vadd.f32 %v3864_v6, %v6256_v58  ;;  %v3879_v44 = vld [vmem:[%s4871_s26 + $0xd8] sm:$0xff]  ;;  %v3880_v0 = vld [vmem:[%s4871_s26 + $0xe0] sm:$0xff]  ;;  %v3881_v18 = vld [vmem:[%s4871_s26 + $0xe8] sm:$0xff] }
 0x34e   : > { %3830 = vst.msk [vmem:[%s4881_s7 + $0x50] sm:$0xff] %vm2101_vm2, %v6202_v55  ;;  %v3897_v55 = vadd.f32 %v3865_v14, %v6263_v60  ;;  %v3882_v22 = vld [vmem:[%s4871_s26 + $0xf0] sm:$0xff]  ;;  %v3912_v13 = vadd.f32 %v3880_v0, %v6296_v21 }
 0x34f   : > { %3831 = vst.msk [vmem:[%s4881_s7 + $0x58] sm:$0xff] %vm2101_vm2, %v6220_v32  ;;  %v3898_v32 = vadd.f32 %v3866_v51, %v6275_v54 }
 0x350   : > { %3832 = vst.msk [vmem:[%s4881_s7 + $0x60] sm:$0xff] %vm2101_vm2, %v6256_v58  ;;  %v3899_v58 = vadd.f32 %v3867_v48, %v6279_v2 }
 0x351   : > { %3833 = vst.msk [vmem:[%s4881_s7 + $0x68] sm:$0xff] %vm2101_vm2, %v6263_v60  ;;  %v3900_v60 = vadd.f32 %v3868_v1, %v6283_v17 }
 0x352   : > { %3834 = vst.msk [vmem:[%s4881_s7 + $0x70] sm:$0xff] %vm2101_vm2, %v6275_v54  ;;  %v3901_v54 = vadd.f32 %v3869_v23, %v6287_v27 }
 0x353   : > { %3835 = vst.msk [vmem:[%s4881_s7 + $0x78] sm:$0xff] %vm2101_vm2, %v6279_v2  ;;  %v3902_v2 = vadd.f32 %v3870_v16, %v6293_v41 }
 0x354   : > { %3836 = vst.msk [vmem:[%s4881_s7 + $0x80] sm:$0xff] %vm2101_vm2, %v6283_v17  ;;  %v3903_v17 = vadd.f32 %v3871_v5, %v6301_v52 }
 0x355   : > { %3837 = vst.msk [vmem:[%s4881_s7 + $0x88] sm:$0xff] %vm2101_vm2, %v6287_v27  ;;  %v3904_v27 = vadd.f32 %v3872_v37, %v6309_v11 }
 0x356   : > { %3838 = vst.msk [vmem:[%s4881_s7 + $0x90] sm:$0xff] %vm2101_vm2, %v6293_v41  ;;  %v3905_v41 = vadd.f32 %v3873_v62, %v6317_v19 }
 0x357   : > { %3839 = vst.msk [vmem:[%s4881_s7 + $0x98] sm:$0xff] %vm2101_vm2, %v6301_v52  ;;  %v3906_v52 = vadd.f32 %v3874_v31, %v6323_v53 }
 0x358   : > { %3840 = vst.msk [vmem:[%s4881_s7 + $0xa0] sm:$0xff] %vm2101_vm2, %v6309_v11  ;;  %v3907_v11 = vadd.f32 %v3875_v50, %v6327_v26 }
 0x359   : > { %3841 = vst.msk [vmem:[%s4881_s7 + $0xa8] sm:$0xff] %vm2101_vm2, %v6317_v19  ;;  %v3908_v19 = vadd.f32 %v3876_v34, %v6241_v3 }
 0x35a   : > { %3842 = vst.msk [vmem:[%s4881_s7 + $0xb0] sm:$0xff] %vm2101_vm2, %v6323_v53  ;;  %v3909_v53 = vadd.f32 %v3877_v61, %v6251_v12 }
 0x35b   : > { %3843 = vst.msk [vmem:[%s4881_s7 + $0xb8] sm:$0xff] %vm2101_vm2, %v6327_v26  ;;  %v3910_v26 = vadd.f32 %v3878_v30, %v6267_v7 }
 0x35c   : > { %3844 = vst.msk [vmem:[%s4881_s7 + $0xc0] sm:$0xff] %vm2101_vm2, %v6241_v3  ;;  %v3911_v3 = vadd.f32 %v3879_v44, %v6272_v36 }
 0x35d   : > { %3845 = vst.msk [vmem:[%s4881_s7 + $0xc8] sm:$0xff] %vm2101_vm2, %v6251_v12  ;;  %v3883_v12 = vld [vmem:[%s4871_s26 + $0xf8] sm:$0xff] }
 0x35e   : > { %3846 = vst.msk [vmem:[%s4881_s7 + $0xd0] sm:$0xff] %vm2101_vm2, %v6267_v7  ;;  %v3914_v7 = vadd.f32 %v3882_v22, %v6312_v56  ;;  %v3915_v63 = vadd.f32 %v3883_v12, %v6319_v43 }
 0x35f   : > { %3847 = vst.msk [vmem:[%s4881_s7 + $0xd8] sm:$0xff] %vm2101_vm2, %v6272_v36 }
 0x360   : > { %3848 = vst.msk [vmem:[%s4881_s7 + $0xe0] sm:$0xff] %vm2101_vm2, %v6296_v21 }
 0x361   : > { %3849 = vst.msk [vmem:[%s4881_s7 + $0xe8] sm:$0xff] %vm2101_vm2, %v6304_v40 }
 0x362   : > { %3850 = vst.msk [vmem:[%s4881_s7 + $0xf0] sm:$0xff] %vm2101_vm2, %v6312_v56 }
 0x363   : > { %3851 = vst.msk [vmem:[%s4881_s7 + $0xf8] sm:$0xff] %vm2101_vm2, %v6319_v43 }
 0x364   : > { %3916 = vst.msk [vmem:[%s4891_s13] sm:$0xff] %vm2101_vm2, %v3884_v57  ;;  %v3913_v57 = vadd.f32 %v3881_v18, %v6304_v40 }
 0x365   : > { %3917 = vst.msk [vmem:[%s4891_s13 + $0x8] sm:$0xff] %vm2101_vm2, %v3885_v47 }
 0x366   : > { %3918 = vst.msk [vmem:[%s4891_s13 + $0x10] sm:$0xff] %vm2101_vm2, %v3886_v45 }
 0x367   : > { %3919 = vst.msk [vmem:[%s4891_s13 + $0x18] sm:$0xff] %vm2101_vm2, %v3887_v35 }
 0x368   : > { %3920 = vst.msk [vmem:[%s4891_s13 + $0x20] sm:$0xff] %vm2101_vm2, %v3888_v42 }
 0x369   : > { %3921 = vst.msk [vmem:[%s4891_s13 + $0x28] sm:$0xff] %vm2101_vm2, %v3889_v15 }
 0x36a   : > { %3922 = vst.msk [vmem:[%s4891_s13 + $0x30] sm:$0xff] %vm2101_vm2, %v3890_v10 }
 0x36b   : > { %3923 = vst.msk [vmem:[%s4891_s13 + $0x38] sm:$0xff] %vm2101_vm2, %v3891_v59 }
 0x36c   : > { %3924 = vst.msk [vmem:[%s4891_s13 + $0x40] sm:$0xff] %vm2101_vm2, %v3892_v9 }
 0x36d   : > { %3925 = vst.msk [vmem:[%s4891_s13 + $0x48] sm:$0xff] %vm2101_vm2, %v3893_v4 }
 0x36e   : > { %3926 = vst.msk [vmem:[%s4891_s13 + $0x50] sm:$0xff] %vm2101_vm2, %v3894_v20 }
 0x36f   : > { %3927 = vst.msk [vmem:[%s4891_s13 + $0x58] sm:$0xff] %vm2101_vm2, %v3895_v49 }
 0x370   : > { %3928 = vst.msk [vmem:[%s4891_s13 + $0x60] sm:$0xff] %vm2101_vm2, %v3896_v28 }
 0x371   : > { %3929 = vst.msk [vmem:[%s4891_s13 + $0x68] sm:$0xff] %vm2101_vm2, %v3897_v55 }
 0x372   : > { %3930 = vst.msk [vmem:[%s4891_s13 + $0x70] sm:$0xff] %vm2101_vm2, %v3898_v32 }
 0x373   : > { %3931 = vst.msk [vmem:[%s4891_s13 + $0x78] sm:$0xff] %vm2101_vm2, %v3899_v58 }
 0x374   : > { %3932 = vst.msk [vmem:[%s4891_s13 + $0x80] sm:$0xff] %vm2101_vm2, %v3900_v60 }
 0x375   : > { %3933 = vst.msk [vmem:[%s4891_s13 + $0x88] sm:$0xff] %vm2101_vm2, %v3901_v54 }
 0x376   : > { %3934 = vst.msk [vmem:[%s4891_s13 + $0x90] sm:$0xff] %vm2101_vm2, %v3902_v2 }
 0x377   : > { %3935 = vst.msk [vmem:[%s4891_s13 + $0x98] sm:$0xff] %vm2101_vm2, %v3903_v17 }
 0x378   : > { %3936 = vst.msk [vmem:[%s4891_s13 + $0xa0] sm:$0xff] %vm2101_vm2, %v3904_v27 }
 0x379   : > { %3937 = vst.msk [vmem:[%s4891_s13 + $0xa8] sm:$0xff] %vm2101_vm2, %v3905_v41 }
 0x37a   : > { %3938 = vst.msk [vmem:[%s4891_s13 + $0xb0] sm:$0xff] %vm2101_vm2, %v3906_v52 }
 0x37b   : > { %3939 = vst.msk [vmem:[%s4891_s13 + $0xb8] sm:$0xff] %vm2101_vm2, %v3907_v11 }
 0x37c   : > { %3940 = vst.msk [vmem:[%s4891_s13 + $0xc0] sm:$0xff] %vm2101_vm2, %v3908_v19 }
 0x37d   : > { %3941 = vst.msk [vmem:[%s4891_s13 + $0xc8] sm:$0xff] %vm2101_vm2, %v3909_v53 }
 0x37e   : > { %3942 = vst.msk [vmem:[%s4891_s13 + $0xd0] sm:$0xff] %vm2101_vm2, %v3910_v26 }
 0x37f   : > { %3943 = vst.msk [vmem:[%s4891_s13 + $0xd8] sm:$0xff] %vm2101_vm2, %v3911_v3 }
 0x380   : > { %3944 = vst.msk [vmem:[%s4891_s13 + $0xe0] sm:$0xff] %vm2101_vm2, %v3912_v13 }
 0x381   : > { %3945 = vst.msk [vmem:[%s4891_s13 + $0xe8] sm:$0xff] %vm2101_vm2, %v3913_v57 }
 0x382   : > { %3946 = vst.msk [vmem:[%s4891_s13 + $0xf0] sm:$0xff] %vm2101_vm2, %v3914_v7 }
 0x383   : > { %3947 = vst.msk [vmem:[%s4891_s13 + $0xf8] sm:$0xff] %vm2101_vm2, %v3915_v63 }
 0x384 PF: > { %s15_s19 = sadd.s32 1, %s4803_s19   ;;  %s6683_s15 = smov %s4795_s17 }
 0x385   : > { %p12_p10 = scmp.ge.s32.totalorder %s15_s19, 34   ;;  %s6684_s16 = smov %s4799_s18 }
 0x386   : > { %s6685_s17 = smov %s6688_s20  ;;  %s6686_s18 = smov %s6692_s21 }
 0x387   :  { %14 = sbr.rel (!%p12_p10) target bundleno = 3 (0x3), region = 96 }

</bundles_post_ra>
